<compile_context>
chip_gen: v7x
topology: tpu7x:2x2x1
jax: 0.10.0
libtpu: 0.0.40
codegen_flags: <defaults>
</compile_context>

<pallas_src>
import functools

import jax
import jax.numpy as jnp
import numpy as np
from jax.experimental import pallas as pl
from jax.experimental.pallas import tpu as pltpu

NKV = 49        # pooled kv tokens: AdaptiveAvgPool2d(7) -> 7*7
NKV_PAD = 64    # sublane-friendly padding; masked with an additive -1e30 row


# ------------------------------ in-kernel helpers ----------------------------
def _ln_rows(x, g, b, eps):
    """Row-wise LayerNorm in f32.  x: (M, C), g/b: (C,)."""
    mu = jnp.mean(x, axis=-1, keepdims=True)
    xc = x - mu
    var = jnp.mean(xc * xc, axis=-1, keepdims=True)
    return xc * jax.lax.rsqrt(var + eps) * g.astype(jnp.float32) + b.astype(jnp.float32)


def _erf_f32(x):
    # Abramowitz & Stegun 7.1.26 (max abs err ~1.5e-7); avoids relying on a
    # lax.erf lowering inside Mosaic, uses only exp/mul/add (EUP/VPU).
    a1, a2, a3, a4, a5 = 0.254829592, -0.284496736, 1.421413741, -1.453152027, 1.061405429
    p = 0.3275911
    ax = jnp.abs(x)
    t = 1.0 / (1.0 + p * ax)
    poly = ((((a5 * t + a4) * t + a3) * t + a2) * t + a1) * t
    y = 1.0 - poly * jnp.exp(-ax * ax)
    return jnp.where(x >= 0.0, y, -y)


def _gelu_f32(x):
    # exact-erf GELU (torch nn.GELU default), computed in f32.
    return 0.5 * x * (1.0 + _erf_f32(x * 0.7071067811865476))


def _pick_row_tile(m):
    for t in (512, 256, 128, 64, 32, 16, 8):
        if m % t == 0 and m // t >= 4:
            return t
    for t in (512, 256, 128, 64, 32, 16, 8):
        if m % t == 0:
            return t
    return m


# ------------------------ patch embed: matmul + bias + LN --------------------
def _patch_embed_kernel(c_ref, w_ref, b_ref, g_ref, bb_ref, o_ref, *, eps):
    y = jnp.dot(c_ref[...].astype(jnp.bfloat16), w_ref[...],
                preferred_element_type=jnp.float32) + b_ref[0, :]
    y = _ln_rows(y, g_ref[0, :], bb_ref[0, :], eps)
    o_ref[...] = y.astype(o_ref.dtype)


def patch_embed(cols, w_bf16, bias, gamma, beta, eps):
    M, Kp = cols.shape
    C = w_bf16.shape[1]
    tm = _pick_row_tile(M)
    return pl.pallas_call(
        functools.partial(_patch_embed_kernel, eps=eps),
        out_shape=jax.ShapeDtypeStruct((M, C), jnp.float32),
        grid_spec=pltpu.PrefetchScalarGridSpec(
            num_scalar_prefetch=0,
            grid=(M // tm,),
            in_specs=[
                pl.BlockSpec((tm, Kp), lambda i: (i, 0)),
                pl.BlockSpec((Kp, C), lambda i: (0, 0)),
                pl.BlockSpec((1, C), lambda i: (0, 0)),
                pl.BlockSpec((1, C), lambda i: (0, 0)),
                pl.BlockSpec((1, C), lambda i: (0, 0)),
            ],
            out_specs=pl.BlockSpec((tm, C), lambda i: (i, 0)),
        ),
        compiler_params=pltpu.CompilerParams(dimension_semantics=("parallel",)),
    )(cols, w_bf16, bias, gamma, beta)


# ------------------------------- final LayerNorm ------------------------------
def _ln_kernel(x_ref, g_ref, b_ref, o_ref, *, eps):
    y = _ln_rows(x_ref[...].astype(jnp.float32), g_ref[0, :], b_ref[0, :], eps)
    o_ref[...] = y.astype(o_ref.dtype)


def layernorm_rows(x2d, gamma, beta, eps):
    M, C = x2d.shape
    tm = _pick_row_tile(M)
    return pl.pallas_call(
        functools.partial(_ln_kernel, eps=eps),
        out_shape=jax.ShapeDtypeStruct((M, C), x2d.dtype),
        grid_spec=pltpu.PrefetchScalarGridSpec(
            num_scalar_prefetch=0,
            grid=(M // tm,),
            in_specs=[
                pl.BlockSpec((tm, C), lambda i: (i, 0)),
                pl.BlockSpec((1, C), lambda i: (0, 0)),
                pl.BlockSpec((1, C), lambda i: (0, 0)),
            ],
            out_specs=pl.BlockSpec((tm, C), lambda i: (i, 0)),
        ),
        compiler_params=pltpu.CompilerParams(dimension_semantics=("parallel",)),
    )(x2d, gamma, beta)


# ----------------- fused attention branch (one kernel per batch) --------------
def _attn_block_kernel(x_ref, g1_ref, b1_ref, wq_ref, pmat_ref, wsr_ref, bsr_ref,
                       gs_ref, bs_ref, wkv_ref, wpr_ref, bpr_ref, mask_ref, o_ref,
                       *, heads, d, scale):
    x = x_ref[0].astype(jnp.float32)                                  # (N, C)
    xn = _ln_rows(x, g1_ref[0, :], b1_ref[0, :], 1e-6)                # norm1
    xnb = xn.astype(jnp.bfloat16)

    q = jnp.dot(xnb, wq_ref[...], preferred_element_type=jnp.float32)  # (N, C)

    # pooled kv path: AdaptiveAvgPool2d(7) folded into a matmul, sr 1x1, LN, GELU, kv
    xp = jnp.dot(pmat_ref[...], xnb, preferred_element_type=jnp.float32)          # (NKV_PAD, C)
    xp = jnp.dot(xp.astype(jnp.bfloat16), wsr_ref[...],
                 preferred_element_type=jnp.float32) + bsr_ref[0, :]
    xp = _ln_rows(xp, gs_ref[0, :], bs_ref[0, :], 1e-5)
    xp = _gelu_f32(xp)
    kv = jnp.dot(xp.astype(jnp.bfloat16), wkv_ref[...],
                 preferred_element_type=jnp.float32)                               # (NKV_PAD, 2C)

    C = heads * d
    add_mask = mask_ref[0, :]                                          # (NKV_PAD,) 0 / -1e30
    head_outs = []
    for h in range(heads):
        qh = q[:, h * d:(h + 1) * d].astype(jnp.bfloat16)
        kh = kv[:, h * d:(h + 1) * d].astype(jnp.bfloat16)
        vh = kv[:, C + h * d:C + (h + 1) * d].astype(jnp.bfloat16)
        s = jax.lax.dot_general(qh, kh, (((1,), (1,)), ((), ())),
                                preferred_element_type=jnp.float32) * scale
        s = s + add_mask
        m = jnp.max(s, axis=-1, keepdims=True)
        p = jnp.exp(s - m)
        l = jnp.sum(p, axis=-1, keepdims=True)
        oh = jnp.dot(p.astype(jnp.bfloat16), vh, preferred_element_type=jnp.float32)
        head_outs.append(oh * pl.reciprocal(l, approx=True))          # deferred softmax norm
    o = head_outs[0] if heads == 1 else jnp.concatenate(head_outs, axis=-1)
    o = jnp.dot(o.astype(jnp.bfloat16), wpr_ref[...],
                preferred_element_type=jnp.float32) + bpr_ref[0, :]
    o_ref[0] = (x + o).astype(o_ref.dtype)                            # fused residual add


def _attn_block_call(x, blk, pmat, mask, *, heads, d, scale):
    B, N, C = x.shape
    kern = functools.partial(_attn_block_kernel, heads=heads, d=d, scale=scale)
    # TODO(synk): for large-N stages, add a token-tile grid axis for the q/attention
    # part (pooled kv kept in scratch) so v7x gets >=4 parallel grid steps.
    return pl.pallas_call(
        kern,
        out_shape=jax.ShapeDtypeStruct((B, N, C), x.dtype),
        grid_spec=pltpu.PrefetchScalarGridSpec(
            num_scalar_prefetch=0,
            grid=(B,),
            in_specs=[
                pl.BlockSpec((1, N, C), lambda b: (b, 0, 0)),
                pl.BlockSpec((1, C), lambda b: (0, 0)),          # norm1 gamma
                pl.BlockSpec((1, C), lambda b: (0, 0)),          # norm1 beta
                pl.BlockSpec((C, C), lambda b: (0, 0)),          # wq
                pl.BlockSpec((NKV_PAD, N), lambda b: (0, 0)),    # pooling matrix
                pl.BlockSpec((C, C), lambda b: (0, 0)),          # wsr (1x1 conv)
                pl.BlockSpec((1, C), lambda b: (0, 0)),          # bsr
                pl.BlockSpec((1, C), lambda b: (0, 0)),          # attn norm gamma
                pl.BlockSpec((1, C), lambda b: (0, 0)),          # attn norm beta
                pl.BlockSpec((C, 2 * C), lambda b: (0, 0)),      # wkv
                pl.BlockSpec((C, C), lambda b: (0, 0)),          # wproj
                pl.BlockSpec((1, C), lambda b: (0, 0)),          # bproj
                pl.BlockSpec((1, NKV_PAD), lambda b: (0, 0)),    # additive kv mask
            ],
            out_specs=pl.BlockSpec((1, N, C), lambda b: (b, 0, 0)),
        ),
        compiler_params=pltpu.CompilerParams(dimension_semantics=("parallel",)),
    )(x, blk["norm1_g"], blk["norm1_b"], blk["wq"], pmat, blk["wsr"], blk["bsr"],
      blk["attn_norm_g"], blk["attn_norm_b"], blk["wkv"], blk["wproj"],
      blk["bproj"], mask)


# -------------------- fused MLP branch (one kernel per batch) -----------------
def _mlp_block_kernel(x_ref, g2_ref, b2_ref, w1_ref, b1_ref, wdw_ref, bdw_ref,
                      w2_ref, bb2_ref, o_ref, hp_ref, *, H, W, hidden, pad_rows, eps):
    N = H * W
    x = x_ref[0].astype(jnp.float32)                                  # (N, C)
    xn = _ln_rows(x, g2_ref[0, :], b2_ref[0, :], eps)                 # norm2
    h = jnp.dot(xn.astype(jnp.bfloat16), w1_ref[...],
                preferred_element_type=jnp.float32) + b1_ref[0, :]    # (N, hidden) fc1

    # zero the halo rows of the scratch only once (they are never overwritten)
    @pl.when(pl.program_id(0) == 0)
    def _():
        hp_ref[0:pad_rows, :] = jnp.zeros((pad_rows, hidden), jnp.float32)
        hp_ref[pad_rows + N:pad_rows + N + pad_rows, :] = jnp.zeros(
            (pad_rows, hidden), jnp.float32)

    # interior stored at a sublane-aligned offset; taps use shifted slice loads
    hp_ref[pad_rows:pad_rows + N, :] = h

    rx = jax.lax.broadcasted_iota(jnp.int32, (N, 1), 0) % W
    left_ok = rx >= 1
    right_ok = rx <= W - 2
    wdw = wdw_ref[...].astype(jnp.float32)                            # (9, hidden)

    acc = jnp.zeros((N, hidden), jnp.float32)
    for dy in (-1, 0, 1):
        for dx in (-1, 0, 1):
            t = (dy + 1) * 3 + (dx + 1)
            s = dy * W + dx
            sh = hp_ref[pad_rows + s:pad_rows + s + N, :]             # flattened-token shift
            if dx == -1:
                sh = jnp.where(left_ok, sh, 0.0)
            elif dx == 1:
                sh = jnp.where(right_ok, sh, 0.0)
            acc = acc + sh * wdw[t, :]
    acc = _gelu_f32(acc + bdw_ref[0, :])
    y = jnp.dot(acc.astype(jnp.bfloat16), w2_ref[...],
                preferred_element_type=jnp.float32) + bb2_ref[0, :]   # fc2
    o_ref[0] = (x + y).astype(o_ref.dtype)                            # fused residual add


def _mlp_block_call(x, blk, *, H, W):
    B, N, C = x.shape
    hidden = blk["w1"].shape[1]
    pad_rows = ((W + 1 + 7) // 8) * 8
    kern = functools.partial(_mlp_block_kernel, H=H, W=W, hidden=hidden,
                             pad_rows=pad_rows, eps=1e-6)
    # TODO(synk): for large feature maps, tile H with halo rows so VMEM stays
    # bounded and v7x gets more than B parallel grid steps.
    return pl.pallas_call(
        kern,
        out_shape=jax.ShapeDtypeStruct((B, N, C), x.dtype),
        grid_spec=pltpu.PrefetchScalarGridSpec(
            num_scalar_prefetch=0,
            grid=(B,),
            in_specs=[
                pl.BlockSpec((1, N, C), lambda b: (b, 0, 0)),
                pl.BlockSpec((1, C), lambda b: (0, 0)),          # norm2 gamma
                pl.BlockSpec((1, C), lambda b: (0, 0)),          # norm2 beta
                pl.BlockSpec((C, hidden), lambda b: (0, 0)),     # fc1 w
                pl.BlockSpec((1, hidden), lambda b: (0, 0)),     # fc1 b
                pl.BlockSpec((9, hidden), lambda b: (0, 0)),     # dw taps
                pl.BlockSpec((1, hidden), lambda b: (0, 0)),     # dw bias
                pl.BlockSpec((hidden, C), lambda b: (0, 0)),     # fc2 w
                pl.BlockSpec((1, C), lambda b: (0, 0)),          # fc2 b
            ],
            out_specs=pl.BlockSpec((1, N, C), lambda b: (b, 0, 0)),
            scratch_shapes=[pltpu.VMEM((2 * pad_rows + N, hidden), jnp.float32)],
        ),
        compiler_params=pltpu.CompilerParams(dimension_semantics=("parallel",)),
    )(x, blk["norm2_g"], blk["norm2_b"], blk["w1"], blk["b1"], blk["wdw"],
      blk["bdw"], blk["w2"], blk["b2"])


# --------------------------------- JAX glue -----------------------------------
def _im2col(x_nchw, ksize, stride, pad):
    B, Cin, Hin, Win = x_nchw.shape
    xp = jnp.pad(x_nchw, ((0, 0), (0, 0), (pad, pad), (pad, pad)))
    Hout = (Hin + 2 * pad - ksize) // stride + 1
    Wout = (Win + 2 * pad - ksize) // stride + 1
    cols = []
    for kh in range(ksize):
        for kw in range(ksize):
            cols.append(xp[:, :, kh:kh + (Hout - 1) * stride + 1:stride,
                           kw:kw + (Wout - 1) * stride + 1:stride])
    cols = jnp.stack(cols, axis=2)                       # (B, Cin, K*K, Ho, Wo)
    cols = cols.transpose(0, 3, 4, 1, 2).reshape(B, Hout * Wout,
                                                 Cin * ksize * ksize)
    return cols, Hout, Wout


def _pool_matrix(in_size, out_size):
    P = np.zeros((out_size, in_size), np.float32)
    for i in range(out_size):
        start = (i * in_size) // out_size
        end = -(-((i + 1) * in_size) // out_size)
        P[i, start:end] = 1.0 / (end - start)
    return P


def _adaptive_avg_pool(img_bhwc, out_size):
    B, H, W, C = img_bhwc.shape
    Ph = jnp.asarray(_pool_matrix(H, out_size))
    Pw = jnp.asarray(_pool_matrix(W, out_size))
    pooled = jnp.einsum('bhwc,ph->bpwc', img_bhwc, Ph)
    pooled = jnp.einsum('bpwc,qw->bpqc', pooled, Pw)
    return pooled                                        # (B, 7, 7, C)


# ----------------------------- PVT layer forward ------------------------------
def pvt_layer_forward(x_nchw, lp, cfg):
    """One PVTLayerv2: OverlapPatchEmbed -> depths x EncoderBlockv2 -> LN -> NCHW."""
    B = x_nchw.shape[0]
    c2, heads = cfg["embed_dims"], cfg["num_heads"]
    ps, st = cfg["patch_size"], cfg["stride"]
    d = c2 // heads
    scale = d ** (-0.5)

    # OverlapPatchEmbed: conv(k=ps, s=st, p=ps//2) as im2col + fused matmul+bias+LN.
    cols, H, W = _im2col(x_nchw, ps, st, ps // 2)        # (B, N, Cin*ps*ps)
    N = H * W
    K = cols.shape[-1]
    Kp = lp["patch_w"].shape[0]
    cols = jnp.pad(cols.reshape(B * N, K), ((0, 0), (0, Kp - K)))
    x = patch_embed(cols, lp["patch_w"], lp["patch_b"],
                    lp["patch_norm_g"], lp["patch_norm_b"], eps=1e-5)
    x = x.reshape(B, N, c2)

    # Compile-time constants: flattened pooling matrix (AdaptiveAvgPool2d(7)
    # as a linear map over tokens) and the additive kv padding mask.
    P = np.zeros((NKV_PAD, N), np.float32)
    P[:NKV] = np.kron(_pool_matrix(H, 7), _pool_matrix(W, 7))
    pmat = jnp.asarray(P, dtype=jnp.bfloat16)
    mask_np = np.zeros((1, NKV_PAD), np.float32)
    mask_np[0, NKV:] = -1e30
    mask = jnp.asarray(mask_np)

    for blk in lp["blocks"]:
        x = _attn_block_call(x, blk, pmat, mask, heads=heads, d=d, scale=scale)
        x = _mlp_block_call(x, blk, H=H, W=W)

    x = layernorm_rows(x.reshape(B * N, c2), lp["final_norm_g"],
                       lp["final_norm_b"], eps=1e-6)
    return x.reshape(B, H, W, c2).transpose(0, 3, 1, 2)  # NCHW


def pvt_block_forward(x_nchw, prepared_params, cfg):
    for lp in prepared_params["layers"]:
        x_nchw = pvt_layer_forward(x_nchw, lp, cfg)
    return x_nchw


# ------------------------- one-time parameter preparation ---------------------
def prepare_params(params, cfg):
    """Pre-transpose / pre-pad / pre-cast weights once (no per-step XLA permutes)."""
    c2, c1, ps = cfg["embed_dims"], cfg["in_chans"], cfg["patch_size"]
    hidden = int(c2 * cfg["mlp_ratio"])
    K = c1 * ps * ps
    Kp = ((K + 127) // 128) * 128
    layers = []
    for lp in params["layers"]:
        w_pe = jnp.pad(lp["patch_proj_w"].reshape(c2, K).T, ((0, Kp - K), (0, 0)))
        out = {
            "patch_w": w_pe.astype(jnp.bfloat16),
            "patch_b": lp["patch_proj_b"].reshape(1, c2),
            "patch_norm_g": lp["patch_norm_g"].reshape(1, c2),
            "patch_norm_b": lp["patch_norm_b"].reshape(1, c2),
            "final_norm_g": lp["final_norm_g"].reshape(1, c2),
            "final_norm_b": lp["final_norm_b"].reshape(1, c2),
            "blocks": [],
        }
        for blk in lp["blocks"]:
            out["blocks"].append({
                "norm1_g": blk["norm1_g"].reshape(1, c2),
                "norm1_b": blk["norm1_b"].reshape(1, c2),
                "wq": blk["q_w"].T.astype(jnp.bfloat16),
                "wkv": blk["kv_w"].T.astype(jnp.bfloat16),
                "wsr": blk["sr_w"].reshape(c2, c2).T.astype(jnp.bfloat16),
                "bsr": blk["sr_b"].reshape(1, c2),
                "attn_norm_g": blk["attn_norm_g"].reshape(1, c2),
                "attn_norm_b": blk["attn_norm_b"].reshape(1, c2),
                "wproj": blk["proj_w"].T.astype(jnp.bfloat16),
                "bproj": blk["proj_b"].reshape(1, c2),
                "norm2_g": blk["norm2_g"].reshape(1, c2),
                "norm2_b": blk["norm2_b"].reshape(1, c2),
                "w1": blk["fc1_w"].T.astype(jnp.bfloat16),
                "b1": blk["fc1_b"].reshape(1, hidden),
                "wdw": blk["dw_w"].reshape(hidden, 9).T,     # (9, hidden) f32
                "bdw": blk["dw_b"].reshape(1, hidden),
                "w2": blk["fc2_w"].T.astype(jnp.bfloat16),
                "b2": blk["fc2_b"].reshape(1, c2),
            })
        layers.append(out)
    return {"layers": layers}


# --------------------------- Pure-JAX f32 reference ---------------------------
def _layernorm_ref(x, g, b, eps):
    mu = jnp.mean(x, axis=-1, keepdims=True)
    var = jnp.mean((x - mu) ** 2, axis=-1, keepdims=True)
    return (x - mu) * jax.lax.rsqrt(var + eps) * g + b


def _gelu_ref(x):
    return jax.nn.gelu(x, approximate=False)


def pvt_layer_reference(x_nchw, lp, cfg):
    B = x_nchw.shape[0]
    c2, heads = cfg["embed_dims"], cfg["num_heads"]
    ps, st = cfg["patch_size"], cfg["stride"]
    d = c2 // heads
    y = jax.lax.conv_general_dilated(
        x_nchw, lp["patch_proj_w"], (st, st),
        ((ps // 2, ps // 2), (ps // 2, ps // 2)),
        dimension_numbers=("NCHW", "OIHW", "NCHW"))
    y = y + lp["patch_proj_b"].reshape(1, c2, 1, 1)
    _, _, H, W = y.shape
    N = H * W
    x = y.reshape(B, c2, N).transpose(0, 2, 1)
    x = _layernorm_ref(x, lp["patch_norm_g"], lp["patch_norm_b"], 1e-5)
    for blk in lp["blocks"]:
        xn = _layernorm_ref(x, blk["norm1_g"], blk["norm1_b"], 1e-6)
        q = (xn @ blk["q_w"].T).reshape(B, N, heads, d).transpose(0, 2, 1, 3)
        pooled = _adaptive_avg_pool(xn.reshape(B, H, W, c2), 7).reshape(B, NKV, c2)
        xp = pooled @ blk["sr_w"].reshape(c2, c2).T + blk["sr_b"]
        xp = _layernorm_ref(xp, blk["attn_norm_g"], blk["attn_norm_b"], 1e-5)
        xp = _gelu_ref(xp)
        kv = (xp @ blk["kv_w"].T).reshape(B, NKV, 2, heads, d).transpose(2, 0, 3, 1, 4)
        k, v = kv[0], kv[1]
        a = (q @ jnp.swapaxes(k, -2, -1)) * (d ** -0.5)
        a = jax.nn.softmax(a, axis=-1)
        o = (a @ v).transpose(0, 2, 1, 3).reshape(B, N, c2)
        o = o @ blk["proj_w"].T + blk["proj_b"]
        x = x + o
        xn2 = _layernorm_ref(x, blk["norm2_g"], blk["norm2_b"], 1e-6)
        h = xn2 @ blk["fc1_w"].T + blk["fc1_b"]
        hidden = h.shape[-1]
        himg = h.transpose(0, 2, 1).reshape(B, hidden, H, W)
        dw = jax.lax.conv_general_dilated(
            himg, blk["dw_w"], (1, 1), ((1, 1), (1, 1)),
            dimension_numbers=("NCHW", "OIHW", "NCHW"),
            feature_group_count=hidden)
        dw = dw + blk["dw_b"].reshape(1, hidden, 1, 1)
        h = _gelu_ref(dw.reshape(B, hidden, N).transpose(0, 2, 1))
        h = h @ blk["fc2_w"].T + blk["fc2_b"]
        x = x + h
    x = _layernorm_ref(x, lp["final_norm_g"], lp["final_norm_b"], 1e-6)
    return x.reshape(B, H, W, c2).transpose(0, 3, 1, 2)


def pvt_block_reference(x_nchw, params, cfg):
    for lp in params["layers"]:
        x_nchw = pvt_layer_reference(x_nchw, lp, cfg)
    return x_nchw


# ----------------------------------- Params -----------------------------------
def _init_layer(key, cfg):
    c1, c2, ps = cfg["in_chans"], cfg["embed_dims"], cfg["patch_size"]
    hidden = int(c2 * cfg["mlp_ratio"])
    depths = cfg["depths"]
    keys = jax.random.split(key, 2 + depths)

    def nrm(k, shape, s=0.05):
        return jax.random.normal(k, shape, jnp.float32) * s

    lp = {
        "patch_proj_w": nrm(keys[0], (c2, c1, ps, ps)),
        "patch_proj_b": nrm(keys[1], (c2,)),
        "patch_norm_g": jnp.ones((c2,), jnp.float32),
        "patch_norm_b": jnp.zeros((c2,), jnp.float32),
        "final_norm_g": jnp.ones((c2,), jnp.float32),
        "final_norm_b": jnp.zeros((c2,), jnp.float32),
        "blocks": [],
    }
    for j in range(depths):
        bk = jax.random.split(keys[2 + j], 12)
        lp["blocks"].append({
            "norm1_g": jnp.ones((c2,), jnp.float32),
            "norm1_b": jnp.zeros((c2,), jnp.float32),
            "q_w": nrm(bk[0], (c2, c2)),
            "kv_w": nrm(bk[1], (2 * c2, c2)),
            "sr_w": nrm(bk[2], (c2, c2, 1, 1)),
            "sr_b": nrm(bk[3], (c2,)),
            "attn_norm_g": jnp.ones((c2,), jnp.float32),
            "attn_norm_b": jnp.zeros((c2,), jnp.float32),
            "proj_w": nrm(bk[4], (c2, c2)),
            "proj_b": nrm(bk[5], (c2,)),
            "norm2_g": jnp.ones((c2,), jnp.float32),
            "norm2_b": jnp.zeros((c2,), jnp.float32),
            "fc1_w": nrm(bk[6], (hidden, c2)),
            "fc1_b": nrm(bk[7], (hidden,)),
            "dw_w": nrm(bk[8], (hidden, 1, 3, 3)),
            "dw_b": nrm(bk[9], (hidden,)),
            "fc2_w": nrm(bk[10], (c2, hidden)),
            "fc2_b": nrm(bk[11], (c2,)),
        })
    return lp


def init_params(key, cfg, n=1):
    keys = jax.random.split(key, n)
    return {"layers": [_init_layer(keys[i], cfg) for i in range(n)]}


# ------------------------------------ Main -------------------------------------
if __name__ == "__main__":
    # PVTBlockv2(c1=3, c2=64, patch_size=7, stride=4, mlp_ratio=4, sr_ratios=8,
    #            depths=2, n=1); num_heads = c2 // 64 = 1; linear=True everywhere,
    # so sr_ratios is unused (pooled 7x7 kv path is taken).
    cfg = dict(in_chans=3, embed_dims=64, patch_size=7, stride=4,
               mlp_ratio=4, sr_ratios=8, depths=2, num_heads=1)
    B, Himg, Wimg = 2, 32, 32

    key = jax.random.PRNGKey(0)
    kx, kp = jax.random.split(key)
    x = jax.random.normal(kx, (B, cfg["in_chans"], Himg, Wimg), jnp.float32)
    params = init_params(kp, cfg, n=1)
    prep = prepare_params(params, cfg)   # one-time transpose / pad / bf16 cast

    fwd = jax.jit(lambda xx, pp: pvt_block_forward(xx, pp, cfg))
    out = jax.block_until_ready(fwd(x, prep))

    ref = pvt_block_reference(x, params, cfg)
    assert out.shape == ref.shape == (B, cfg["embed_dims"], 8, 8), out.shape
    err = float(jnp.max(jnp.abs(out - ref)))
    # bf16 MXU operands (f32 accumulate; LN/softmax/GELU kept in f32) -> loosened
    # tolerance vs the pure-f32 reference.
    assert err < 5e-2, f"max abs err {err}"
    print("KERNEL_OK")
</pallas_src>

<mosaic_0001>
module attributes {stable_mosaic.version = 11 : i64} {
  func.func @_patch_embed_kernel(%arg0: i32, %arg1: memref<32x256xf32, #tpu.memory_space<vmem>>, %arg2: memref<256x64xbf16, #tpu.memory_space<vmem>>, %arg3: memref<1x64xf32, #tpu.memory_space<vmem>>, %arg4: memref<1x64xf32, #tpu.memory_space<vmem>>, %arg5: memref<1x64xf32, #tpu.memory_space<vmem>>, %arg6: memref<32x64xf32, #tpu.memory_space<vmem>>) attributes {dimension_semantics = [#tpu.dimension_semantics<parallel>], iteration_bounds = array<i64: 4>, scalar_prefetch = 0 : i64, scratch_operands = 0 : i64, tpu.core_type = #tpu.core_type<tc>, window_params = [{transform_indices = @transform_0, window_bounds = array<i64: 32, 256>}, {pipeline_mode = #tpu.pipeline_mode<synchronous>, transform_indices = @transform_1, window_bounds = array<i64: 256, 64>}, {pipeline_mode = #tpu.pipeline_mode<synchronous>, transform_indices = @transform_2, window_bounds = array<i64: 1, 64>}, {pipeline_mode = #tpu.pipeline_mode<synchronous>, transform_indices = @transform_3, window_bounds = array<i64: 1, 64>}, {pipeline_mode = #tpu.pipeline_mode<synchronous>, transform_indices = @transform_4, window_bounds = array<i64: 1, 64>}, {transform_indices = @transform_5, window_bounds = array<i64: 32, 64>}]} {
    %c0 = arith.constant 0 : index
    %c0_0 = arith.constant 0 : index
    %0 = vector.load %arg1[%c0, %c0_0] : memref<32x256xf32, #tpu.memory_space<vmem>>, vector<32x256xf32>
    %1 = arith.truncf %0 : vector<32x256xf32> to vector<32x256xbf16>
    %c0_1 = arith.constant 0 : index
    %c0_2 = arith.constant 0 : index
    %2 = vector.load %arg2[%c0_1, %c0_2] : memref<256x64xbf16, #tpu.memory_space<vmem>>, vector<256x64xbf16>
    %cst = arith.constant dense<0.000000e+00> : vector<32x64xf32>
    %3 = tpu.matmul %1, %2, %cst {dimension_numbers = #tpu.dot_dimension_numbers<[1], [0], [0], [1], [0, 0, 1, 1], [], []>} : vector<32x256xbf16>, vector<256x64xbf16>, vector<32x64xf32> -> vector<32x64xf32>
    %c0_3 = arith.constant 0 : index
    %c0_4 = arith.constant 0 : index
    %4 = vector.load %arg3[%c0_3, %c0_4] : memref<1x64xf32, #tpu.memory_space<vmem>>, vector<1x64xf32>
    %5 = vector.shape_cast %4 : vector<1x64xf32> to vector<64xf32>
    %6 = vector.shape_cast %5 : vector<64xf32> to vector<1x64xf32>
    %7 = vector.broadcast %6 : vector<1x64xf32> to vector<32x64xf32>
    %8 = arith.addf %3, %7 : vector<32x64xf32>
    %c0_5 = arith.constant 0 : index
    %c0_6 = arith.constant 0 : index
    %9 = vector.load %arg4[%c0_5, %c0_6] : memref<1x64xf32, #tpu.memory_space<vmem>>, vector<1x64xf32>
    %10 = vector.shape_cast %9 : vector<1x64xf32> to vector<64xf32>
    %c0_7 = arith.constant 0 : index
    %c0_8 = arith.constant 0 : index
    %11 = vector.load %arg5[%c0_7, %c0_8] : memref<1x64xf32, #tpu.memory_space<vmem>>, vector<1x64xf32>
    %12 = vector.shape_cast %11 : vector<1x64xf32> to vector<64xf32>
    %cst_9 = arith.constant dense<0.000000e+00> : vector<32xf32>
    %13 = vector.multi_reduction <add>, %8, %cst_9 [1] : vector<32x64xf32> to vector<32xf32>
    %14 = vector.shape_cast %13 : vector<32xf32> to vector<32x1xf32>
    %cst_10 = arith.constant 6.400000e+01 : f32
    %15 = vector.broadcast %cst_10 : f32 to vector<32x1xf32>
    %16 = arith.divf %14, %15 : vector<32x1xf32>
    %17 = vector.broadcast %16 : vector<32x1xf32> to vector<32x64xf32>
    %18 = arith.subf %8, %17 : vector<32x64xf32>
    %19 = arith.mulf %18, %18 : vector<32x64xf32>
    %cst_11 = arith.constant dense<0.000000e+00> : vector<32xf32>
    %20 = vector.multi_reduction <add>, %19, %cst_11 [1] : vector<32x64xf32> to vector<32xf32>
    %21 = vector.shape_cast %20 : vector<32xf32> to vector<32x1xf32>
    %cst_12 = arith.constant 6.400000e+01 : f32
    %22 = vector.broadcast %cst_12 : f32 to vector<32x1xf32>
    %23 = arith.divf %21, %22 : vector<32x1xf32>
    %cst_13 = arith.constant 9.99999974E-6 : f32
    %24 = vector.broadcast %cst_13 : f32 to vector<32x1xf32>
    %25 = arith.addf %23, %24 : vector<32x1xf32>
    %26 = math.rsqrt %25 : vector<32x1xf32>
    %27 = vector.broadcast %26 : vector<32x1xf32> to vector<32x64xf32>
    %28 = arith.mulf %18, %27 : vector<32x64xf32>
    %29 = vector.shape_cast %10 : vector<64xf32> to vector<1x64xf32>
    %30 = vector.broadcast %29 : vector<1x64xf32> to vector<32x64xf32>
    %31 = arith.mulf %28, %30 : vector<32x64xf32>
    %32 = vector.shape_cast %12 : vector<64xf32> to vector<1x64xf32>
    %33 = vector.broadcast %32 : vector<1x64xf32> to vector<32x64xf32>
    %34 = arith.addf %31, %33 : vector<32x64xf32>
    %c0_14 = arith.constant 0 : index
    %c0_15 = arith.constant 0 : index
    %35 = vector.load %arg6[%c0_14, %c0_15] : memref<32x64xf32, #tpu.memory_space<vmem>>, vector<32x64xf32>
    tpu.vector_store %arg6[%c0_14, %c0_15], %34 {strides = array<i32>} : memref<32x64xf32, #tpu.memory_space<vmem>>, vector<32x64xf32>,
    return
  }
  func.func @transform_0(%arg0: i32) -> (i32, i32) {
    %c0_i32 = arith.constant 0 : i32
    %c0_i32_0 = arith.constant 0 : i32
    return %arg0, %c0_i32 : i32, i32
  }
  func.func @transform_1(%arg0: i32) -> (i32, i32) {
    %c0_i32 = arith.constant 0 : i32
    %c0_i32_0 = arith.constant 0 : i32
    %c0_i32_1 = arith.constant 0 : i32
    return %c0_i32, %c0_i32_0 : i32, i32
  }
  func.func @transform_2(%arg0: i32) -> (i32, i32) {
    %c0_i32 = arith.constant 0 : i32
    %c0_i32_0 = arith.constant 0 : i32
    %c0_i32_1 = arith.constant 0 : i32
    return %c0_i32, %c0_i32_0 : i32, i32
  }
  func.func @transform_3(%arg0: i32) -> (i32, i32) {
    %c0_i32 = arith.constant 0 : i32
    %c0_i32_0 = arith.constant 0 : i32
    %c0_i32_1 = arith.constant 0 : i32
    return %c0_i32, %c0_i32_0 : i32, i32
  }
  func.func @transform_4(%arg0: i32) -> (i32, i32) {
    %c0_i32 = arith.constant 0 : i32
    %c0_i32_0 = arith.constant 0 : i32
    %c0_i32_1 = arith.constant 0 : i32
    return %c0_i32, %c0_i32_0 : i32, i32
  }
  func.func @transform_5(%arg0: i32) -> (i32, i32) {
    %c0_i32 = arith.constant 0 : i32
    %c0_i32_0 = arith.constant 0 : i32
    return %arg0, %c0_i32 : i32, i32
  }
}

module attributes {stable_mosaic.version = 11 : i64} {
  func.func @_ln_kernel(%arg0: i32, %arg1: memref<32x64xf32, #tpu.memory_space<vmem>>, %arg2: memref<1x64xf32, #tpu.memory_space<vmem>>, %arg3: memref<1x64xf32, #tpu.memory_space<vmem>>, %arg4: memref<32x64xf32, #tpu.memory_space<vmem>>) attributes {dimension_semantics = [#tpu.dimension_semantics<parallel>], iteration_bounds = array<i64: 4>, scalar_prefetch = 0 : i64, scratch_operands = 0 : i64, tpu.core_type = #tpu.core_type<tc>, window_params = [{transform_indices = @transform_0, window_bounds = array<i64: 32, 64>}, {pipeline_mode = #tpu.pipeline_mode<synchronous>, transform_indices = @transform_1, window_bounds = array<i64: 1, 64>}, {pipeline_mode = #tpu.pipeline_mode<synchronous>, transform_indices = @transform_2, window_bounds = array<i64: 1, 64>}, {transform_indices = @transform_3, window_bounds = array<i64: 32, 64>}]} {
    %c0 = arith.constant 0 : index
    %c0_0 = arith.constant 0 : index
    %0 = vector.load %arg1[%c0, %c0_0] : memref<32x64xf32, #tpu.memory_space<vmem>>, vector<32x64xf32>
    %c0_1 = arith.constant 0 : index
    %c0_2 = arith.constant 0 : index
    %1 = vector.load %arg2[%c0_1, %c0_2] : memref<1x64xf32, #tpu.memory_space<vmem>>, vector<1x64xf32>
    %2 = vector.shape_cast %1 : vector<1x64xf32> to vector<64xf32>
    %c0_3 = arith.constant 0 : index
    %c0_4 = arith.constant 0 : index
    %3 = vector.load %arg3[%c0_3, %c0_4] : memref<1x64xf32, #tpu.memory_space<vmem>>, vector<1x64xf32>
    %4 = vector.shape_cast %3 : vector<1x64xf32> to vector<64xf32>
    %cst = arith.constant dense<0.000000e+00> : vector<32xf32>
    %5 = vector.multi_reduction <add>, %0, %cst [1] : vector<32x64xf32> to vector<32xf32>
    %6 = vector.shape_cast %5 : vector<32xf32> to vector<32x1xf32>
    %cst_5 = arith.constant 6.400000e+01 : f32
    %7 = vector.broadcast %cst_5 : f32 to vector<32x1xf32>
    %8 = arith.divf %6, %7 : vector<32x1xf32>
    %9 = vector.broadcast %8 : vector<32x1xf32> to vector<32x64xf32>
    %10 = arith.subf %0, %9 : vector<32x64xf32>
    %11 = arith.mulf %10, %10 : vector<32x64xf32>
    %cst_6 = arith.constant dense<0.000000e+00> : vector<32xf32>
    %12 = vector.multi_reduction <add>, %11, %cst_6 [1] : vector<32x64xf32> to vector<32xf32>
    %13 = vector.shape_cast %12 : vector<32xf32> to vector<32x1xf32>
    %cst_7 = arith.constant 6.400000e+01 : f32
    %14 = vector.broadcast %cst_7 : f32 to vector<32x1xf32>
    %15 = arith.divf %13, %14 : vector<32x1xf32>
    %cst_8 = arith.constant 9.99999997E-7 : f32
    %16 = vector.broadcast %cst_8 : f32 to vector<32x1xf32>
    %17 = arith.addf %15, %16 : vector<32x1xf32>
    %18 = math.rsqrt %17 : vector<32x1xf32>
    %19 = vector.broadcast %18 : vector<32x1xf32> to vector<32x64xf32>
    %20 = arith.mulf %10, %19 : vector<32x64xf32>
    %21 = vector.shape_cast %2 : vector<64xf32> to vector<1x64xf32>
    %22 = vector.broadcast %21 : vector<1x64xf32> to vector<32x64xf32>
    %23 = arith.mulf %20, %22 : vector<32x64xf32>
    %24 = vector.shape_cast %4 : vector<64xf32> to vector<1x64xf32>
    %25 = vector.broadcast %24 : vector<1x64xf32> to vector<32x64xf32>
    %26 = arith.addf %23, %25 : vector<32x64xf32>
    %c0_9 = arith.constant 0 : index
    %c0_10 = arith.constant 0 : index
    %27 = vector.load %arg4[%c0_9, %c0_10] : memref<32x64xf32, #tpu.memory_space<vmem>>, vector<32x64xf32>
    tpu.vector_store %arg4[%c0_9, %c0_10], %26 {strides = array<i32>} : memref<32x64xf32, #tpu.memory_space<vmem>>, vector<32x64xf32>,
    return
  }
  func.func @transform_0(%arg0: i32) -> (i32, i32) {
    %c0_i32 = arith.constant 0 : i32
    %c0_i32_0 = arith.constant 0 : i32
    return %arg0, %c0_i32 : i32, i32
  }
  func.func @transform_1(%arg0: i32) -> (i32, i32) {
    %c0_i32 = arith.constant 0 : i32
    %c0_i32_0 = arith.constant 0 : i32
    %c0_i32_1 = arith.constant 0 : i32
    return %c0_i32, %c0_i32_0 : i32, i32
  }
  func.func @transform_2(%arg0: i32) -> (i32, i32) {
    %c0_i32 = arith.constant 0 : i32
    %c0_i32_0 = arith.constant 0 : i32
    %c0_i32_1 = arith.constant 0 : i32
    return %c0_i32, %c0_i32_0 : i32, i32
  }
  func.func @transform_3(%arg0: i32) -> (i32, i32) {
    %c0_i32 = arith.constant 0 : i32
    %c0_i32_0 = arith.constant 0 : i32
    return %arg0, %c0_i32 : i32, i32
  }
}

module attributes {stable_mosaic.version = 11 : i64} {
  func.func @_mlp_block_kernel(%arg0: i32, %arg1: memref<1x64x64xf32, #tpu.memory_space<vmem>>, %arg2: memref<1x64xf32, #tpu.memory_space<vmem>>, %arg3: memref<1x64xf32, #tpu.memory_space<vmem>>, %arg4: memref<64x256xbf16, #tpu.memory_space<vmem>>, %arg5: memref<1x256xf32, #tpu.memory_space<vmem>>, %arg6: memref<9x256xf32, #tpu.memory_space<vmem>>, %arg7: memref<1x256xf32, #tpu.memory_space<vmem>>, %arg8: memref<256x64xbf16, #tpu.memory_space<vmem>>, %arg9: memref<1x64xf32, #tpu.memory_space<vmem>>, %arg10: memref<1x64x64xf32, #tpu.memory_space<vmem>>, %arg11: memref<96x256xf32, #tpu.memory_space<vmem>>) attributes {dimension_semantics = [#tpu.dimension_semantics<parallel>], iteration_bounds = array<i64: 2>, scalar_prefetch = 0 : i64, scratch_operands = 1 : i64, tpu.core_type = #tpu.core_type<tc>, window_params = [{transform_indices = @transform_0, window_bounds = array<i64: 1, 64, 64>}, {pipeline_mode = #tpu.pipeline_mode<synchronous>, transform_indices = @transform_1, window_bounds = array<i64: 1, 64>}, {pipeline_mode = #tpu.pipeline_mode<synchronous>, transform_indices = @transform_2, window_bounds = array<i64: 1, 64>}, {pipeline_mode = #tpu.pipeline_mode<synchronous>, transform_indices = @transform_3, window_bounds = array<i64: 64, 256>}, {pipeline_mode = #tpu.pipeline_mode<synchronous>, transform_indices = @transform_4, window_bounds = array<i64: 1, 256>}, {pipeline_mode = #tpu.pipeline_mode<synchronous>, transform_indices = @transform_5, window_bounds = array<i64: 9, 256>}, {pipeline_mode = #tpu.pipeline_mode<synchronous>, transform_indices = @transform_6, window_bounds = array<i64: 1, 256>}, {pipeline_mode = #tpu.pipeline_mode<synchronous>, transform_indices = @transform_7, window_bounds = array<i64: 256, 64>}, {pipeline_mode = #tpu.pipeline_mode<synchronous>, transform_indices = @transform_8, window_bounds = array<i64: 1, 64>}, {transform_indices = @transform_9, window_bounds = array<i64: 1, 64, 64>}]} {
    %c0 = arith.constant 0 : index
    %c0_0 = arith.constant 0 : index
    %c0_1 = arith.constant 0 : index
    %0 = vector.load %arg1[%c0, %c0_0, %c0_1] : memref<1x64x64xf32, #tpu.memory_space<vmem>>, vector<1x64x64xf32>
    %1 = vector.shape_cast %0 : vector<1x64x64xf32> to vector<64x64xf32>
    %c0_2 = arith.constant 0 : index
    %c0_3 = arith.constant 0 : index
    %2 = vector.load %arg2[%c0_2, %c0_3] : memref<1x64xf32, #tpu.memory_space<vmem>>, vector<1x64xf32>
    %3 = vector.shape_cast %2 : vector<1x64xf32> to vector<64xf32>
    %c0_4 = arith.constant 0 : index
    %c0_5 = arith.constant 0 : index
    %4 = vector.load %arg3[%c0_4, %c0_5] : memref<1x64xf32, #tpu.memory_space<vmem>>, vector<1x64xf32>
    %5 = vector.shape_cast %4 : vector<1x64xf32> to vector<64xf32>
    %cst = arith.constant dense<0.000000e+00> : vector<64xf32>
    %6 = vector.multi_reduction <add>, %1, %cst [1] : vector<64x64xf32> to vector<64xf32>
    %7 = vector.shape_cast %6 : vector<64xf32> to vector<64x1xf32>
    %cst_6 = arith.constant 6.400000e+01 : f32
    %8 = vector.broadcast %cst_6 : f32 to vector<64x1xf32>
    %9 = arith.divf %7, %8 : vector<64x1xf32>
    %10 = vector.broadcast %9 : vector<64x1xf32> to vector<64x64xf32>
    %11 = arith.subf %1, %10 : vector<64x64xf32>
    %12 = arith.mulf %11, %11 : vector<64x64xf32>
    %cst_7 = arith.constant dense<0.000000e+00> : vector<64xf32>
    %13 = vector.multi_reduction <add>, %12, %cst_7 [1] : vector<64x64xf32> to vector<64xf32>
    %14 = vector.shape_cast %13 : vector<64xf32> to vector<64x1xf32>
    %cst_8 = arith.constant 6.400000e+01 : f32
    %15 = vector.broadcast %cst_8 : f32 to vector<64x1xf32>
    %16 = arith.divf %14, %15 : vector<64x1xf32>
    %cst_9 = arith.constant 9.99999997E-7 : f32
    %17 = vector.broadcast %cst_9 : f32 to vector<64x1xf32>
    %18 = arith.addf %16, %17 : vector<64x1xf32>
    %19 = math.rsqrt %18 : vector<64x1xf32>
    %20 = vector.broadcast %19 : vector<64x1xf32> to vector<64x64xf32>
    %21 = arith.mulf %11, %20 : vector<64x64xf32>
    %22 = vector.shape_cast %3 : vector<64xf32> to vector<1x64xf32>
    %23 = vector.broadcast %22 : vector<1x64xf32> to vector<64x64xf32>
    %24 = arith.mulf %21, %23 : vector<64x64xf32>
    %25 = vector.shape_cast %5 : vector<64xf32> to vector<1x64xf32>
    %26 = vector.broadcast %25 : vector<1x64xf32> to vector<64x64xf32>
    %27 = arith.addf %24, %26 : vector<64x64xf32>
    %28 = arith.truncf %27 : vector<64x64xf32> to vector<64x64xbf16>
    %c0_10 = arith.constant 0 : index
    %c0_11 = arith.constant 0 : index
    %29 = vector.load %arg4[%c0_10, %c0_11] : memref<64x256xbf16, #tpu.memory_space<vmem>>, vector<64x256xbf16>
    %cst_12 = arith.constant dense<0.000000e+00> : vector<64x256xf32>
    %30 = tpu.matmul %28, %29, %cst_12 {dimension_numbers = #tpu.dot_dimension_numbers<[1], [0], [0], [1], [0, 0, 1, 1], [], []>} : vector<64x64xbf16>, vector<64x256xbf16>, vector<64x256xf32> -> vector<64x256xf32>
    %c0_13 = arith.constant 0 : index
    %c0_14 = arith.constant 0 : index
    %31 = vector.load %arg5[%c0_13, %c0_14] : memref<1x256xf32, #tpu.memory_space<vmem>>, vector<1x256xf32>
    %32 = vector.shape_cast %31 : vector<1x256xf32> to vector<256xf32>
    %33 = vector.shape_cast %32 : vector<256xf32> to vector<1x256xf32>
    %34 = vector.broadcast %33 : vector<1x256xf32> to vector<64x256xf32>
    %35 = arith.addf %30, %34 : vector<64x256xf32>
    %c0_i32 = arith.constant 0 : i32
    %36 = arith.cmpi eq, %arg0, %c0_i32 : i32
    %37 = arith.extui %36 : i1 to i32
    %c0_i32_15 = arith.constant 0 : i32
    %38 = arith.cmpi ne, %37, %c0_i32_15 : i32
    scf.if %38 {
      %cst_66 = arith.constant 0.000000e+00 : f32
      %207 = vector.broadcast %cst_66 : f32 to vector<16x256xf32>
      %c0_67 = arith.constant 0 : index
      %c0_68 = arith.constant 0 : index
      %208 = vector.load %arg11[%c0_67, %c0_68] : memref<96x256xf32, #tpu.memory_space<vmem>>, vector<16x256xf32>
      tpu.vector_store %arg11[%c0_67, %c0_68], %207 {strides = array<i32>} : memref<96x256xf32, #tpu.memory_space<vmem>>, vector<16x256xf32>,
      %cst_69 = arith.constant 0.000000e+00 : f32
      %209 = vector.broadcast %cst_69 : f32 to vector<16x256xf32>
      %c80 = arith.constant 80 : index
      %c0_70 = arith.constant 0 : index
      %210 = vector.load %arg11[%c80, %c0_70] : memref<96x256xf32, #tpu.memory_space<vmem>>, vector<16x256xf32>
      tpu.vector_store %arg11[%c80, %c0_70], %209 {strides = array<i32>} : memref<96x256xf32, #tpu.memory_space<vmem>>, vector<16x256xf32>,
    } else {
    }
    %c16 = arith.constant 16 : index
    %c0_16 = arith.constant 0 : index
    %39 = vector.load %arg11[%c16, %c0_16] : memref<96x256xf32, #tpu.memory_space<vmem>>, vector<64x256xf32>
    tpu.vector_store %arg11[%c16, %c0_16], %35 {strides = array<i32>} : memref<96x256xf32, #tpu.memory_space<vmem>>, vector<64x256xf32>,
    %40 = tpu.iota {dimensions = array<i32: 0>} : vector<64x1xi32>
    %c8_i32 = arith.constant 8 : i32
    %c0_i32_17 = arith.constant 0 : i32
    %41 = arith.cmpi eq, %c8_i32, %c0_i32_17 : i32
    %c1_i32 = arith.constant 1 : i32
    %42 = arith.select %41, %c1_i32, %c8_i32 : i32
    %43 = vector.broadcast %42 : i32 to vector<64x1xi32>
    %44 = arith.remsi %40, %43 : vector<64x1xi32>
    %c0_i32_18 = arith.constant 0 : i32
    %45 = vector.broadcast %c0_i32_18 : i32 to vector<64x1xi32>
    %46 = arith.cmpi ne, %44, %45 : vector<64x1xi32>
    %c0_i32_19 = arith.constant 0 : i32
    %47 = vector.broadcast %c0_i32_19 : i32 to vector<64x1xi32>
    %48 = arith.cmpi slt, %44, %47 : vector<64x1xi32>
    %c0_i32_20 = arith.constant 0 : i32
    %49 = arith.cmpi slt, %42, %c0_i32_20 : i32
    %50 = vector.broadcast %49 : i1 to vector<64x1xi1>
    %51 = vector.broadcast %50 : vector<64x1xi1> to vector<64x1xi1>
    %52 = arith.xori %48, %51 : vector<64x1xi1>
    %53 = arith.andi %52, %46 : vector<64x1xi1>
    %54 = vector.broadcast %42 : i32 to vector<64x1xi32>
    %55 = arith.addi %44, %54 : vector<64x1xi32>
    %56 = arith.select %53, %55, %44 : vector<64x1xi1>, vector<64x1xi32>
    %c1_i32_21 = arith.constant 1 : i32
    %57 = vector.broadcast %c1_i32_21 : i32 to vector<64x1xi32>
    %58 = arith.cmpi sge, %56, %57 : vector<64x1xi32>
    %c6_i32 = arith.constant 6 : i32
    %59 = vector.broadcast %c6_i32 : i32 to vector<64x1xi32>
    %60 = arith.cmpi sle, %56, %59 : vector<64x1xi32>
    %c0_22 = arith.constant 0 : index
    %c0_23 = arith.constant 0 : index
    %61 = vector.load %arg6[%c0_22, %c0_23] : memref<9x256xf32, #tpu.memory_space<vmem>>, vector<9x256xf32>
    %cst_24 = arith.constant 0.000000e+00 : f32
    %62 = vector.broadcast %cst_24 : f32 to vector<64x256xf32>
    %c7 = arith.constant 7 : index
    %c0_25 = arith.constant 0 : index
    %63 = vector.load %arg11[%c7, %c0_25] : memref<96x256xf32, #tpu.memory_space<vmem>>, vector<64x256xf32>
    %cst_26 = arith.constant 0.000000e+00 : f32
    %64 = vector.shape_cast %58 : vector<64x1xi1> to vector<64x1xi1>
    %65 = vector.broadcast %64 : vector<64x1xi1> to vector<64x256xi1>
    %66 = vector.broadcast %cst_26 : f32 to vector<64x256xf32>
    %67 = arith.select %65, %63, %66 : vector<64x256xi1>, vector<64x256xf32>
    %68 = vector.extract_strided_slice %61 {offsets = [0, 0], sizes = [1, 256], strides = [1, 1]} : vector<9x256xf32> to vector<1x256xf32>
    %69 = vector.shape_cast %68 : vector<1x256xf32> to vector<256xf32>
    %70 = vector.shape_cast %69 : vector<256xf32> to vector<1x256xf32>
    %71 = vector.broadcast %70 : vector<1x256xf32> to vector<64x256xf32>
    %72 = arith.mulf %67, %71 : vector<64x256xf32>
    %73 = arith.addf %62, %72 : vector<64x256xf32>
    %c8 = arith.constant 8 : index
    %c0_27 = arith.constant 0 : index
    %74 = vector.load %arg11[%c8, %c0_27] : memref<96x256xf32, #tpu.memory_space<vmem>>, vector<64x256xf32>
    %75 = vector.extract_strided_slice %61 {offsets = [1, 0], sizes = [1, 256], strides = [1, 1]} : vector<9x256xf32> to vector<1x256xf32>
    %76 = vector.shape_cast %75 : vector<1x256xf32> to vector<256xf32>
    %77 = vector.shape_cast %76 : vector<256xf32> to vector<1x256xf32>
    %78 = vector.broadcast %77 : vector<1x256xf32> to vector<64x256xf32>
    %79 = arith.mulf %74, %78 : vector<64x256xf32>
    %80 = arith.addf %73, %79 : vector<64x256xf32>
    %c9 = arith.constant 9 : index
    %c0_28 = arith.constant 0 : index
    %81 = vector.load %arg11[%c9, %c0_28] : memref<96x256xf32, #tpu.memory_space<vmem>>, vector<64x256xf32>
    %cst_29 = arith.constant 0.000000e+00 : f32
    %82 = vector.shape_cast %60 : vector<64x1xi1> to vector<64x1xi1>
    %83 = vector.broadcast %82 : vector<64x1xi1> to vector<64x256xi1>
    %84 = vector.broadcast %cst_29 : f32 to vector<64x256xf32>
    %85 = arith.select %83, %81, %84 : vector<64x256xi1>, vector<64x256xf32>
    %86 = vector.extract_strided_slice %61 {offsets = [2, 0], sizes = [1, 256], strides = [1, 1]} : vector<9x256xf32> to vector<1x256xf32>
    %87 = vector.shape_cast %86 : vector<1x256xf32> to vector<256xf32>
    %88 = vector.shape_cast %87 : vector<256xf32> to vector<1x256xf32>
    %89 = vector.broadcast %88 : vector<1x256xf32> to vector<64x256xf32>
    %90 = arith.mulf %85, %89 : vector<64x256xf32>
    %91 = arith.addf %80, %90 : vector<64x256xf32>
    %c15 = arith.constant 15 : index
    %c0_30 = arith.constant 0 : index
    %92 = vector.load %arg11[%c15, %c0_30] : memref<96x256xf32, #tpu.memory_space<vmem>>, vector<64x256xf32>
    %cst_31 = arith.constant 0.000000e+00 : f32
    %93 = vector.shape_cast %58 : vector<64x1xi1> to vector<64x1xi1>
    %94 = vector.broadcast %93 : vector<64x1xi1> to vector<64x256xi1>
    %95 = vector.broadcast %cst_31 : f32 to vector<64x256xf32>
    %96 = arith.select %94, %92, %95 : vector<64x256xi1>, vector<64x256xf32>
    %97 = vector.extract_strided_slice %61 {offsets = [3, 0], sizes = [1, 256], strides = [1, 1]} : vector<9x256xf32> to vector<1x256xf32>
    %98 = vector.shape_cast %97 : vector<1x256xf32> to vector<256xf32>
    %99 = vector.shape_cast %98 : vector<256xf32> to vector<1x256xf32>
    %100 = vector.broadcast %99 : vector<1x256xf32> to vector<64x256xf32>
    %101 = arith.mulf %96, %100 : vector<64x256xf32>
    %102 = arith.addf %91, %101 : vector<64x256xf32>
    %c16_32 = arith.constant 16 : index
    %c0_33 = arith.constant 0 : index
    %103 = vector.load %arg11[%c16_32, %c0_33] : memref<96x256xf32, #tpu.memory_space<vmem>>, vector<64x256xf32>
    %104 = vector.extract_strided_slice %61 {offsets = [4, 0], sizes = [1, 256], strides = [1, 1]} : vector<9x256xf32> to vector<1x256xf32>
    %105 = vector.shape_cast %104 : vector<1x256xf32> to vector<256xf32>
    %106 = vector.shape_cast %105 : vector<256xf32> to vector<1x256xf32>
    %107 = vector.broadcast %106 : vector<1x256xf32> to vector<64x256xf32>
    %108 = arith.mulf %103, %107 : vector<64x256xf32>
    %109 = arith.addf %102, %108 : vector<64x256xf32>
    %c17 = arith.constant 17 : index
    %c0_34 = arith.constant 0 : index
    %110 = vector.load %arg11[%c17, %c0_34] : memref<96x256xf32, #tpu.memory_space<vmem>>, vector<64x256xf32>
    %cst_35 = arith.constant 0.000000e+00 : f32
    %111 = vector.shape_cast %60 : vector<64x1xi1> to vector<64x1xi1>
    %112 = vector.broadcast %111 : vector<64x1xi1> to vector<64x256xi1>
    %113 = vector.broadcast %cst_35 : f32 to vector<64x256xf32>
    %114 = arith.select %112, %110, %113 : vector<64x256xi1>, vector<64x256xf32>
    %115 = vector.extract_strided_slice %61 {offsets = [5, 0], sizes = [1, 256], strides = [1, 1]} : vector<9x256xf32> to vector<1x256xf32>
    %116 = vector.shape_cast %115 : vector<1x256xf32> to vector<256xf32>
    %117 = vector.shape_cast %116 : vector<256xf32> to vector<1x256xf32>
    %118 = vector.broadcast %117 : vector<1x256xf32> to vector<64x256xf32>
    %119 = arith.mulf %114, %118 : vector<64x256xf32>
    %120 = arith.addf %109, %119 : vector<64x256xf32>
    %c23 = arith.constant 23 : index
    %c0_36 = arith.constant 0 : index
    %121 = vector.load %arg11[%c23, %c0_36] : memref<96x256xf32, #tpu.memory_space<vmem>>, vector<64x256xf32>
    %cst_37 = arith.constant 0.000000e+00 : f32
    %122 = vector.shape_cast %58 : vector<64x1xi1> to vector<64x1xi1>
    %123 = vector.broadcast %122 : vector<64x1xi1> to vector<64x256xi1>
    %124 = vector.broadcast %cst_37 : f32 to vector<64x256xf32>
    %125 = arith.select %123, %121, %124 : vector<64x256xi1>, vector<64x256xf32>
    %126 = vector.extract_strided_slice %61 {offsets = [6, 0], sizes = [1, 256], strides = [1, 1]} : vector<9x256xf32> to vector<1x256xf32>
    %127 = vector.shape_cast %126 : vector<1x256xf32> to vector<256xf32>
    %128 = vector.shape_cast %127 : vector<256xf32> to vector<1x256xf32>
    %129 = vector.broadcast %128 : vector<1x256xf32> to vector<64x256xf32>
    %130 = arith.mulf %125, %129 : vector<64x256xf32>
    %131 = arith.addf %120, %130 : vector<64x256xf32>
    %c24 = arith.constant 24 : index
    %c0_38 = arith.constant 0 : index
    %132 = vector.load %arg11[%c24, %c0_38] : memref<96x256xf32, #tpu.memory_space<vmem>>, vector<64x256xf32>
    %133 = vector.extract_strided_slice %61 {offsets = [7, 0], sizes = [1, 256], strides = [1, 1]} : vector<9x256xf32> to vector<1x256xf32>
    %134 = vector.shape_cast %133 : vector<1x256xf32> to vector<256xf32>
    %135 = vector.shape_cast %134 : vector<256xf32> to vector<1x256xf32>
    %136 = vector.broadcast %135 : vector<1x256xf32> to vector<64x256xf32>
    %137 = arith.mulf %132, %136 : vector<64x256xf32>
    %138 = arith.addf %131, %137 : vector<64x256xf32>
    %c25 = arith.constant 25 : index
    %c0_39 = arith.constant 0 : index
    %139 = vector.load %arg11[%c25, %c0_39] : memref<96x256xf32, #tpu.memory_space<vmem>>, vector<64x256xf32>
    %cst_40 = arith.constant 0.000000e+00 : f32
    %140 = vector.shape_cast %60 : vector<64x1xi1> to vector<64x1xi1>
    %141 = vector.broadcast %140 : vector<64x1xi1> to vector<64x256xi1>
    %142 = vector.broadcast %cst_40 : f32 to vector<64x256xf32>
    %143 = arith.select %141, %139, %142 : vector<64x256xi1>, vector<64x256xf32>
    %144 = vector.extract_strided_slice %61 {offsets = [8, 0], sizes = [1, 256], strides = [1, 1]} : vector<9x256xf32> to vector<1x256xf32>
    %145 = vector.shape_cast %144 : vector<1x256xf32> to vector<256xf32>
    %146 = vector.shape_cast %145 : vector<256xf32> to vector<1x256xf32>
    %147 = vector.broadcast %146 : vector<1x256xf32> to vector<64x256xf32>
    %148 = arith.mulf %143, %147 : vector<64x256xf32>
    %149 = arith.addf %138, %148 : vector<64x256xf32>
    %c0_41 = arith.constant 0 : index
    %c0_42 = arith.constant 0 : index
    %150 = vector.load %arg7[%c0_41, %c0_42] : memref<1x256xf32, #tpu.memory_space<vmem>>, vector<1x256xf32>
    %151 = vector.shape_cast %150 : vector<1x256xf32> to vector<256xf32>
    %152 = vector.shape_cast %151 : vector<256xf32> to vector<1x256xf32>
    %153 = vector.broadcast %152 : vector<1x256xf32> to vector<64x256xf32>
    %154 = arith.addf %149, %153 : vector<64x256xf32>
    %cst_43 = arith.constant 5.000000e-01 : f32
    %155 = vector.broadcast %cst_43 : f32 to vector<64x256xf32>
    %156 = arith.mulf %155, %154 : vector<64x256xf32>
    %cst_44 = arith.constant 0.707106769 : f32
    %157 = vector.broadcast %cst_44 : f32 to vector<64x256xf32>
    %158 = arith.mulf %154, %157 : vector<64x256xf32>
    %159 = math.absf %158 : vector<64x256xf32>
    %cst_45 = arith.constant 0.327591091 : f32
    %160 = vector.broadcast %cst_45 : f32 to vector<64x256xf32>
    %161 = arith.mulf %160, %159 : vector<64x256xf32>
    %cst_46 = arith.constant 1.000000e+00 : f32
    %162 = vector.broadcast %cst_46 : f32 to vector<64x256xf32>
    %163 = arith.addf %162, %161 : vector<64x256xf32>
    %cst_47 = arith.constant 1.000000e+00 : f32
    %164 = vector.broadcast %cst_47 : f32 to vector<64x256xf32>
    %165 = arith.divf %164, %163 : vector<64x256xf32>
    %cst_48 = arith.constant 1.06140542 : f32
    %166 = vector.broadcast %cst_48 : f32 to vector<64x256xf32>
    %167 = arith.mulf %166, %165 : vector<64x256xf32>
    %cst_49 = arith.constant -1.45315206 : f32
    %168 = vector.broadcast %cst_49 : f32 to vector<64x256xf32>
    %169 = arith.addf %167, %168 : vector<64x256xf32>
    %170 = arith.mulf %169, %165 : vector<64x256xf32>
    %cst_50 = arith.constant 1.42141378 : f32
    %171 = vector.broadcast %cst_50 : f32 to vector<64x256xf32>
    %172 = arith.addf %170, %171 : vector<64x256xf32>
    %173 = arith.mulf %172, %165 : vector<64x256xf32>
    %cst_51 = arith.constant -0.284496725 : f32
    %174 = vector.broadcast %cst_51 : f32 to vector<64x256xf32>
    %175 = arith.addf %173, %174 : vector<64x256xf32>
    %176 = arith.mulf %175, %165 : vector<64x256xf32>
    %cst_52 = arith.constant 0.254829586 : f32
    %177 = vector.broadcast %cst_52 : f32 to vector<64x256xf32>
    %178 = arith.addf %176, %177 : vector<64x256xf32>
    %179 = arith.mulf %178, %165 : vector<64x256xf32>
    %cst_53 = arith.constant 0.000000e+00 : f32
    %180 = vector.broadcast %cst_53 : f32 to vector<64x256xf32>
    %181 = arith.subf %180, %159 : vector<64x256xf32>
    %182 = arith.mulf %181, %159 : vector<64x256xf32>
    %183 = math.exp %182 : vector<64x256xf32>
    %184 = arith.mulf %179, %183 : vector<64x256xf32>
    %cst_54 = arith.constant 1.000000e+00 : f32
    %185 = vector.broadcast %cst_54 : f32 to vector<64x256xf32>
    %186 = arith.subf %185, %184 : vector<64x256xf32>
    %cst_55 = arith.constant 0.000000e+00 : f32
    %187 = vector.broadcast %cst_55 : f32 to vector<64x256xf32>
    %188 = arith.cmpf oge, %158, %187 : vector<64x256xf32>
    %cst_56 = arith.constant 0.000000e+00 : f32
    %189 = vector.broadcast %cst_56 : f32 to vector<64x256xf32>
    %190 = arith.subf %189, %186 : vector<64x256xf32>
    %191 = arith.select %188, %186, %190 : vector<64x256xi1>, vector<64x256xf32>
    %cst_57 = arith.constant 1.000000e+00 : f32
    %192 = vector.broadcast %cst_57 : f32 to vector<64x256xf32>
    %193 = arith.addf %192, %191 : vector<64x256xf32>
    %194 = arith.mulf %156, %193 : vector<64x256xf32>
    %195 = arith.truncf %194 : vector<64x256xf32> to vector<64x256xbf16>
    %c0_58 = arith.constant 0 : index
    %c0_59 = arith.constant 0 : index
    %196 = vector.load %arg8[%c0_58, %c0_59] : memref<256x64xbf16, #tpu.memory_space<vmem>>, vector<256x64xbf16>
    %cst_60 = arith.constant dense<0.000000e+00> : vector<64x64xf32>
    %197 = tpu.matmul %195, %196, %cst_60 {dimension_numbers = #tpu.dot_dimension_numbers<[1], [0], [0], [1], [0, 0, 1, 1], [], []>} : vector<64x256xbf16>, vector<256x64xbf16>, vector<64x64xf32> -> vector<64x64xf32>
    %c0_61 = arith.constant 0 : index
    %c0_62 = arith.constant 0 : index
    %198 = vector.load %arg9[%c0_61, %c0_62] : memref<1x64xf32, #tpu.memory_space<vmem>>, vector<1x64xf32>
    %199 = vector.shape_cast %198 : vector<1x64xf32> to vector<64xf32>
    %200 = vector.shape_cast %199 : vector<64xf32> to vector<1x64xf32>
    %201 = vector.broadcast %200 : vector<1x64xf32> to vector<64x64xf32>
    %202 = arith.addf %197, %201 : vector<64x64xf32>
    %203 = arith.addf %1, %202 : vector<64x64xf32>
    %c0_63 = arith.constant 0 : index
    %c0_64 = arith.constant 0 : index
    %c0_65 = arith.constant 0 : index
    %204 = vector.load %arg10[%c0_63, %c0_64, %c0_65] : memref<1x64x64xf32, #tpu.memory_space<vmem>>, vector<1x64x64xf32>
    %205 = vector.shape_cast %204 : vector<1x64x64xf32> to vector<64x64xf32>
    %206 = vector.shape_cast %203 : vector<64x64xf32> to vector<1x64x64xf32>
    tpu.vector_store %arg10[%c0_63, %c0_64, %c0_65], %206 {strides = array<i32>} : memref<1x64x64xf32, #tpu.memory_space<vmem>>, vector<1x64x64xf32>,
    return
  }
  func.func @transform_0(%arg0: i32) -> (i32, i32, i32) {
    %c0_i32 = arith.constant 0 : i32
    %c0_i32_0 = arith.constant 0 : i32
    %c0_i32_1 = arith.constant 0 : i32
    return %arg0, %c0_i32, %c0_i32_0 : i32, i32, i32
  }
  func.func @transform_1(%arg0: i32) -> (i32, i32) {
    %c0_i32 = arith.constant 0 : i32
    %c0_i32_0 = arith.constant 0 : i32
    %c0_i32_1 = arith.constant 0 : i32
    return %c0_i32, %c0_i32_0 : i32, i32
  }
  func.func @transform_2(%arg0: i32) -> (i32, i32) {
    %c0_i32 = arith.constant 0 : i32
    %c0_i32_0 = arith.constant 0 : i32
    %c0_i32_1 = arith.constant 0 : i32
    return %c0_i32, %c0_i32_0 : i32, i32
  }
  func.func @transform_3(%arg0: i32) -> (i32, i32) {
    %c0_i32 = arith.constant 0 : i32
    %c0_i32_0 = arith.constant 0 : i32
    %c0_i32_1 = arith.constant 0 : i32
    return %c0_i32, %c0_i32_0 : i32, i32
  }
  func.func @transform_4(%arg0: i32) -> (i32, i32) {
    %c0_i32 = arith.constant 0 : i32
    %c0_i32_0 = arith.constant 0 : i32
    %c0_i32_1 = arith.constant 0 : i32
    return %c0_i32, %c0_i32_0 : i32, i32
  }
  func.func @transform_5(%arg0: i32) -> (i32, i32) {
    %c0_i32 = arith.constant 0 : i32
    %c0_i32_0 = arith.constant 0 : i32
    %c0_i32_1 = arith.constant 0 : i32
    return %c0_i32, %c0_i32_0 : i32, i32
  }
  func.func @transform_6(%arg0: i32) -> (i32, i32) {
    %c0_i32 = arith.constant 0 : i32
    %c0_i32_0 = arith.constant 0 : i32
    %c0_i32_1 = arith.constant 0 : i32
    return %c0_i32, %c0_i32_0 : i32, i32
  }
  func.func @transform_7(%arg0: i32) -> (i32, i32) {
    %c0_i32 = arith.constant 0 : i32
    %c0_i32_0 = arith.constant 0 : i32
    %c0_i32_1 = arith.constant 0 : i32
    return %c0_i32, %c0_i32_0 : i32, i32
  }
  func.func @transform_8(%arg0: i32) -> (i32, i32) {
    %c0_i32 = arith.constant 0 : i32
    %c0_i32_0 = arith.constant 0 : i32
    %c0_i32_1 = arith.constant 0 : i32
    return %c0_i32, %c0_i32_0 : i32, i32
  }
  func.func @transform_9(%arg0: i32) -> (i32, i32, i32) {
    %c0_i32 = arith.constant 0 : i32
    %c0_i32_0 = arith.constant 0 : i32
    %c0_i32_1 = arith.constant 0 : i32
    return %arg0, %c0_i32, %c0_i32_0 : i32, i32, i32
  }
}

module attributes {stable_mosaic.version = 11 : i64} {
  func.func @_attn_block_kernel(%arg0: i32, %arg1: memref<1x64x64xf32, #tpu.memory_space<vmem>>, %arg2: memref<1x64xf32, #tpu.memory_space<vmem>>, %arg3: memref<1x64xf32, #tpu.memory_space<vmem>>, %arg4: memref<64x64xbf16, #tpu.memory_space<vmem>>, %arg5: memref<64x64xbf16, #tpu.memory_space<vmem>>, %arg6: memref<64x64xbf16, #tpu.memory_space<vmem>>, %arg7: memref<1x64xf32, #tpu.memory_space<vmem>>, %arg8: memref<1x64xf32, #tpu.memory_space<vmem>>, %arg9: memref<1x64xf32, #tpu.memory_space<vmem>>, %arg10: memref<64x128xbf16, #tpu.memory_space<vmem>>, %arg11: memref<64x64xbf16, #tpu.memory_space<vmem>>, %arg12: memref<1x64xf32, #tpu.memory_space<vmem>>, %arg13: memref<1x64xf32, #tpu.memory_space<vmem>>, %arg14: memref<1x64x64xf32, #tpu.memory_space<vmem>>) attributes {dimension_semantics = [#tpu.dimension_semantics<parallel>], iteration_bounds = array<i64: 2>, scalar_prefetch = 0 : i64, scratch_operands = 0 : i64, tpu.core_type = #tpu.core_type<tc>, window_params = [{transform_indices = @transform_0, window_bounds = array<i64: 1, 64, 64>}, {pipeline_mode = #tpu.pipeline_mode<synchronous>, transform_indices = @transform_1, window_bounds = array<i64: 1, 64>}, {pipeline_mode = #tpu.pipeline_mode<synchronous>, transform_indices = @transform_2, window_bounds = array<i64: 1, 64>}, {pipeline_mode = #tpu.pipeline_mode<synchronous>, transform_indices = @transform_3, window_bounds = array<i64: 64, 64>}, {pipeline_mode = #tpu.pipeline_mode<synchronous>, transform_indices = @transform_4, window_bounds = array<i64: 64, 64>}, {pipeline_mode = #tpu.pipeline_mode<synchronous>, transform_indices = @transform_5, window_bounds = array<i64: 64, 64>}, {pipeline_mode = #tpu.pipeline_mode<synchronous>, transform_indices = @transform_6, window_bounds = array<i64: 1, 64>}, {pipeline_mode = #tpu.pipeline_mode<synchronous>, transform_indices = @transform_7, window_bounds = array<i64: 1, 64>}, {pipeline_mode = #tpu.pipeline_mode<synchronous>, transform_indices = @transform_8, window_bounds = array<i64: 1, 64>}, {pipeline_mode = #tpu.pipeline_mode<synchronous>, transform_indices = @transform_9, window_bounds = array<i64: 64, 128>}, {pipeline_mode = #tpu.pipeline_mode<synchronous>, transform_indices = @transform_10, window_bounds = array<i64: 64, 64>}, {pipeline_mode = #tpu.pipeline_mode<synchronous>, transform_indices = @transform_11, window_bounds = array<i64: 1, 64>}, {pipeline_mode = #tpu.pipeline_mode<synchronous>, transform_indices = @transform_12, window_bounds = array<i64: 1, 64>}, {transform_indices = @transform_13, window_bounds = array<i64: 1, 64, 64>}]} {
    %c0 = arith.constant 0 : index
    %c0_0 = arith.constant 0 : index
    %c0_1 = arith.constant 0 : index
    %0 = vector.load %arg1[%c0, %c0_0, %c0_1] : memref<1x64x64xf32, #tpu.memory_space<vmem>>, vector<1x64x64xf32>
    %1 = vector.shape_cast %0 : vector<1x64x64xf32> to vector<64x64xf32>
    %c0_2 = arith.constant 0 : index
    %c0_3 = arith.constant 0 : index
    %2 = vector.load %arg2[%c0_2, %c0_3] : memref<1x64xf32, #tpu.memory_space<vmem>>, vector<1x64xf32>
    %3 = vector.shape_cast %2 : vector<1x64xf32> to vector<64xf32>
    %c0_4 = arith.constant 0 : index
    %c0_5 = arith.constant 0 : index
    %4 = vector.load %arg3[%c0_4, %c0_5] : memref<1x64xf32, #tpu.memory_space<vmem>>, vector<1x64xf32>
    %5 = vector.shape_cast %4 : vector<1x64xf32> to vector<64xf32>
    %cst = arith.constant dense<0.000000e+00> : vector<64xf32>
    %6 = vector.multi_reduction <add>, %1, %cst [1] : vector<64x64xf32> to vector<64xf32>
    %7 = vector.shape_cast %6 : vector<64xf32> to vector<64x1xf32>
    %cst_6 = arith.constant 6.400000e+01 : f32
    %8 = vector.broadcast %cst_6 : f32 to vector<64x1xf32>
    %9 = arith.divf %7, %8 : vector<64x1xf32>
    %10 = vector.broadcast %9 : vector<64x1xf32> to vector<64x64xf32>
    %11 = arith.subf %1, %10 : vector<64x64xf32>
    %12 = arith.mulf %11, %11 : vector<64x64xf32>
    %cst_7 = arith.constant dense<0.000000e+00> : vector<64xf32>
    %13 = vector.multi_reduction <add>, %12, %cst_7 [1] : vector<64x64xf32> to vector<64xf32>
    %14 = vector.shape_cast %13 : vector<64xf32> to vector<64x1xf32>
    %cst_8 = arith.constant 6.400000e+01 : f32
    %15 = vector.broadcast %cst_8 : f32 to vector<64x1xf32>
    %16 = arith.divf %14, %15 : vector<64x1xf32>
    %cst_9 = arith.constant 9.99999997E-7 : f32
    %17 = vector.broadcast %cst_9 : f32 to vector<64x1xf32>
    %18 = arith.addf %16, %17 : vector<64x1xf32>
    %19 = math.rsqrt %18 : vector<64x1xf32>
    %20 = vector.broadcast %19 : vector<64x1xf32> to vector<64x64xf32>
    %21 = arith.mulf %11, %20 : vector<64x64xf32>
    %22 = vector.shape_cast %3 : vector<64xf32> to vector<1x64xf32>
    %23 = vector.broadcast %22 : vector<1x64xf32> to vector<64x64xf32>
    %24 = arith.mulf %21, %23 : vector<64x64xf32>
    %25 = vector.shape_cast %5 : vector<64xf32> to vector<1x64xf32>
    %26 = vector.broadcast %25 : vector<1x64xf32> to vector<64x64xf32>
    %27 = arith.addf %24, %26 : vector<64x64xf32>
    %28 = arith.truncf %27 : vector<64x64xf32> to vector<64x64xbf16>
    %c0_10 = arith.constant 0 : index
    %c0_11 = arith.constant 0 : index
    %29 = vector.load %arg4[%c0_10, %c0_11] : memref<64x64xbf16, #tpu.memory_space<vmem>>, vector<64x64xbf16>
    %cst_12 = arith.constant dense<0.000000e+00> : vector<64x64xf32>
    %30 = tpu.matmul %28, %29, %cst_12 {dimension_numbers = #tpu.dot_dimension_numbers<[1], [0], [0], [1], [0, 0, 1, 1], [], []>} : vector<64x64xbf16>, vector<64x64xbf16>, vector<64x64xf32> -> vector<64x64xf32>
    %c0_13 = arith.constant 0 : index
    %c0_14 = arith.constant 0 : index
    %31 = vector.load %arg5[%c0_13, %c0_14] : memref<64x64xbf16, #tpu.memory_space<vmem>>, vector<64x64xbf16>
    %cst_15 = arith.constant dense<0.000000e+00> : vector<64x64xf32>
    %32 = tpu.matmul %31, %28, %cst_15 {dimension_numbers = #tpu.dot_dimension_numbers<[1], [0], [0], [1], [0, 0, 1, 1], [], []>} : vector<64x64xbf16>, vector<64x64xbf16>, vector<64x64xf32> -> vector<64x64xf32>
    %33 = arith.truncf %32 : vector<64x64xf32> to vector<64x64xbf16>
    %c0_16 = arith.constant 0 : index
    %c0_17 = arith.constant 0 : index
    %34 = vector.load %arg6[%c0_16, %c0_17] : memref<64x64xbf16, #tpu.memory_space<vmem>>, vector<64x64xbf16>
    %cst_18 = arith.constant dense<0.000000e+00> : vector<64x64xf32>
    %35 = tpu.matmul %33, %34, %cst_18 {dimension_numbers = #tpu.dot_dimension_numbers<[1], [0], [0], [1], [0, 0, 1, 1], [], []>} : vector<64x64xbf16>, vector<64x64xbf16>, vector<64x64xf32> -> vector<64x64xf32>
    %c0_19 = arith.constant 0 : index
    %c0_20 = arith.constant 0 : index
    %36 = vector.load %arg7[%c0_19, %c0_20] : memref<1x64xf32, #tpu.memory_space<vmem>>, vector<1x64xf32>
    %37 = vector.shape_cast %36 : vector<1x64xf32> to vector<64xf32>
    %38 = vector.shape_cast %37 : vector<64xf32> to vector<1x64xf32>
    %39 = vector.broadcast %38 : vector<1x64xf32> to vector<64x64xf32>
    %40 = arith.addf %35, %39 : vector<64x64xf32>
    %c0_21 = arith.constant 0 : index
    %c0_22 = arith.constant 0 : index
    %41 = vector.load %arg8[%c0_21, %c0_22] : memref<1x64xf32, #tpu.memory_space<vmem>>, vector<1x64xf32>
    %42 = vector.shape_cast %41 : vector<1x64xf32> to vector<64xf32>
    %c0_23 = arith.constant 0 : index
    %c0_24 = arith.constant 0 : index
    %43 = vector.load %arg9[%c0_23, %c0_24] : memref<1x64xf32, #tpu.memory_space<vmem>>, vector<1x64xf32>
    %44 = vector.shape_cast %43 : vector<1x64xf32> to vector<64xf32>
    %cst_25 = arith.constant dense<0.000000e+00> : vector<64xf32>
    %45 = vector.multi_reduction <add>, %40, %cst_25 [1] : vector<64x64xf32> to vector<64xf32>
    %46 = vector.shape_cast %45 : vector<64xf32> to vector<64x1xf32>
    %cst_26 = arith.constant 6.400000e+01 : f32
    %47 = vector.broadcast %cst_26 : f32 to vector<64x1xf32>
    %48 = arith.divf %46, %47 : vector<64x1xf32>
    %49 = vector.broadcast %48 : vector<64x1xf32> to vector<64x64xf32>
    %50 = arith.subf %40, %49 : vector<64x64xf32>
    %51 = arith.mulf %50, %50 : vector<64x64xf32>
    %cst_27 = arith.constant dense<0.000000e+00> : vector<64xf32>
    %52 = vector.multi_reduction <add>, %51, %cst_27 [1] : vector<64x64xf32> to vector<64xf32>
    %53 = vector.shape_cast %52 : vector<64xf32> to vector<64x1xf32>
    %cst_28 = arith.constant 6.400000e+01 : f32
    %54 = vector.broadcast %cst_28 : f32 to vector<64x1xf32>
    %55 = arith.divf %53, %54 : vector<64x1xf32>
    %cst_29 = arith.constant 9.99999974E-6 : f32
    %56 = vector.broadcast %cst_29 : f32 to vector<64x1xf32>
    %57 = arith.addf %55, %56 : vector<64x1xf32>
    %58 = math.rsqrt %57 : vector<64x1xf32>
    %59 = vector.broadcast %58 : vector<64x1xf32> to vector<64x64xf32>
    %60 = arith.mulf %50, %59 : vector<64x64xf32>
    %61 = vector.shape_cast %42 : vector<64xf32> to vector<1x64xf32>
    %62 = vector.broadcast %61 : vector<1x64xf32> to vector<64x64xf32>
    %63 = arith.mulf %60, %62 : vector<64x64xf32>
    %64 = vector.shape_cast %44 : vector<64xf32> to vector<1x64xf32>
    %65 = vector.broadcast %64 : vector<1x64xf32> to vector<64x64xf32>
    %66 = arith.addf %63, %65 : vector<64x64xf32>
    %cst_30 = arith.constant 5.000000e-01 : f32
    %67 = vector.broadcast %cst_30 : f32 to vector<64x64xf32>
    %68 = arith.mulf %67, %66 : vector<64x64xf32>
    %cst_31 = arith.constant 0.707106769 : f32
    %69 = vector.broadcast %cst_31 : f32 to vector<64x64xf32>
    %70 = arith.mulf %66, %69 : vector<64x64xf32>
    %71 = math.absf %70 : vector<64x64xf32>
    %cst_32 = arith.constant 0.327591091 : f32
    %72 = vector.broadcast %cst_32 : f32 to vector<64x64xf32>
    %73 = arith.mulf %72, %71 : vector<64x64xf32>
    %cst_33 = arith.constant 1.000000e+00 : f32
    %74 = vector.broadcast %cst_33 : f32 to vector<64x64xf32>
    %75 = arith.addf %74, %73 : vector<64x64xf32>
    %cst_34 = arith.constant 1.000000e+00 : f32
    %76 = vector.broadcast %cst_34 : f32 to vector<64x64xf32>
    %77 = arith.divf %76, %75 : vector<64x64xf32>
    %cst_35 = arith.constant 1.06140542 : f32
    %78 = vector.broadcast %cst_35 : f32 to vector<64x64xf32>
    %79 = arith.mulf %78, %77 : vector<64x64xf32>
    %cst_36 = arith.constant -1.45315206 : f32
    %80 = vector.broadcast %cst_36 : f32 to vector<64x64xf32>
    %81 = arith.addf %79, %80 : vector<64x64xf32>
    %82 = arith.mulf %81, %77 : vector<64x64xf32>
    %cst_37 = arith.constant 1.42141378 : f32
    %83 = vector.broadcast %cst_37 : f32 to vector<64x64xf32>
    %84 = arith.addf %82, %83 : vector<64x64xf32>
    %85 = arith.mulf %84, %77 : vector<64x64xf32>
    %cst_38 = arith.constant -0.284496725 : f32
    %86 = vector.broadcast %cst_38 : f32 to vector<64x64xf32>
    %87 = arith.addf %85, %86 : vector<64x64xf32>
    %88 = arith.mulf %87, %77 : vector<64x64xf32>
    %cst_39 = arith.constant 0.254829586 : f32
    %89 = vector.broadcast %cst_39 : f32 to vector<64x64xf32>
    %90 = arith.addf %88, %89 : vector<64x64xf32>
    %91 = arith.mulf %90, %77 : vector<64x64xf32>
    %cst_40 = arith.constant 0.000000e+00 : f32
    %92 = vector.broadcast %cst_40 : f32 to vector<64x64xf32>
    %93 = arith.subf %92, %71 : vector<64x64xf32>
    %94 = arith.mulf %93, %71 : vector<64x64xf32>
    %95 = math.exp %94 : vector<64x64xf32>
    %96 = arith.mulf %91, %95 : vector<64x64xf32>
    %cst_41 = arith.constant 1.000000e+00 : f32
    %97 = vector.broadcast %cst_41 : f32 to vector<64x64xf32>
    %98 = arith.subf %97, %96 : vector<64x64xf32>
    %cst_42 = arith.constant 0.000000e+00 : f32
    %99 = vector.broadcast %cst_42 : f32 to vector<64x64xf32>
    %100 = arith.cmpf oge, %70, %99 : vector<64x64xf32>
    %cst_43 = arith.constant 0.000000e+00 : f32
    %101 = vector.broadcast %cst_43 : f32 to vector<64x64xf32>
    %102 = arith.subf %101, %98 : vector<64x64xf32>
    %103 = arith.select %100, %98, %102 : vector<64x64xi1>, vector<64x64xf32>
    %cst_44 = arith.constant 1.000000e+00 : f32
    %104 = vector.broadcast %cst_44 : f32 to vector<64x64xf32>
    %105 = arith.addf %104, %103 : vector<64x64xf32>
    %106 = arith.mulf %68, %105 : vector<64x64xf32>
    %107 = arith.truncf %106 : vector<64x64xf32> to vector<64x64xbf16>
    %c0_45 = arith.constant 0 : index
    %c0_46 = arith.constant 0 : index
    %108 = vector.load %arg10[%c0_45, %c0_46] : memref<64x128xbf16, #tpu.memory_space<vmem>>, vector<64x128xbf16>
    %cst_47 = arith.constant dense<0.000000e+00> : vector<64x128xf32>
    %109 = tpu.matmul %107, %108, %cst_47 {dimension_numbers = #tpu.dot_dimension_numbers<[1], [0], [0], [1], [0, 0, 1, 1], [], []>} : vector<64x64xbf16>, vector<64x128xbf16>, vector<64x128xf32> -> vector<64x128xf32>
    %c0_48 = arith.constant 0 : index
    %c0_49 = arith.constant 0 : index
    %110 = vector.load %arg13[%c0_48, %c0_49] : memref<1x64xf32, #tpu.memory_space<vmem>>, vector<1x64xf32>
    %111 = vector.shape_cast %110 : vector<1x64xf32> to vector<64xf32>
    %112 = arith.truncf %30 : vector<64x64xf32> to vector<64x64xbf16>
    %113 = vector.extract_strided_slice %109 {offsets = [0, 0], sizes = [64, 64], strides = [1, 1]} : vector<64x128xf32> to vector<64x64xf32>
    %114 = arith.truncf %113 : vector<64x64xf32> to vector<64x64xbf16>
    %115 = vector.extract_strided_slice %109 {offsets = [0, 64], sizes = [64, 64], strides = [1, 1]} : vector<64x128xf32> to vector<64x64xf32>
    %116 = arith.truncf %115 : vector<64x64xf32> to vector<64x64xbf16>
    %cst_50 = arith.constant dense<0.000000e+00> : vector<64x64xf32>
    %117 = tpu.matmul %112, %114, %cst_50 {dimension_numbers = #tpu.dot_dimension_numbers<[1], [1], [0], [0], [0, 0, 1, 0], [], []>} : vector<64x64xbf16>, vector<64x64xbf16>, vector<64x64xf32> -> vector<64x64xf32>
    %cst_51 = arith.constant 1.250000e-01 : f32
    %118 = vector.broadcast %cst_51 : f32 to vector<64x64xf32>
    %119 = arith.mulf %117, %118 : vector<64x64xf32>
    %120 = vector.shape_cast %111 : vector<64xf32> to vector<1x64xf32>
    %121 = vector.broadcast %120 : vector<1x64xf32> to vector<64x64xf32>
    %122 = arith.addf %119, %121 : vector<64x64xf32>
    %cst_52 = arith.constant dense<0xFF800000> : vector<64xf32>
    %123 = vector.multi_reduction <maximumf>, %122, %cst_52 [1] : vector<64x64xf32> to vector<64xf32>
    %124 = vector.shape_cast %123 : vector<64xf32> to vector<64x1xf32>
    %125 = vector.broadcast %124 : vector<64x1xf32> to vector<64x64xf32>
    %126 = arith.subf %122, %125 : vector<64x64xf32>
    %127 = math.exp %126 : vector<64x64xf32>
    %cst_53 = arith.constant dense<0.000000e+00> : vector<64xf32>
    %128 = vector.multi_reduction <add>, %127, %cst_53 [1] : vector<64x64xf32> to vector<64xf32>
    %129 = vector.shape_cast %128 : vector<64xf32> to vector<64x1xf32>
    %130 = arith.truncf %127 : vector<64x64xf32> to vector<64x64xbf16>
    %cst_54 = arith.constant dense<0.000000e+00> : vector<64x64xf32>
    %131 = tpu.matmul %130, %116, %cst_54 {dimension_numbers = #tpu.dot_dimension_numbers<[1], [0], [0], [1], [0, 0, 1, 1], [], []>} : vector<64x64xbf16>, vector<64x64xbf16>, vector<64x64xf32> -> vector<64x64xf32>
    %132 = tpu.reciprocal %129 {approx = true} : vector<64x1xf32> -> vector<64x1xf32>
    %133 = vector.broadcast %132 : vector<64x1xf32> to vector<64x64xf32>
    %134 = arith.mulf %131, %133 : vector<64x64xf32>
    %135 = arith.truncf %134 : vector<64x64xf32> to vector<64x64xbf16>
    %c0_55 = arith.constant 0 : index
    %c0_56 = arith.constant 0 : index
    %136 = vector.load %arg11[%c0_55, %c0_56] : memref<64x64xbf16, #tpu.memory_space<vmem>>, vector<64x64xbf16>
    %cst_57 = arith.constant dense<0.000000e+00> : vector<64x64xf32>
    %137 = tpu.matmul %135, %136, %cst_57 {dimension_numbers = #tpu.dot_dimension_numbers<[1], [0], [0], [1], [0, 0, 1, 1], [], []>} : vector<64x64xbf16>, vector<64x64xbf16>, vector<64x64xf32> -> vector<64x64xf32>
    %c0_58 = arith.constant 0 : index
    %c0_59 = arith.constant 0 : index
    %138 = vector.load %arg12[%c0_58, %c0_59] : memref<1x64xf32, #tpu.memory_space<vmem>>, vector<1x64xf32>
    %139 = vector.shape_cast %138 : vector<1x64xf32> to vector<64xf32>
    %140 = vector.shape_cast %139 : vector<64xf32> to vector<1x64xf32>
    %141 = vector.broadcast %140 : vector<1x64xf32> to vector<64x64xf32>
    %142 = arith.addf %137, %141 : vector<64x64xf32>
    %143 = arith.addf %1, %142 : vector<64x64xf32>
    %c0_60 = arith.constant 0 : index
    %c0_61 = arith.constant 0 : index
    %c0_62 = arith.constant 0 : index
    %144 = vector.load %arg14[%c0_60, %c0_61, %c0_62] : memref<1x64x64xf32, #tpu.memory_space<vmem>>, vector<1x64x64xf32>
    %145 = vector.shape_cast %144 : vector<1x64x64xf32> to vector<64x64xf32>
    %146 = vector.shape_cast %143 : vector<64x64xf32> to vector<1x64x64xf32>
    tpu.vector_store %arg14[%c0_60, %c0_61, %c0_62], %146 {strides = array<i32>} : memref<1x64x64xf32, #tpu.memory_space<vmem>>, vector<1x64x64xf32>,
    return
  }
  func.func @transform_0(%arg0: i32) -> (i32, i32, i32) {
    %c0_i32 = arith.constant 0 : i32
    %c0_i32_0 = arith.constant 0 : i32
    %c0_i32_1 = arith.constant 0 : i32
    return %arg0, %c0_i32, %c0_i32_0 : i32, i32, i32
  }
  func.func @transform_1(%arg0: i32) -> (i32, i32) {
    %c0_i32 = arith.constant 0 : i32
    %c0_i32_0 = arith.constant 0 : i32
    %c0_i32_1 = arith.constant 0 : i32
    return %c0_i32, %c0_i32_0 : i32, i32
  }
  func.func @transform_2(%arg0: i32) -> (i32, i32) {
    %c0_i32 = arith.constant 0 : i32
    %c0_i32_0 = arith.constant 0 : i32
    %c0_i32_1 = arith.constant 0 : i32
    return %c0_i32, %c0_i32_0 : i32, i32
  }
  func.func @transform_3(%arg0: i32) -> (i32, i32) {
    %c0_i32 = arith.constant 0 : i32
    %c0_i32_0 = arith.constant 0 : i32
    %c0_i32_1 = arith.constant 0 : i32
    return %c0_i32, %c0_i32_0 : i32, i32
  }
  func.func @transform_4(%arg0: i32) -> (i32, i32) {
    %c0_i32 = arith.constant 0 : i32
    %c0_i32_0 = arith.constant 0 : i32
    %c0_i32_1 = arith.constant 0 : i32
    return %c0_i32, %c0_i32_0 : i32, i32
  }
  func.func @transform_5(%arg0: i32) -> (i32, i32) {
    %c0_i32 = arith.constant 0 : i32
    %c0_i32_0 = arith.constant 0 : i32
    %c0_i32_1 = arith.constant 0 : i32
    return %c0_i32, %c0_i32_0 : i32, i32
  }
  func.func @transform_6(%arg0: i32) -> (i32, i32) {
    %c0_i32 = arith.constant 0 : i32
    %c0_i32_0 = arith.constant 0 : i32
    %c0_i32_1 = arith.constant 0 : i32
    return %c0_i32, %c0_i32_0 : i32, i32
  }
  func.func @transform_7(%arg0: i32) -> (i32, i32) {
    %c0_i32 = arith.constant 0 : i32
    %c0_i32_0 = arith.constant 0 : i32
    %c0_i32_1 = arith.constant 0 : i32
    return %c0_i32, %c0_i32_0 : i32, i32
  }
  func.func @transform_8(%arg0: i32) -> (i32, i32) {
    %c0_i32 = arith.constant 0 : i32
    %c0_i32_0 = arith.constant 0 : i32
    %c0_i32_1 = arith.constant 0 : i32
    return %c0_i32, %c0_i32_0 : i32, i32
  }
  func.func @transform_9(%arg0: i32) -> (i32, i32) {
    %c0_i32 = arith.constant 0 : i32
    %c0_i32_0 = arith.constant 0 : i32
    %c0_i32_1 = arith.constant 0 : i32
    return %c0_i32, %c0_i32_0 : i32, i32
  }
  func.func @transform_10(%arg0: i32) -> (i32, i32) {
    %c0_i32 = arith.constant 0 : i32
    %c0_i32_0 = arith.constant 0 : i32
    %c0_i32_1 = arith.constant 0 : i32
    return %c0_i32, %c0_i32_0 : i32, i32
  }
  func.func @transform_11(%arg0: i32) -> (i32, i32) {
    %c0_i32 = arith.constant 0 : i32
    %c0_i32_0 = arith.constant 0 : i32
    %c0_i32_1 = arith.constant 0 : i32
    return %c0_i32, %c0_i32_0 : i32, i32
  }
  func.func @transform_12(%arg0: i32) -> (i32, i32) {
    %c0_i32 = arith.constant 0 : i32
    %c0_i32_0 = arith.constant 0 : i32
    %c0_i32_1 = arith.constant 0 : i32
    return %c0_i32, %c0_i32_0 : i32, i32
  }
  func.func @transform_13(%arg0: i32) -> (i32, i32, i32) {
    %c0_i32 = arith.constant 0 : i32
    %c0_i32_0 = arith.constant 0 : i32
    %c0_i32_1 = arith.constant 0 : i32
    return %arg0, %c0_i32, %c0_i32_0 : i32, i32, i32
  }
}

</mosaic_0001>

<bundles_post_ra>
// kernel: _lambda_.6
= control target key start
LH: loop header
LB: loop body
LE: loop exit
PB: predicated region body
PF: predicated region fallthrough
CT: control target
= control target key end

     0   :  { %s710_s18 = smov 0   ;;  %s810_s0 = inlined_call_operand.vmem [shape: f32[128,256], index: 0, kind: input, shape index: {}]   ;;  %s811_s1 = inlined_call_operand.vmem [shape: bf16[256,64], index: 1, kind: input, shape index: {}]   ;;  %s812_s2 = inlined_call_operand.vmem [shape: f32[1,64], index: 2, kind: input, shape index: {}]   ;;  %s813_s3 = inlined_call_operand.vmem [shape: f32[1,64], index: 3, kind: input, shape index: {}]   ;;  %s814_s4 = inlined_call_operand.vmem [shape: f32[1,64], index: 4, kind: input, shape index: {}]   ;;  %s815_s5 = inlined_call_operand.vmem [shape: f32[128,64], index: 5, kind: output, shape index: {}]  }
   0x1 LB: > { %s564_s19 = sadd.s32 4294967295, %s678_s18   ;;  %p568_p0 = scmp.ge.s32.totalorder %s678_s18, 1  ;;  %s678_s18 = sphi %s710_s18, %s15_s18  }
   0x2   : > { %p189_p1 = scmp.lt.s32.totalorder %s678_s18, 5 }
   0x4   : > { %p190_p2 = pnand %p568_p0, %p189_p1 }
   0x5   : > { %v648_v0 = vld [vmem:[%s811_s1 + $0x40] sm:$0xff] (!%p190_p2)   ;;  %s569_s22 = sshll.u32 (!%p190_p2), %s564_s19, 2  ;;  %v650_v2 = vld [vmem:[%s811_s1 + $0x48] sm:$0xff] (!%p190_p2)   ;;  %v652_v4 = vld [vmem:[%s811_s1 + $0x50] sm:$0xff] (!%p190_p2)   ;;  %vm430_vm0 = vcmask (!%p190_p2), 523264  }
   0x6   : > { %193 = sbr.rel (%p190_p2) target bundleno = 577 (0x241), region = 40  ;;  %v649_v1 = vld [vmem:[%s811_s1] sm:$0xff] (!%p190_p2)   ;;  %596 = vmatprep.subr.bf16.mxu0 (!%p190_p2), %v648_v0  ;;  %624 = vmatprep.subr.bf16.mxu1 (!%p190_p2), %v648_v0  ;;  %p219_p3 = scmp.lt.s32.totalorder (!%p190_p2), %s569_s22, 15  ;;  %v651_v3 = vld [vmem:[%s811_s1 + $0x8] sm:$0xff] (!%p190_p2)   ;;  %v653_v5 = vld [vmem:[%s811_s1 + $0x10] sm:$0xff] (!%p190_p2)  }
   0x7   : > { %597 = vmatpush3.bf16.msra.mxu0 (!%p190_p2), %v649_v1  ;;  %632 = vmatpush3.bf16.msra.mxu1 (!%p190_p2), %v649_v1  ;;  %v654_v6 = vld [vmem:[%s811_s1 + $0x58] sm:$0xff] (!%p190_p2)   ;;  %v656_v8 = vld [vmem:[%s811_s1 + $0x60] sm:$0xff] (!%p190_p2)   ;;  %v658_v10 = vld [vmem:[%s811_s1 + $0x68] sm:$0xff] (!%p190_p2)  }
   0x8   : > { %598 = vmatprep.subr.bf16.mxu0 (!%p190_p2), %v650_v2  ;;  %625 = vmatprep.subr.bf16.mxu1 (!%p190_p2), %v650_v2  ;;  %v655_v7 = vld [vmem:[%s811_s1 + $0x18] sm:$0xff] (!%p190_p2)   ;;  %v657_v9 = vld [vmem:[%s811_s1 + $0x20] sm:$0xff] (!%p190_p2)   ;;  %v659_v17 = vld [vmem:[%s811_s1 + $0x28] sm:$0xff] (!%p190_p2)  }
   0x9   : > { %v660_v18 = vld [vmem:[%s811_s1 + $0x70] sm:$0xff] (!%p190_p2)   ;;  %v662_v20 = vld [vmem:[%s811_s1 + $0x78] sm:$0xff] (!%p190_p2)   ;;  %v574_v32 = vld [vmem:[%s812_s2] ss:$0 sm:$0xff] (!%p190_p2) }
   0xa   : > { %v661_v19 = vld [vmem:[%s811_s1 + $0x30] sm:$0xff] (!%p190_p2)   ;;  %v663_v21 = vld [vmem:[%s811_s1 + $0x38] sm:$0xff] (!%p190_p2)  }
   0xb   : > { %599 = vmatpush3.bf16.msra.mxu0 (!%p190_p2), %v651_v3  ;;  %633 = vmatpush3.bf16.msra.mxu1 (!%p190_p2), %v651_v3 }
   0xc   : > { %600 = vmatprep.subr.bf16.mxu0 (!%p190_p2), %v652_v4  ;;  %626 = vmatprep.subr.bf16.mxu1 (!%p190_p2), %v652_v4 }
   0xd   : > { %s817_s22 = smov (!%p219_p3, %s569_s22), 15 }
   0xe   : > { %s595_s10 = sshll.u32 %s817_s22, 4  ;;  %s573_s13 = sshll.u32 %s817_s22, 3 }
   0xf   : > { %601 = vmatpush3.bf16.msra.mxu0 %v653_v5  ;;  %634 = vmatpush3.bf16.msra.mxu1 %v653_v5  ;;  %s751_s17 = scalar_lea.vmem %s810_s0, %s595_s10  ;;  %s229_s19 = scalar_lea.vmem %s815_s5, %s573_s13 }
  0x10   : > { %602 = vmatprep.subr.bf16.mxu0 %v654_v6  ;;  %627 = vmatprep.subr.bf16.mxu1 %v654_v6  ;;  %v233_v11 = vld [vmem:[%s751_s17 + $0x8] sm:$0xff]  ;;  %v235_v12 = vld [vmem:[%s751_s17 + $0x18] sm:$0xff]  ;;  %v232_v22 = vld [vmem:[%s751_s17] sm:$0xff] }
  0x11   : > { %v237_v13 = vld [vmem:[%s751_s17 + $0x28] sm:$0xff]  ;;  %v241_v14 = vpack.c.bf16 %v235_v12, %v233_v11  ;;  %v239_v15 = vld [vmem:[%s751_s17 + $0x38] sm:$0xff]  ;;  %v234_v23 = vld [vmem:[%s751_s17 + $0x10] sm:$0xff] }
  0x12   : > { %v243_v16 = vpack.c.bf16 %v239_v15, %v237_v13  ;;  %v236_v24 = vld [vmem:[%s751_s17 + $0x20] sm:$0xff]  ;;  %v238_v25 = vld [vmem:[%s751_s17 + $0x30] sm:$0xff]  ;;  %v240_v26 = vpack.c.bf16 %v234_v23, %v232_v22 }
  0x13   : > { %603 = vmatpush3.bf16.msra.mxu0 %v655_v7  ;;  %635 = vmatpush3.bf16.msra.mxu1 %v655_v7  ;;  %v242_v27 = vpack.c.bf16 %v238_v25, %v236_v24 }
  0x14   : > { %604 = vmatprep.subr.bf16.mxu0 %v656_v8  ;;  %628 = vmatprep.subr.bf16.mxu1 %v656_v8 }
  0x15   : > { %411 = vmatprep.mubr.bf16.mxu0 %v241_v14  ;;  %419 = vmatprep.mubr.bf16.mxu1 %v243_v16 }
  0x17   : > { %605 = vmatpush3.bf16.msra.mxu0 %v657_v9  ;;  %636 = vmatpush3.bf16.msra.mxu1 %v657_v9 }
  0x18   : > { %606 = vmatprep.subr.bf16.mxu0 %v658_v10  ;;  %629 = vmatprep.subr.bf16.mxu1 %v658_v10 }
  0x1b   : > { %607 = vmatpush3.bf16.msra.mxu0 %v659_v17  ;;  %637 = vmatpush3.bf16.msra.mxu1 %v659_v17 }
  0x1c   : > { %608 = vmatprep.subr.bf16.mxu0 %v660_v18  ;;  %630 = vmatprep.subr.bf16.mxu1 %v660_v18  ;;  %v591_v18 = vld [vmem:[%s813_s3] ss:$0 sm:$0xff] }
  0x1f   : > { %609 = vmatpush3.bf16.msra.mxu0 %v661_v19  ;;  %638 = vmatpush3.bf16.msra.mxu1 %v661_v19 }
  0x20   : > { %610 = vmatprep.subr.bf16.mxu0 %v662_v20  ;;  %631 = vmatprep.subr.bf16.mxu1 %v662_v20  ;;  %v592_v20 = vld [vmem:[%s814_s4] ss:$0 sm:$0xff] }
  0x23   : > { %611 = vmatpush3.bf16.msra.mxu0 %v663_v21  ;;  %639 = vmatpush3.bf16.msra.mxu1 %v663_v21 }
  0x26   : > { %412 = vmatmul.mubr.bf16.vlgmr.msra.gmra.mrb[0].mxu0 %v240_v26  ;;  %420 = vmatmul.mubr.bf16.vlgmr.msra.gmra.mrb[0].mxu1 %v242_v27 }
  0xf9   : > { %v612_v28 = vpop.f32.mrb[0].mxu0  ;;  %v618_v29 = vpop.f32.mrb[0].mxu1 }
  0xfa   : > { %v613_v30 = vpop.f32.mrb[1].mxu0  ;;  %v619_v31 = vpop.f32.mrb[1].mxu1 }
  0xfb   : > { %v614_v33 = vadd.f32 %v613_v30, %v612_v28  ;;  %v620_v34 = vadd.f32 %v619_v31, %v618_v29  ;;  %v615_v35 = vpop.f32.mrb[2].mxu0  ;;  %v621_v36 = vpop.f32.mrb[2].mxu1 }
  0xfc   : > { %v616_v37 = vpop.f32.mrb[3].mxu0  ;;  %v622_v38 = vpop.f32.mrb[3].mxu1 }
  0xfd   : > { %v617_v39 = vadd.f32 %v616_v37, %v615_v35  ;;  %v623_v40 = vadd.f32 %v622_v38, %v621_v36  ;;  %v422_v41 = vadd.f32 %v620_v34, %v574_v32  ;;  %v414_v42 = vadd.f32 %v614_v33, %v574_v32 }
  0xff   : > { %v437_v43 = vsel %vm430_vm0, %v422_v41, 0.0  ;;  %v431_v44 = vsel %vm430_vm0, %v414_v42, 0.0  ;;  %v425_v45 = vadd.f32 %v623_v40, %v574_v32  ;;  %v417_v46 = vadd.f32 %v617_v39, %v574_v32 }
 0x100   : > { %438 = vadd.xlane.f32.xlu1 %v437_v43  ;;  %432 = vadd.xlane.f32.xlu0 %v431_v44 }
 0x101   : > { %v440_v47 = vsel %vm430_vm0, %v425_v45, 0.0  ;;  %v434_v48 = vsel %vm430_vm0, %v417_v46, 0.0 }
 0x104   : > { %441 = vadd.xlane.f32.xlu1 %v440_v47  ;;  %435 = vadd.xlane.f32.xlu0 %v434_v48 }
 0x18d   : > { %v439_v49 = vpop.xlane.xlu1 %438  ;;  %v433_v50 = vpop.xlane.xlu0 %432 }
 0x18e   : > { %v446_v51 = vmul.f32 0.015625, %v439_v49  ;;  %v444_v52 = vmul.f32 0.015625, %v433_v50 }
 0x190   : > { %v450_v53 = vsub.f32 %v422_v41, %v446_v51  ;;  %v448_v54 = vsub.f32 %v414_v42, %v444_v52 }
 0x191   : > { %v442_v55 = vpop.xlane.xlu1 %441  ;;  %v436_v56 = vpop.xlane.xlu0 %435 }
 0x192   : > { %v447_v57 = vmul.f32 0.015625, %v442_v55  ;;  %v445_v58 = vmul.f32 0.015625, %v436_v56  ;;  %v452_v59 = vmul.f32 %v448_v54, %v448_v54  ;;  %v454_v63 = vmul.f32 %v450_v53, %v450_v53 }
 0x194   : > { %v451_v60 = vsub.f32 %v425_v45, %v447_v57  ;;  %v449_v61 = vsub.f32 %v417_v46, %v445_v58  ;;  %v456_v62 = vsel %vm430_vm0, %v452_v59, 0.0  ;;  %v462_v1 = vsel %vm430_vm0, %v454_v63, 0.0 }
 0x195   : > { %457 = vadd.xlane.f32.xlu0 %v456_v62 }
 0x196   : > { %v453_v0 = vmul.f32 %v449_v61, %v449_v61  ;;  %v455_v3 = vmul.f32 %v451_v60, %v451_v60 }
 0x198   : > { %v459_v2 = vsel %vm430_vm0, %v453_v0, 0.0  ;;  %v465_v4 = vsel %vm430_vm0, %v455_v3, 0.0 }
 0x199   : > { %463 = vadd.xlane.f32.xlu0 %v462_v1  ;;  %460 = vadd.xlane.f32.xlu1 %v459_v2 }
 0x19d   : > { %466 = vadd.xlane.f32.xlu1 %v465_v4 }
 0x222   : > { %v458_v5 = vpop.xlane.xlu0 %457 }
 0x223   : > { %v468_v6 = vmul.f32 0.015625, %v458_v5 }
 0x225   : > { %v472_v7 = vadd.f32 1e-05, %v468_v6 }
 0x226   : > { %v461_v8 = vpop.xlane.xlu1 %460  ;;  %v464_v9 = vpop.xlane.xlu0 %463 }
 0x227   : > { %664 = vrsqrt.f32 %v472_v7  ;;  %v469_v10 = vmul.f32 0.015625, %v461_v8  ;;  %v470_v11 = vmul.f32 0.015625, %v464_v9 }
 0x229   : > { %v473_v12 = vadd.f32 1e-05, %v469_v10  ;;  %v474_v13 = vadd.f32 1e-05, %v470_v11 }
 0x22a   : > { %v467_v14 = vpop.xlane.xlu1 %466 }
 0x22b   : > { %666 = vrsqrt.f32 %v473_v12  ;;  %v471_v15 = vmul.f32 0.015625, %v467_v14 }
 0x22c   : > { %668 = vrsqrt.f32 %v474_v13 }
 0x22d   : > { %v475_v16 = vadd.f32 1e-05, %v471_v15 }
 0x22f   : > { %670 = vrsqrt.f32 %v475_v16 }
 0x231   : > { %v665_v17 = vpop.eup %664 }
 0x232   : > { %v480_v19 = vmul.f32 %v665_v17, %v448_v54 }
 0x234   : > { %v490_v21 = vmul.f32 %v591_v18, %v480_v19 }
 0x235   : > { %v667_v22 = vpop.eup %666 }
 0x236   : > { %v669_v23 = vpop.eup %668  ;;  %v500_v24 = vadd.f32 %v592_v20, %v490_v21  ;;  %v481_v25 = vmul.f32 %v667_v22, %v449_v61 }
 0x237   : > { %v482_v26 = vmul.f32 %v669_v23, %v450_v53 }
 0x238   : > { %504 = vst.msk [vmem:[%s229_s19] sm:$0xff] %vm430_vm0, %v500_v24  ;;  %v491_v27 = vmul.f32 %v591_v18, %v481_v25 }
 0x239   : > { %v671_v28 = vpop.eup %670  ;;  %v492_v29 = vmul.f32 %v591_v18, %v482_v26 }
 0x23a   : > { %v501_v30 = vadd.f32 %v592_v20, %v491_v27  ;;  %v483_v31 = vmul.f32 %v671_v28, %v451_v60 }
 0x23b   : > { %v502_v32 = vadd.f32 %v592_v20, %v492_v29 }
 0x23c   : > { %505 = vst.msk [vmem:[%s229_s19 + $0x8] sm:$0xff] %vm430_vm0, %v501_v30  ;;  %v493_v33 = vmul.f32 %v591_v18, %v483_v31 }
 0x23d   : > { %506 = vst.msk [vmem:[%s229_s19 + $0x10] sm:$0xff] %vm430_vm0, %v502_v32 }
 0x23e   : > { %v503_v34 = vadd.f32 %v592_v20, %v493_v33 }
 0x240   : > { %507 = vst.msk [vmem:[%s229_s19 + $0x18] sm:$0xff] %vm430_vm0, %v503_v34 }
 0x241 PF: > { %s15_s18 = sadd.s32 1, %s678_s18  }
 0x242   : > { %p12_p4 = scmp.ge.s32.totalorder %s15_s18, 6  }
 0x244   :  { %14 = sbr.rel (!%p12_p4) target bundleno = 1 (0x1), region = 70 }

// kernel: _lambda_.11
= control target key start
LH: loop header
LB: loop body
LE: loop exit
PB: predicated region body
PF: predicated region fallthrough
CT: control target
= control target key end

     0   :  { %8 = vsyncpa [#allocation3], 0  ;;  %s603_s0 = inlined_call_operand.vmem [shape: f32[128,64], index: 0, kind: input, shape index: {}]   ;;  %s604_s1 = inlined_call_operand.vmem [shape: f32[1,64], index: 1, kind: input, shape index: {}]   ;;  %s605_s2 = inlined_call_operand.vmem [shape: f32[1,64], index: 2, kind: input, shape index: {}]   ;;  %s606_s3 = inlined_call_operand.hbm [shape: f32[128,64], index: 3, kind: output, shape index: {}]  }
   0x1   :  { %10 = vsyncpa [#allocation3 + $0x1], 0  ;;  %s483_s12 = smov 0   ;;  %s485_s13 = smov 0  }
   0x2   :  { %s487_s14 = smov 0   ;;  %s489_s15 = smov 0  }
   0x3 LB: > { %s504_s16 = sadd.s32 4294967295, %s458_s15   ;;  %s332_s17 = sadd.s32 4294967294, %s458_s15   ;;  %s458_s15 = sphi %s489_s15, %s612_s15   ;;  %s454_s14 = sphi %s487_s14, %s611_s14   ;;  %s450_s13 = sphi %s485_s13, %s610_s13   ;;  %s446_s12 = sphi %s483_s12, %s609_s12  }
   0x4   : > { %s508_s18 = sadd.s32 1, %s458_s15   ;;  %s91_s19 = sadd.s32 1, %s454_s14 }
   0x5   : > { %s88_s20 = ssub.s32 %s458_s15, %s508_s18  ;;  %p101_p0 = scmp.ne.s32.totalorder %s454_s14, %s450_s13 }
   0x6   : > { %p89_p1 = scmp.eq.s32.totalorder %s88_s20, 0  ;;  %p102_p2 = scmp.eq.s32.totalorder %s504_s16, 3 }
   0x7   : > { %p107_p3 = scmp.ne.s32.totalorder %s450_s13, %s446_s12  ;;  %p108_p4 = scmp.eq.s32.totalorder %s332_s17, 3 }
   0x8   : > { %s519_s21 = scalar_select %p89_p1, %s454_s14, %s91_s19  }
   0x9   : > { %p521_p5 = por %p102_p2, %p101_p0  ;;  %p525_p6 = por %p108_p4, %p107_p3 }
   0xa   : > { %p335_p7 = scmp.ge.s32.totalorder %s458_s15, 1  ;;  %p141_p8 = scmp.lt.s32.totalorder %s458_s15, 5 }
   0xc   : > { %p142_p9 = pnand %p335_p7, %p141_p8 }
   0xd   : > { %s337_s24 = sshll.u32 (!%p142_p9), %s504_s16, 2  ;;  %vm178_vm0 = vcmask (!%p142_p9), 523264   ;;  %s162_s29 = sand.u32 (!%p142_p9), 1, %s450_s13   ;;  %v339_v41 = vld [vmem:[%s604_s1] ss:$0 sm:$0xff] (!%p142_p9) }
   0xe   : > { %145 = sbr.rel (%p142_p9) target bundleno = 361 (0x169), region = 32  ;;  %p166_p10 = scmp.lt.s32.totalorder (!%p142_p9), %s337_s24, 15  ;;  %v340_v43 = vld [vmem:[%s605_s2] ss:$0 sm:$0xff] (!%p142_p9) }
   0xf   : > { %s336_s5 = sshll.u32 (!%p142_p9), %s162_s29, 5  ;;  %s346_s9 = sshll.u32 (!%p142_p9), %s504_s16, 9 }
  0x10   : > { %s164_s8 = scalar_lea.vmem (!%p142_p9), [#allocation2], %s336_s5  ;;  %s557_s19 = scalar_lea.hbm (!%p142_p9), %s606_s3, %s346_s9 }
  0x11   : > { %s270_s10 = sshll.u32 (!%p142_p9), %s164_s8, 4  ;;  %s562_s16 = scalar_lea.sflag (!%p142_p9), [#allocation3], %s162_s29  ;;  %s559_s10 = int_to_ptr.vmem [resolvable:$true] %s270_s10 }
  0x12   : > { %s396_s20 = scalar_lea.vmem (!%p142_p9), %s559_s10, 512 }
  0x13   : > { %p397_p11 = scmp.ne.s32.totalorder (!%p142_p9), %s559_s10, %s396_s20 }
  0x15   : > { %s614_s24 = smov (!%p166_p10, %s337_s24), 15  ;;  %p398_p12 = pnand %p397_p11, %p521_p5 }
  0x16   : > { %s338_s25 = sshll.u32 %s614_s24, 3  ;;  %s460_s24 = smov [#allocation2]  }
  0x17   : > { %s169_s28 = scalar_lea.vmem %s603_s0, %s338_s25  ;;  %p399_p13 = pneg %p398_p12 }
  0x18   : > { %v172_v0 = vld [vmem:[%s169_s28] sm:$0xff]  ;;  %v174_v1 = vld [vmem:[%s169_s28 + $0x10] sm:$0xff]  ;;  %v173_v2 = vld [vmem:[%s169_s28 + $0x8] sm:$0xff]  ;;  %s400_s25 = sshll.u32 %s460_s24, 4  ;;  %s401_s25 = int_to_ptr.vmem [resolvable:$false] %s400_s25 }
  0x19   : > { %v179_v3 = vsel %vm178_vm0, %v172_v0, 0.0  ;;  %v185_v4 = vsel %vm178_vm0, %v174_v1, 0.0  ;;  %v175_v5 = vld [vmem:[%s169_s28 + $0x18] sm:$0xff]  ;;  %v182_v6 = vsel %vm178_vm0, %v173_v2, 0.0  ;;  %s402_s26 = scalar_lea.vmem %s401_s25, 1024  ;;  %p403_p0 = scmp.lt.s32.totalorder %s559_s10, %s401_s25 }
  0x1a   : > { %180 = vadd.xlane.f32.xlu0 %v179_v3  ;;  %186 = vadd.xlane.f32.xlu1 %v185_v4  ;;  %v188_v7 = vsel %vm178_vm0, %v175_v5, 0.0  ;;  %p404_p1 = scmp.lt.s32.totalorder %s402_s26, %s396_s20 }
  0x1c   : > { %p405_p2 = por %p404_p1, %p403_p0 }
  0x1e   : > { %183 = vadd.xlane.f32.xlu0 %v182_v6  ;;  %189 = vadd.xlane.f32.xlu1 %v188_v7  ;;  %p406_p3 = pnand %p405_p2, %p399_p13 }
  0xa7   : > { %v181_v8 = vpop.xlane.xlu0 %180  ;;  %v187_v9 = vpop.xlane.xlu1 %186 }
  0xa8   : > { %v192_v10 = vmul.f32 0.015625, %v181_v8  ;;  %v194_v11 = vmul.f32 0.015625, %v187_v9 }
  0xaa   : > { %v196_v12 = vsub.f32 %v172_v0, %v192_v10  ;;  %v198_v13 = vsub.f32 %v174_v1, %v194_v11 }
  0xab   : > { %v184_v14 = vpop.xlane.xlu0 %183  ;;  %v190_v15 = vpop.xlane.xlu1 %189 }
  0xac   : > { %v193_v16 = vmul.f32 0.015625, %v184_v14  ;;  %v195_v17 = vmul.f32 0.015625, %v190_v15  ;;  %v200_v18 = vmul.f32 %v196_v12, %v196_v12  ;;  %v202_v19 = vmul.f32 %v198_v13, %v198_v13 }
  0xae   : > { %v197_v20 = vsub.f32 %v173_v2, %v193_v16  ;;  %v199_v21 = vsub.f32 %v175_v5, %v195_v17  ;;  %v204_v22 = vsel %vm178_vm0, %v200_v18, 0.0  ;;  %v210_v23 = vsel %vm178_vm0, %v202_v19, 0.0 }
  0xaf   : > { %205 = vadd.xlane.f32.xlu0 %v204_v22 }
  0xb0   : > { %v201_v24 = vmul.f32 %v197_v20, %v197_v20  ;;  %v203_v25 = vmul.f32 %v199_v21, %v199_v21 }
  0xb2   : > { %v207_v26 = vsel %vm178_vm0, %v201_v24, 0.0  ;;  %v213_v27 = vsel %vm178_vm0, %v203_v25, 0.0 }
  0xb3   : > { %211 = vadd.xlane.f32.xlu0 %v210_v23  ;;  %208 = vadd.xlane.f32.xlu1 %v207_v26 }
  0xb7   : > { %214 = vadd.xlane.f32.xlu1 %v213_v27 }
 0x13c   : > { %v206_v28 = vpop.xlane.xlu0 %205 }
 0x13d   : > { %v216_v29 = vmul.f32 0.015625, %v206_v28 }
 0x13f   : > { %v220_v30 = vadd.f32 1e-06, %v216_v29 }
 0x140   : > { %v209_v31 = vpop.xlane.xlu1 %208  ;;  %v212_v32 = vpop.xlane.xlu0 %211 }
 0x141   : > { %388 = vrsqrt.f32 %v220_v30  ;;  %v217_v33 = vmul.f32 0.015625, %v209_v31  ;;  %v218_v34 = vmul.f32 0.015625, %v212_v32 }
 0x143   : > { %v221_v35 = vadd.f32 1e-06, %v217_v33  ;;  %v222_v36 = vadd.f32 1e-06, %v218_v34 }
 0x144   : > { %v215_v37 = vpop.xlane.xlu1 %214 }
 0x145   : > { %390 = vrsqrt.f32 %v221_v35  ;;  %v219_v38 = vmul.f32 0.015625, %v215_v37 }
 0x146   : > { %392 = vrsqrt.f32 %v222_v36 }
 0x147   : > { %v223_v39 = vadd.f32 1e-06, %v219_v38 }
 0x149   : > { %394 = vrsqrt.f32 %v223_v39 }
 0x14b   : > { %v389_v40 = vpop.eup %388 }
 0x14c   : > { %v228_v42 = vmul.f32 %v389_v40, %v196_v12 }
 0x14e   : > { %v238_v44 = vmul.f32 %v339_v41, %v228_v42 }
 0x14f   : > { %v391_v45 = vpop.eup %390 }
 0x150   : > { %v393_v46 = vpop.eup %392  ;;  %v248_v47 = vadd.f32 %v340_v43, %v238_v44  ;;  %v229_v48 = vmul.f32 %v391_v45, %v197_v20 }
 0x151   : > { %v230_v49 = vmul.f32 %v393_v46, %v198_v13 }
 0x152   : > { %v239_v50 = vmul.f32 %v339_v41, %v229_v48  ;;  %252 = vst.msk [vmem:[%s164_s8] sm:$0xff] %vm178_vm0, %v248_v47 }
 0x153   : > { %v395_v51 = vpop.eup %394  ;;  %v240_v52 = vmul.f32 %v339_v41, %v230_v49 }
 0x154   : > { %v249_v53 = vadd.f32 %v340_v43, %v239_v50  ;;  %v231_v54 = vmul.f32 %v395_v51, %v199_v21 }
 0x155   : > { %v250_v55 = vadd.f32 %v340_v43, %v240_v52 }
 0x156   : > { %v241_v56 = vmul.f32 %v339_v41, %v231_v54  ;;  %253 = vst.msk [vmem:[%s164_s8 + $0x8] sm:$0xff] %vm178_vm0, %v249_v53 }
 0x157   : > { %254 = vst.msk [vmem:[%s164_s8 + $0x10] sm:$0xff] %vm178_vm0, %v250_v55 }
 0x158   : > { %v251_v57 = vadd.f32 %v340_v43, %v241_v56 }
 0x15a   : > { %255 = vst.msk [vmem:[%s164_s8 + $0x18] sm:$0xff] %vm178_vm0, %v251_v57 }
 0x15b   : > { %409 = shalt.err (!%p406_p3)
}
 0x15c   : > { %s410_s27 = scalar_lea.hbm %s557_s19, 512  ;;  %s414_s30 = scalar_lea.hbm %s606_s3, 2048 }
 0x15d   : > { %p411_p4 = scmp.ne.s32.totalorder %s557_s19, %s410_s27  ;;  %p415_p9 = scmp.lt.u32.totalorder %s557_s19, %s606_s3 }
 0x15e   : > { %p416_p10 = scmp.lt.u32.totalorder %s414_s30, %s410_s27  ;;  %p418_p12 = scmp.lt.u32.totalorder %s410_s27, %s557_s19 }
 0x15f   : > { %p412_p7 = pnand %p411_p4, %p521_p5 }
 0x160   : > { %p417_p11 = por %p416_p10, %p415_p9 }
 0x161   : > { %p413_p8 = pneg %p412_p7 }
 0x162   : > { %p419_p13 = por %p418_p12, %p417_p11 }
 0x164   : > { %p420_p0 = pnand %p419_p13, %p413_p8 }
 0x166   : > { %423 = shalt.err (!%p420_p0)
}
 0x167   : > { %s461_s6 = smov 128   ;;  %s462_s7 = smov 8  }
 0x168   : > { %347 = dma.vmem_to_hbm [thread:$0]  (%p521_p5), %s559_s10, 512, %s557_s19, %s562_s16, %s461_s6, %s461_s6, %s462_s7  }
 0x169 PF: > { %p353_p1 = scmp.ge.s32.totalorder %s458_s15, 2  ;;  %s285_s8 = sand.u32 1, %s446_s12  }
 0x16a   : > { %s286_s9 = scalar_lea.sflag [#allocation3], %s285_s8 }
 0x16b   : > { %p350_p2 = pnand %p353_p1, %p525_p6 }
 0x16d   : > { %441 = dma.done.wait (!%p350_p2), %s286_s9, 512  }
 0x16e   : > { %443 = vsyncadd (!%p350_p2), %s286_s9, 4294966784  ;;  %p13_p3 = scmp.ge.s32.totalorder %s508_s18, 6   ;;  %s609_s12 = smov %s450_s13 }
 0x16f   : > { %s610_s13 = smov %s454_s14  ;;  %s611_s14 = smov %s519_s21 }
 0x170   : > { %s612_s15 = smov %s508_s18  ;;  %15 = sbr.rel (!%p13_p3) target bundleno = 3 (0x3), region = 67 }
 0x177   :  { %291 = vsyncpa [#allocation3], 1 }
 0x178   :  { %293 = vsyncpa [#allocation3 + $0x1], 1 }

// kernel: _lambda_.7
= control target key start
LH: loop header
LB: loop body
LE: loop exit
PB: predicated region body
PF: predicated region fallthrough
CT: control target
= control target key end

     0   :  { %s2335_s25 = smov 0   ;;  %s2803_s0 = inlined_call_operand.vmem [shape: f32[2,64,64], index: 0, kind: input, shape index: {}]   ;;  %s2804_s1 = inlined_call_operand.vmem [shape: f32[1,64], index: 1, kind: input, shape index: {}]   ;;  %s2805_s2 = inlined_call_operand.vmem [shape: f32[1,64], index: 2, kind: input, shape index: {}]   ;;  %s2806_s3 = inlined_call_operand.vmem [shape: bf16[64,64], index: 3, kind: input, shape index: {}]   ;;  %s2807_s4 = inlined_call_operand.vmem [shape: bf16[64,64], index: 4, kind: input, shape index: {}]   ;;  %s2808_s5 = inlined_call_operand.vmem [shape: bf16[64,64], index: 5, kind: input, shape index: {}]   ;;  %s2809_s6 = inlined_call_operand.vmem [shape: f32[1,64], index: 6, kind: input, shape index: {}]   ;;  %s2810_s7 = inlined_call_operand.vmem [shape: f32[1,64], index: 7, kind: input, shape index: {}]   ;;  %s2811_s8 = inlined_call_operand.vmem [shape: f32[1,64], index: 8, kind: input, shape index: {}]   ;;  %s2812_s9 = inlined_call_operand.vmem [shape: bf16[64,128], index: 9, kind: input, shape index: {}]   ;;  %s2813_s10 = inlined_call_operand.vmem [shape: bf16[64,64], index: 10, kind: input, shape index: {}]   ;;  %s2814_s11 = inlined_call_operand.vmem [shape: f32[1,64], index: 11, kind: input, shape index: {}]   ;;  %s2815_s12 = inlined_call_operand.vmem [shape: f32[1,64], index: 12, kind: input, shape index: {}]   ;;  %s2816_s13 = inlined_call_operand.vmem [shape: f32[2,64,64], index: 13, kind: output, shape index: {}]  }
   0x1 LB: > { %s1883_s26 = sadd.s32 4294967295, %s2262_s25   ;;  %p1887_p0 = scmp.ge.s32.totalorder %s2262_s25, 1  ;;  %s2262_s25 = sphi %s2335_s25, %s23_s25  }
   0x2   : > { %p387_p1 = scmp.lt.s32.totalorder %s2262_s25, 3 }
   0x4   : > { %p388_p2 = pnand %p1887_p0, %p387_p1 }
   0x5   : > { %p431_p3 = scmp.lt.s32.totalorder (!%p388_p2), %s1883_s26, 1  ;;  %vm452_vm0 = vcmask (!%p388_p2), 523264   ;;  %v2132_v56 = vld [vmem:[%s2806_s3] sm:$0xff] (!%p388_p2)   ;;  %v2133_v57 = vld [vmem:[%s2806_s3 + $0x8] sm:$0xff] (!%p388_p2)   ;;  %v2134_v58 = vld [vmem:[%s2806_s3 + $0x10] sm:$0xff] (!%p388_p2)   ;;  %s2264_s19 = smov (!%p388_p2), 64  }
   0x6   : > { %391 = sbr.rel (%p388_p2) target bundleno = 2287 (0x8ef), region = 72  ;;  %2007 = vmatprep.subr.bf16.mxu0 (!%p388_p2), %v2132_v56  ;;  %v2135_v59 = vld [vmem:[%s2806_s3 + $0x18] sm:$0xff] (!%p388_p2)   ;;  %v2136_v60 = vld [vmem:[%s2807_s4] sm:$0xff] (!%p388_p2)  }
   0x7   : > { %2008 = vmatpush3.bf16.msra.mxu0 (!%p388_p2), %v2132_v56  ;;  %2031 = vmatprep.mubr.msk.bf16.mxu1 (!%p388_p2), %vm452_vm0, %v2136_v60  ;;  %v2138_v60 = vld [vmem:[%s2807_s4 + $0x10] sm:$0xff] (!%p388_p2)  }
   0x8   : > { %2009 = vmatprep.subr.bf16.mxu0 (!%p388_p2), %v2133_v57 }
   0xb   : > { %2010 = vmatpush3.bf16.msra.mxu0 (!%p388_p2), %v2133_v57 }
   0xc   : > { %2011 = vmatprep.subr.bf16.mxu0 (!%p388_p2), %v2134_v58 }
   0xd   : > { %s2818_s26 = smov (!%p431_p3, %s1883_s26), 1 }
   0xe   : > { %s1949_s27 = sshll.u32 %s2818_s26, 6 }
   0xf   : > { %s2351_s30 = scalar_lea.vmem %s2803_s0, %s1949_s27  ;;  %2012 = vmatpush3.bf16.msra.mxu0 %v2134_v58 }
  0x10   : > { %v442_v0 = vld [vmem:[%s2351_s30] sm:$0xff]  ;;  %v444_v1 = vld [vmem:[%s2351_s30 + $0x10] sm:$0xff]  ;;  %v443_v2 = vld [vmem:[%s2351_s30 + $0x8] sm:$0xff]  ;;  %2013 = vmatprep.subr.bf16.mxu0 %v2135_v59 }
  0x11   : > { %v453_v3 = vsel %vm452_vm0, %v442_v0, 0.0  ;;  %v459_v4 = vsel %vm452_vm0, %v444_v1, 0.0  ;;  %v445_v5 = vld [vmem:[%s2351_s30 + $0x18] sm:$0xff]  ;;  %v446_v6 = vld [vmem:[%s2351_s30 + $0x20] sm:$0xff]  ;;  %v447_v7 = vld [vmem:[%s2351_s30 + $0x28] sm:$0xff]  ;;  %v456_v8 = vsel %vm452_vm0, %v443_v2, 0.0 }
  0x12   : > { %454 = vadd.xlane.f32.xlu0 %v453_v3  ;;  %460 = vadd.xlane.f32.xlu1 %v459_v4  ;;  %v462_v9 = vsel %vm452_vm0, %v445_v5, 0.0  ;;  %v465_v10 = vsel %vm452_vm0, %v446_v6, 0.0  ;;  %v468_v11 = vsel %vm452_vm0, %v447_v7, 0.0  ;;  %v448_v12 = vld [vmem:[%s2351_s30 + $0x30] sm:$0xff]  ;;  %v449_v13 = vld [vmem:[%s2351_s30 + $0x38] sm:$0xff] }
  0x13   : > { %v471_v14 = vsel %vm452_vm0, %v448_v12, 0.0  ;;  %v474_v15 = vsel %vm452_vm0, %v449_v13, 0.0  ;;  %2014 = vmatpush3.bf16.msra.mxu0 %v2135_v59 }
  0x16   : > { %457 = vadd.xlane.f32.xlu0 %v456_v8  ;;  %463 = vadd.xlane.f32.xlu1 %v462_v9 }
  0x1a   : > { %466 = vadd.xlane.f32.xlu0 %v465_v10  ;;  %469 = vadd.xlane.f32.xlu1 %v468_v11 }
  0x1e   : > { %472 = vadd.xlane.f32.xlu0 %v471_v14  ;;  %475 = vadd.xlane.f32.xlu1 %v474_v15 }
  0x9f   : > { %v455_v16 = vpop.xlane.xlu0 %454  ;;  %v461_v17 = vpop.xlane.xlu1 %460 }
  0xa0   : > { %v478_v18 = vmul.f32 0.015625, %v455_v16  ;;  %v480_v19 = vmul.f32 0.015625, %v461_v17 }
  0xa2   : > { %v2369_v20 = vsub.f32 %v442_v0, %v478_v18  ;;  %v2371_v21 = vsub.f32 %v444_v1, %v480_v19 }
  0xa3   : > { %v458_v22 = vpop.xlane.xlu0 %457  ;;  %v464_v23 = vpop.xlane.xlu1 %463 }
  0xa4   : > { %v479_v24 = vmul.f32 0.015625, %v458_v22  ;;  %v481_v25 = vmul.f32 0.015625, %v464_v23  ;;  %v494_v26 = vmul.f32 %v2369_v20, %v2369_v20  ;;  %v496_v27 = vmul.f32 %v2371_v21, %v2371_v21 }
  0xa6   : > { %v2377_v28 = vsub.f32 %v443_v2, %v479_v24  ;;  %v2379_v29 = vsub.f32 %v445_v5, %v481_v25  ;;  %v502_v30 = vsel %vm452_vm0, %v494_v26, 0.0  ;;  %v508_v33 = vsel %vm452_vm0, %v496_v27, 0.0  ;;  %v1892_v24 = vld [vmem:[%s2804_s1] ss:$0 sm:$0xff] }
  0xa7   : > { %503 = vadd.xlane.f32.xlu0 %v502_v30  ;;  %v467_v31 = vpop.xlane.xlu0 %466  ;;  %v470_v32 = vpop.xlane.xlu1 %469 }
  0xa8   : > { %v482_v34 = vmul.f32 0.015625, %v467_v31  ;;  %v483_v35 = vmul.f32 0.015625, %v470_v32  ;;  %v495_v36 = vmul.f32 %v2377_v28, %v2377_v28  ;;  %v497_v37 = vmul.f32 %v2379_v29, %v2379_v29 }
  0xaa   : > { %v2387_v38 = vsub.f32 %v446_v6, %v482_v34  ;;  %v2389_v39 = vsub.f32 %v447_v7, %v483_v35  ;;  %v505_v40 = vsel %vm452_vm0, %v495_v36, 0.0  ;;  %v511_v43 = vsel %vm452_vm0, %v497_v37, 0.0 }
  0xab   : > { %509 = vadd.xlane.f32.xlu0 %v508_v33  ;;  %506 = vadd.xlane.f32.xlu1 %v505_v40  ;;  %v473_v41 = vpop.xlane.xlu0 %472  ;;  %v476_v42 = vpop.xlane.xlu1 %475 }
  0xac   : > { %v484_v44 = vmul.f32 0.015625, %v473_v41  ;;  %v485_v45 = vmul.f32 0.015625, %v476_v42  ;;  %v498_v46 = vmul.f32 %v2387_v38, %v2387_v38  ;;  %v499_v47 = vmul.f32 %v2389_v39, %v2389_v39 }
  0xae   : > { %v2397_v48 = vsub.f32 %v448_v12, %v484_v44  ;;  %v2399_v49 = vsub.f32 %v449_v13, %v485_v45  ;;  %v514_v50 = vsel %vm452_vm0, %v498_v46, 0.0  ;;  %v517_v51 = vsel %vm452_vm0, %v499_v47, 0.0 }
  0xaf   : > { %512 = vadd.xlane.f32.xlu1 %v511_v43  ;;  %515 = vadd.xlane.f32.xlu0 %v514_v50 }
  0xb0   : > { %v500_v52 = vmul.f32 %v2397_v48, %v2397_v48  ;;  %v501_v53 = vmul.f32 %v2399_v49, %v2399_v49 }
  0xb2   : > { %v520_v54 = vsel %vm452_vm0, %v500_v52, 0.0  ;;  %v523_v55 = vsel %vm452_vm0, %v501_v53, 0.0 }
  0xb3   : > { %518 = vadd.xlane.f32.xlu1 %v517_v51  ;;  %521 = vadd.xlane.f32.xlu0 %v520_v54 }
  0xb7   : > { %524 = vadd.xlane.f32.xlu1 %v523_v55 }
 0x134   : > { %v504_v61 = vpop.xlane.xlu0 %503 }
 0x135   : > { %v526_v62 = vmul.f32 0.015625, %v504_v61  ;;  %v2139_v61 = vld [vmem:[%s2807_s4 + $0x18] sm:$0xff]  }
 0x137   : > { %v534_v63 = vadd.f32 1e-06, %v526_v62  ;;  %v2140_v62 = vld [vmem:[%s2808_s5] sm:$0xff]  }
 0x138   : > { %v507_v0 = vpop.xlane.xlu1 %506  ;;  %v510_v1 = vpop.xlane.xlu0 %509  ;;  %2039 = vmatprep.subr.bf16.mxu0 %v2140_v62 }
 0x139   : > { %2152 = vrsqrt.f32 %v534_v63  ;;  %v527_v2 = vmul.f32 0.015625, %v507_v0  ;;  %v528_v3 = vmul.f32 0.015625, %v510_v1  ;;  %v2141_v63 = vld [vmem:[%s2808_s5 + $0x8] sm:$0xff]   ;;  %v2142_v0 = vld [vmem:[%s2808_s5 + $0x10] sm:$0xff]   ;;  %v2143_v1 = vld [vmem:[%s2808_s5 + $0x18] sm:$0xff]  }
 0x13b   : > { %v535_v4 = vadd.f32 1e-06, %v527_v2  ;;  %v536_v5 = vadd.f32 1e-06, %v528_v3 }
 0x13c   : > { %v513_v6 = vpop.xlane.xlu1 %512  ;;  %v516_v7 = vpop.xlane.xlu0 %515 }
 0x13d   : > { %2154 = vrsqrt.f32 %v535_v4  ;;  %v529_v8 = vmul.f32 0.015625, %v513_v6  ;;  %v530_v9 = vmul.f32 0.015625, %v516_v7 }
 0x13e   : > { %2156 = vrsqrt.f32 %v536_v5 }
 0x13f   : > { %v537_v10 = vadd.f32 1e-06, %v529_v8  ;;  %v538_v11 = vadd.f32 1e-06, %v530_v9 }
 0x140   : > { %v519_v12 = vpop.xlane.xlu1 %518  ;;  %v522_v13 = vpop.xlane.xlu0 %521 }
 0x141   : > { %2158 = vrsqrt.f32 %v537_v10  ;;  %v531_v14 = vmul.f32 0.015625, %v519_v12  ;;  %v532_v15 = vmul.f32 0.015625, %v522_v13 }
 0x142   : > { %2160 = vrsqrt.f32 %v538_v11 }
 0x143   : > { %v2153_v16 = vpop.eup %2152  ;;  %v539_v17 = vadd.f32 1e-06, %v531_v14  ;;  %v540_v18 = vadd.f32 1e-06, %v532_v15 }
 0x144   : > { %v525_v19 = vpop.xlane.xlu1 %524  ;;  %v550_v22 = vmul.f32 %v2153_v16, %v2369_v20  ;;  %v1893_v20 = vld [vmem:[%s2805_s2] ss:$0 sm:$0xff] }
 0x145   : > { %2162 = vrsqrt.f32 %v539_v17  ;;  %v533_v23 = vmul.f32 0.015625, %v525_v19 }
 0x146   : > { %2164 = vrsqrt.f32 %v540_v18  ;;  %v564_v31 = vmul.f32 %v1892_v24, %v550_v22 }
 0x147   : > { %v2155_v25 = vpop.eup %2154  ;;  %v541_v26 = vadd.f32 1e-06, %v533_v23 }
 0x148   : > { %v2157_v27 = vpop.eup %2156  ;;  %v551_v30 = vmul.f32 %v2155_v25, %v2377_v28  ;;  %v578_v37 = vadd.f32 %v1893_v20, %v564_v31 }
 0x149   : > { %v552_v32 = vmul.f32 %v2157_v27, %v2371_v21  ;;  %2166 = vrsqrt.f32 %v541_v26 }
 0x14a   : > { %v565_v33 = vmul.f32 %v1892_v24, %v551_v30  ;;  %v1910_v30 = vld [vmem:[%s2809_s6] ss:$0 sm:$0xff] }
 0x14b   : > { %v2159_v34 = vpop.eup %2158  ;;  %v566_v41 = vmul.f32 %v1892_v24, %v552_v32 }
 0x14c   : > { %v2161_v35 = vpop.eup %2160  ;;  %v553_v36 = vmul.f32 %v2159_v34, %v2379_v29  ;;  %v579_v40 = vadd.f32 %v1893_v20, %v565_v33 }
 0x14d   : > { %v554_v42 = vmul.f32 %v2161_v35, %v2387_v38  ;;  %v580_v47 = vadd.f32 %v1893_v20, %v566_v41 }
 0x14e   : > { %v586_v43 = vpack.c.bf16 %v579_v40, %v578_v37  ;;  %v567_v28 = vmul.f32 %v1892_v24, %v553_v36 }
 0x14f   : > { %v2163_v44 = vpop.eup %2162  ;;  %v568_v45 = vmul.f32 %v1892_v24, %v554_v42 }
 0x150   : > { %v2165_v21 = vpop.eup %2164  ;;  %v555_v46 = vmul.f32 %v2163_v44, %v2389_v39  ;;  %2015 = vmatprep.mubr.msk.bf16.mxu0 %vm452_vm0, %v586_v43  ;;  %2023 = vmatprep.subr.bf16.mxu1 %v586_v43  ;;  %v581_v50 = vadd.f32 %v1893_v20, %v567_v28 }
 0x151   : > { %v556_v51 = vmul.f32 %v2165_v21, %v2397_v48  ;;  %2024 = vmatpush3.bf16.msra.mxu1 %v586_v43  ;;  %v582_v54 = vadd.f32 %v1893_v20, %v568_v45 }
 0x152   : > { %v587_v29 = vpack.c.bf16 %v581_v50, %v580_v47  ;;  %v569_v52 = vmul.f32 %v1892_v24, %v555_v46 }
 0x153   : > { %v2167_v53 = vpop.eup %2166  ;;  %v570_v56 = vmul.f32 %v1892_v24, %v556_v51 }
 0x154   : > { %v557_v38 = vmul.f32 %v2167_v53, %v2399_v49  ;;  %2016 = vmatmul.mubr.msk.bf16.vlgmr.msra.gmra.mrb[0].mxu0 %vm452_vm0, %v587_v29  ;;  %2025 = vmatprep.subr.bf16.mxu1 %v587_v29  ;;  %v583_v55 = vadd.f32 %v1893_v20, %v569_v52  ;;  %v2137_v49 = vld [vmem:[%s2807_s4 + $0x8] sm:$0xff]  }
 0x155   : > { %2026 = vmatpush3.bf16.msra.mxu1 %v587_v29  ;;  %v584_v58 = vadd.f32 %v1893_v20, %v570_v56  ;;  %2040 = vmatpush3.bf16.msra.mxu0 %v2140_v62 }
 0x156   : > { %v588_v39 = vpack.c.bf16 %v583_v55, %v582_v54  ;;  %v571_v57 = vmul.f32 %v1892_v24, %v557_v38  ;;  %2041 = vmatprep.subr.bf16.mxu0 %v2141_v63 }
 0x158   : > { %2019 = vmatprep.mubr.msk.bf16.mxu0 %vm452_vm0, %v588_v39  ;;  %2027 = vmatprep.subr.bf16.mxu1 %v588_v39  ;;  %v585_v48 = vadd.f32 %v1893_v20, %v571_v57 }
 0x159   : > { %2028 = vmatpush3.bf16.msra.mxu1 %v588_v39  ;;  %2042 = vmatpush3.bf16.msra.mxu0 %v2141_v63 }
 0x15a   : > { %v589_v59 = vpack.c.bf16 %v585_v48, %v584_v58  ;;  %2043 = vmatprep.subr.bf16.mxu0 %v2142_v0 }
 0x15c   : > { %2020 = vmatmul.mubr.msk.bf16.gmra.mrb[4].mxu0 %vm452_vm0, %v589_v59  ;;  %2029 = vmatprep.subr.bf16.mxu1 %v589_v59 }
 0x15d   : > { %2030 = vmatpush3.bf16.msra.mxu1 %v589_v59  ;;  %2044 = vmatpush3.bf16.msra.mxu0 %v2142_v0 }
 0x15e   : > { %2045 = vmatprep.subr.bf16.mxu0 %v2143_v1 }
 0x160   : > { %2032 = vmatmul.mubr.msk.bf16.vlgmr.msra.gmra.mrb[0].mxu1 %vm452_vm0, %v2137_v49 }
 0x161   : > { %2035 = vmatprep.mubr.msk.bf16.mxu1 %vm452_vm0, %v2138_v60  ;;  %2046 = vmatpush3.bf16.msra.mxu0 %v2143_v1 }
 0x168   : > { %2036 = vmatmul.mubr.msk.bf16.gmra.mrb[4].mxu1 %vm452_vm0, %v2139_v61 }
 0x227   : > { %v2467_v2 = vpop.f32.mrb[0].mxu0 }
 0x228   : > { %v668_v3 = vpop.f32.mrb[1].mxu0 }
 0x229   : > { %v2469_v4 = vpop.f32.mrb[2].mxu0 }
 0x22a   : > { %v1389_v5 = vpack.c.bf16 %v2469_v4, %v2467_v2  ;;  %v671_v6 = vpop.f32.mrb[3].mxu0 }
 0x22b   : > { %v1388_v7 = vpack.c.bf16 %v671_v6, %v668_v3 }
 0x22f   : > { %v2473_v8 = vpop.f32.mrb[4].mxu0 }
 0x230   : > { %v2475_v9 = vpop.f32.mrb[5].mxu0 }
 0x231   : > { %v2477_v10 = vpop.f32.mrb[6].mxu0 }
 0x232   : > { %v1391_v11 = vpack.c.bf16 %v2477_v10, %v2473_v8  ;;  %v2481_v12 = vpop.f32.mrb[7].mxu0 }
 0x233   : > { %v1390_v13 = vpack.c.bf16 %v2481_v12, %v2475_v9  ;;  %v2033_v14 = vpop.f32.mrb[0].mxu1 }
 0x234   : > { %v773_v15 = vpop.f32.mrb[1].mxu1 }
 0x235   : > { %v2034_v16 = vpop.f32.mrb[2].mxu1 }
 0x236   : > { %v805_v17 = vpack.c.bf16 %v2034_v16, %v2033_v14  ;;  %v776_v18 = vpop.f32.mrb[3].mxu1 }
 0x237   : > { %v804_v19 = vpack.c.bf16 %v776_v18, %v773_v15 }
 0x239   : > { %2047 = vmatprep.mubr.msk.bf16.mxu0 %vm452_vm0, %v804_v19 }
 0x23a   : > { %2048 = vmatmul.mubr.msk.bf16.vlgmr.msra.gmra.mrb[8].mxu0 %vm452_vm0, %v805_v17 }
 0x23b   : > { %v2037_v22 = vpop.f32.mrb[4].mxu1 }
 0x23c   : > { %v789_v23 = vpop.f32.mrb[5].mxu1 }
 0x23d   : > { %v2038_v24 = vpop.f32.mrb[6].mxu1 }
 0x23e   : > { %v807_v25 = vpack.c.bf16 %v2038_v24, %v2037_v22  ;;  %v792_v26 = vpop.f32.mrb[7].mxu1 }
 0x23f   : > { %v806_v27 = vpack.c.bf16 %v792_v26, %v789_v23 }
 0x241   : > { %2051 = vmatprep.mubr.msk.bf16.mxu0 %vm452_vm0, %v806_v27 }
 0x242   : > { %2052 = vmatmul.mubr.msk.bf16.gmra.mrb[12].mxu0 %vm452_vm0, %v807_v25 }
 0x243   : > { %2079 = vmatprep.mubr.msk.bf16.mxu0 %vm452_vm0, %v1388_v7 }
 0x30d   : > { %v2049_v31 = vpop.f32.mrb[8].mxu0 }
 0x30e   : > { %v893_v32 = vpop.f32.mrb[9].mxu0  ;;  %v902_v35 = vadd.f32 %v2049_v31, %v1910_v30 }
 0x30f   : > { %v894_v20 = vadd.f32 %v1910_v30, %v893_v32  ;;  %v2050_v33 = vpop.f32.mrb[10].mxu0 }
 0x310   : > { %v896_v34 = vpop.f32.mrb[11].mxu0  ;;  %v905_v40 = vadd.f32 %v2050_v33, %v1910_v30  ;;  %v932_v43 = vsel %vm452_vm0, %v902_v35, 0.0 }
 0x311   : > { %v897_v36 = vadd.f32 %v1910_v30, %v896_v34  ;;  %v926_v37 = vsel %vm452_vm0, %v894_v20, 0.0 }
 0x312   : > { %927 = vadd.xlane.f32.xlu0 %v926_v37  ;;  %v935_v46 = vsel %vm452_vm0, %v905_v40, 0.0 }
 0x313   : > { %v929_v41 = vsel %vm452_vm0, %v897_v36, 0.0 }
 0x314   : > { %930 = vadd.xlane.f32.xlu1 %v929_v41  ;;  %v2144_v41 = vld [vmem:[%s2812_s9] sm:$0xff]  }
 0x315   : > { %v2053_v42 = vpop.f32.mrb[12].mxu0  ;;  %2055 = vmatprep.subr.bf16.mxu1 %v2144_v41 }
 0x316   : > { %v909_v28 = vpop.f32.mrb[13].mxu0  ;;  %933 = vadd.xlane.f32.xlu0 %v932_v43  ;;  %v918_v44 = vadd.f32 %v2053_v42, %v1910_v30  ;;  %v2145_v42 = vld [vmem:[%s2812_s9 + $0x8] sm:$0xff]   ;;  %2056 = vmatpush3.bf16.msra.mxu1 %v2144_v41  ;;  %v2146_v43 = vld [vmem:[%s2812_s9 + $0x10] sm:$0xff]  }
 0x317   : > { %v910_v45 = vadd.f32 %v1910_v30, %v909_v28  ;;  %v2054_v21 = vpop.f32.mrb[14].mxu0  ;;  %2057 = vmatprep.subr.bf16.mxu1 %v2145_v42  ;;  %v2147_v28 = vld [vmem:[%s2812_s9 + $0x18] sm:$0xff]  }
 0x318   : > { %v912_v47 = vpop.f32.mrb[15].mxu0  ;;  %936 = vadd.xlane.f32.xlu1 %v935_v46  ;;  %v921_v29 = vadd.f32 %v2054_v21, %v1910_v30  ;;  %v944_v53 = vsel %vm452_vm0, %v918_v44, 0.0 }
 0x319   : > { %v913_v50 = vadd.f32 %v1910_v30, %v912_v47  ;;  %v938_v51 = vsel %vm452_vm0, %v910_v45, 0.0 }
 0x31a   : > { %939 = vadd.xlane.f32.xlu0 %v938_v51  ;;  %v947_v54 = vsel %vm452_vm0, %v921_v29, 0.0  ;;  %2058 = vmatpush3.bf16.msra.mxu1 %v2145_v42 }
 0x31b   : > { %v941_v52 = vsel %vm452_vm0, %v913_v50, 0.0  ;;  %2059 = vmatprep.subr.bf16.mxu1 %v2146_v43 }
 0x31c   : > { %942 = vadd.xlane.f32.xlu1 %v941_v52 }
 0x31e   : > { %945 = vadd.xlane.f32.xlu0 %v944_v53  ;;  %2060 = vmatpush3.bf16.msra.mxu1 %v2146_v43 }
 0x31f   : > { %2061 = vmatprep.subr.bf16.mxu1 %v2147_v28 }
 0x320   : > { %948 = vadd.xlane.f32.xlu1 %v947_v54 }
 0x322   : > { %2062 = vmatpush3.bf16.msra.mxu1 %v2147_v28 }
 0x39f   : > { %v928_v38 = vpop.xlane.xlu0 %927 }
 0x3a0   : > { %v950_v55 = vmul.f32 0.015625, %v928_v38 }
 0x3a1   : > { %v931_v56 = vpop.xlane.xlu1 %930 }
 0x3a2   : > { %v2501_v39 = vsub.f32 %v894_v20, %v950_v55  ;;  %v951_v57 = vmul.f32 0.015625, %v931_v56 }
 0x3a3   : > { %v934_v58 = vpop.xlane.xlu0 %933 }
 0x3a4   : > { %v2503_v48 = vsub.f32 %v897_v36, %v951_v57  ;;  %v952_v59 = vmul.f32 0.015625, %v934_v58  ;;  %v966_v49 = vmul.f32 %v2501_v39, %v2501_v39 }
 0x3a5   : > { %v937_v60 = vpop.xlane.xlu1 %936 }
 0x3a6   : > { %v2507_v61 = vsub.f32 %v902_v35, %v952_v59  ;;  %v953_v62 = vmul.f32 0.015625, %v937_v60  ;;  %v974_v63 = vsel %vm452_vm0, %v966_v49, 0.0  ;;  %v967_v0 = vmul.f32 %v2503_v48, %v2503_v48 }
 0x3a7   : > { %975 = vadd.xlane.f32.xlu0 %v974_v63  ;;  %v940_v1 = vpop.xlane.xlu0 %939 }
 0x3a8   : > { %v2512_v3 = vsub.f32 %v905_v40, %v953_v62  ;;  %v954_v6 = vmul.f32 0.015625, %v940_v1  ;;  %v977_v7 = vsel %vm452_vm0, %v967_v0, 0.0  ;;  %v968_v14 = vmul.f32 %v2507_v61, %v2507_v61  ;;  %v1919_v1 = vld [vmem:[%s2810_s7] ss:$0 sm:$0xff] }
 0x3a9   : > { %978 = vadd.xlane.f32.xlu1 %v977_v7  ;;  %v943_v15 = vpop.xlane.xlu1 %942 }
 0x3aa   : > { %v2517_v16 = vsub.f32 %v910_v45, %v954_v6  ;;  %v955_v17 = vmul.f32 0.015625, %v943_v15  ;;  %v980_v18 = vsel %vm452_vm0, %v968_v14, 0.0  ;;  %v969_v19 = vmul.f32 %v2512_v3, %v2512_v3 }
 0x3ab   : > { %981 = vadd.xlane.f32.xlu0 %v980_v18  ;;  %v946_v22 = vpop.xlane.xlu0 %945 }
 0x3ac   : > { %v2522_v23 = vsub.f32 %v913_v50, %v955_v17  ;;  %v956_v24 = vmul.f32 0.015625, %v946_v22  ;;  %v983_v25 = vsel %vm452_vm0, %v969_v19, 0.0  ;;  %v970_v26 = vmul.f32 %v2517_v16, %v2517_v16  ;;  %v1920_v17 = vld [vmem:[%s2811_s8] ss:$0 sm:$0xff] }
 0x3ad   : > { %984 = vadd.xlane.f32.xlu1 %v983_v25  ;;  %v949_v27 = vpop.xlane.xlu1 %948 }
 0x3ae   : > { %v2527_v30 = vsub.f32 %v918_v44, %v956_v24  ;;  %v957_v31 = vmul.f32 0.015625, %v949_v27  ;;  %v986_v32 = vsel %vm452_vm0, %v970_v26, 0.0  ;;  %v971_v20 = vmul.f32 %v2522_v23, %v2522_v23 }
 0x3af   : > { %987 = vadd.xlane.f32.xlu0 %v986_v32 }
 0x3b0   : > { %v2532_v33 = vsub.f32 %v921_v29, %v957_v31  ;;  %v989_v34 = vsel %vm452_vm0, %v971_v20, 0.0  ;;  %v972_v35 = vmul.f32 %v2527_v30, %v2527_v30 }
 0x3b1   : > { %990 = vadd.xlane.f32.xlu1 %v989_v34 }
 0x3b2   : > { %v992_v36 = vsel %vm452_vm0, %v972_v35, 0.0  ;;  %v973_v37 = vmul.f32 %v2532_v33, %v2532_v33 }
 0x3b3   : > { %993 = vadd.xlane.f32.xlu0 %v992_v36 }
 0x3b4   : > { %v995_v40 = vsel %vm452_vm0, %v973_v37, 0.0 }
 0x3b5   : > { %996 = vadd.xlane.f32.xlu1 %v995_v40 }
 0x434   : > { %v976_v44 = vpop.xlane.xlu0 %975 }
 0x435   : > { %v998_v45 = vmul.f32 0.015625, %v976_v44 }
 0x436   : > { %v979_v21 = vpop.xlane.xlu1 %978 }
 0x437   : > { %v1006_v46 = vadd.f32 1e-05, %v998_v45  ;;  %v999_v47 = vmul.f32 0.015625, %v979_v21 }
 0x438   : > { %v982_v50 = vpop.xlane.xlu0 %981 }
 0x439   : > { %2168 = vrsqrt.f32 %v1006_v46  ;;  %v1007_v51 = vadd.f32 1e-05, %v999_v47  ;;  %v1000_v29 = vmul.f32 0.015625, %v982_v50 }
 0x43a   : > { %v985_v52 = vpop.xlane.xlu1 %984 }
 0x43b   : > { %2170 = vrsqrt.f32 %v1007_v51  ;;  %v1008_v53 = vadd.f32 1e-05, %v1000_v29  ;;  %v1001_v54 = vmul.f32 0.015625, %v985_v52 }
 0x43c   : > { %v988_v38 = vpop.xlane.xlu0 %987 }
 0x43d   : > { %2172 = vrsqrt.f32 %v1008_v53  ;;  %v1009_v55 = vadd.f32 1e-05, %v1001_v54  ;;  %v1002_v56 = vmul.f32 0.015625, %v988_v38 }
 0x43e   : > { %v991_v57 = vpop.xlane.xlu1 %990 }
 0x43f   : > { %2174 = vrsqrt.f32 %v1009_v55  ;;  %v1010_v58 = vadd.f32 1e-05, %v1002_v56  ;;  %v1003_v59 = vmul.f32 0.015625, %v991_v57 }
 0x440   : > { %v994_v49 = vpop.xlane.xlu0 %993 }
 0x441   : > { %v1011_v60 = vadd.f32 1e-05, %v1003_v59  ;;  %v1004_v62 = vmul.f32 0.015625, %v994_v49  ;;  %2176 = vrsqrt.f32 %v1010_v58 }
 0x442   : > { %v997_v63 = vpop.xlane.xlu1 %996 }
 0x443   : > { %v2169_v0 = vpop.eup %2168  ;;  %2178 = vrsqrt.f32 %v1011_v60  ;;  %v1012_v6 = vadd.f32 1e-05, %v1004_v62  ;;  %v1005_v7 = vmul.f32 0.015625, %v997_v63 }
 0x444   : > { %v1022_v14 = vmul.f32 %v2169_v0, %v2501_v39 }
 0x445   : > { %v2171_v15 = vpop.eup %2170  ;;  %2180 = vrsqrt.f32 %v1012_v6  ;;  %v1013_v18 = vadd.f32 1e-05, %v1005_v7 }
 0x446   : > { %v1036_v19 = vmul.f32 %v1919_v1, %v1022_v14  ;;  %v1023_v22 = vmul.f32 %v2171_v15, %v2503_v48 }
 0x447   : > { %v2173_v24 = vpop.eup %2172  ;;  %2182 = vrsqrt.f32 %v1013_v18 }
 0x448   : > { %v1037_v25 = vmul.f32 %v1919_v1, %v1023_v22  ;;  %v1024_v26 = vmul.f32 %v2173_v24, %v2507_v61  ;;  %v1050_v27 = vadd.f32 %v1920_v17, %v1036_v19 }
 0x449   : > { %v2175_v31 = vpop.eup %2174 }
 0x44a   : > { %v1038_v32 = vmul.f32 %v1919_v1, %v1024_v26  ;;  %v1025_v39 = vmul.f32 %v2175_v31, %v2512_v3  ;;  %v1051_v20 = vadd.f32 %v1920_v17, %v1037_v25  ;;  %v2563_v34 = vmul.f32 0.70710677, %v1050_v27 }
 0x44b   : > { %v2177_v35 = vpop.eup %2176  ;;  %v2600_v22 = vmul.f32 0.5, %v1050_v27 }
 0x44c   : > { %v2565_v36 = vadd.f32 %v1920_v17, %v1038_v32  ;;  %v1039_v37 = vmul.f32 %v1919_v1, %v1025_v39  ;;  %v2567_v41 = vmul.f32 0.70710677, %v1051_v20  ;;  %v1074_v48 = vand.u32 2147483647, %v2563_v34 }
 0x44d   : > { %v2179_v40 = vpop.eup %2178  ;;  %v1026_v3 = vmul.f32 %v2177_v35, %v2517_v16  ;;  %v2605_v26 = vmul.f32 0.5, %v1051_v20  ;;  %vm1234_vm1 = vcmp.ge.f32.partialorder %v2563_v34, 0.0 }
 0x44e   : > { %v2571_v42 = vmul.f32 0.70710677, %v2565_v36  ;;  %v2573_v61 = vadd.f32 %v1920_v17, %v1039_v37  ;;  %v1075_v28 = vand.u32 2147483647, %v2567_v41  ;;  %v1082_v44 = vmul.f32 0.3275911, %v1074_v48 }
 0x44f   : > { %v2181_v43 = vpop.eup %2180  ;;  %v1027_v46 = vmul.f32 %v2179_v40, %v2522_v23  ;;  %v1040_v54 = vmul.f32 %v1919_v1, %v1026_v3  ;;  %v1186_v49 = vsub.f32 0.0, %v1074_v48  ;;  %vm1235_vm2 = vcmp.ge.f32.partialorder %v2567_v41, 0.0 }
 0x450   : > { %v1076_v45 = vand.u32 2147483647, %v2571_v42  ;;  %v2579_v21 = vmul.f32 0.70710677, %v2573_v61  ;;  %v1028_v50 = vmul.f32 %v2181_v43, %v2527_v30  ;;  %v1083_v51 = vmul.f32 0.3275911, %v1075_v28 }
 0x451   : > { %v2183_v47 = vpop.eup %2182  ;;  %v1090_v29 = vadd.f32 1.0, %v1082_v44  ;;  %v1041_v58 = vmul.f32 %v1919_v1, %v1027_v46  ;;  %v2585_v60 = vadd.f32 %v1920_v17, %v1040_v54  ;;  %v1187_v0 = vsub.f32 0.0, %v1075_v28 }
 0x452   : > { %v1084_v52 = vmul.f32 0.3275911, %v1076_v45  ;;  %v1077_v53 = vand.u32 2147483647, %v2579_v21  ;;  %v1029_v16 = vmul.f32 %v2183_v47, %v2532_v33  ;;  %v1091_v38 = vadd.f32 1.0, %v1083_v51 }
 0x453   : > { %2184 = vrcp.f32 %v1090_v29  ;;  %v1188_v56 = vsub.f32 0.0, %v1076_v45  ;;  %v1042_v59 = vmul.f32 %v1919_v1, %v1028_v50  ;;  %v2587_v63 = vadd.f32 %v1920_v17, %v1041_v58 }
 0x454   : > { %v1092_v55 = vadd.f32 1.0, %v1084_v52  ;;  %v1085_v57 = vmul.f32 0.3275911, %v1077_v53  ;;  %2186 = vrcp.f32 %v1091_v38  ;;  %v1043_v30 = vmul.f32 %v1919_v1, %v1029_v16 }
 0x455   : > { %v1196_v62 = vmul.f32 %v1188_v56, %v1076_v45  ;;  %v2590_v33 = vmul.f32 0.70710677, %v2585_v60  ;;  %v2592_v6 = vadd.f32 %v1920_v17, %v1042_v59  ;;  %v1189_v7 = vsub.f32 0.0, %v1077_v53 }
 0x456   : > { %2188 = vrcp.f32 %v1092_v55  ;;  %v1093_v23 = vadd.f32 1.0, %v1085_v57  ;;  %v1194_v14 = vmul.f32 %v1186_v49, %v1074_v48  ;;  %v2595_v15 = vmul.f32 0.70710677, %v2587_v63 }
 0x457   : > { %v1078_v18 = vand.u32 2147483647, %v2590_v33  ;;  %v2598_v1 = vadd.f32 %v1920_v17, %v1043_v30  ;;  %v1206_v19 = vmul.f32 1.442695, %v1196_v62  ;;  %v1195_v31 = vmul.f32 %v1187_v0, %v1075_v28 }
 0x458   : > { %2190 = vrcp.f32 %v1093_v23  ;;  %v1079_v24 = vand.u32 2147483647, %v2595_v15  ;;  %v2608_v39 = vmul.f32 0.70710677, %v2592_v6  ;;  %v1197_v35 = vmul.f32 %v1189_v7, %v1077_v53 }
 0x459   : > { %v1086_v32 = vmul.f32 0.3275911, %v1078_v18  ;;  %v1202_v40 = vmul.f32 1.442695, %v1194_v14  ;;  %v1190_v43 = vsub.f32 0.0, %v1078_v18  ;;  %2192 = vpow2.f32 %v1206_v19 }
 0x45a   : > { %v1087_v17 = vmul.f32 0.3275911, %v1079_v24  ;;  %v2614_v3 = vmul.f32 0.70710677, %v2598_v1  ;;  %v1080_v20 = vand.u32 2147483647, %v2608_v39 }
 0x45b   : > { %v1094_v27 = vadd.f32 1.0, %v1086_v32  ;;  %v1204_v47 = vmul.f32 1.442695, %v1195_v31  ;;  %v1191_v53 = vsub.f32 0.0, %v1079_v24  ;;  %v1198_v38 = vmul.f32 %v1190_v43, %v1078_v18 }
 0x45c   : > { %v1095_v46 = vadd.f32 1.0, %v1087_v17  ;;  %v1081_v51 = vand.u32 2147483647, %v2614_v3  ;;  %v1088_v55 = vmul.f32 0.3275911, %v1080_v20  ;;  %vm1236_vm3 = vcmp.ge.f32.partialorder %v2571_v42, 0.0 }
 0x45d   : > { %v2603_v25 = vpop.eup %2184  ;;  %2194 = vrcp.f32 %v1094_v27  ;;  %v1208_v57 = vmul.f32 1.442695, %v1197_v35  ;;  %v1199_v18 = vmul.f32 %v1191_v53, %v1079_v24  ;;  %v1210_v31 = vmul.f32 1.442695, %v1198_v38 }
 0x45e   : > { %v1114_v37 = vmul.f32 1.0614054, %v2603_v25  ;;  %v2611_v48 = vpop.eup %2186  ;;  %2196 = vrcp.f32 %v1095_v46  ;;  %v1089_v56 = vmul.f32 0.3275911, %v1081_v51  ;;  %v1096_v30 = vadd.f32 1.0, %v1088_v55 }
 0x45f   : > { %v1115_v28 = vmul.f32 1.0614054, %v2611_v48  ;;  %2198 = vpow2.f32 %v1202_v40  ;;  %v2632_v40 = vmul.f32 0.5, %v2565_v36  ;;  %v1192_v27 = vsub.f32 0.0, %v1080_v20 }
 0x460   : > { %v2617_v44 = vpop.eup %2188  ;;  %v1122_v45 = vadd.f32 -1.4531521, %v1114_v37  ;;  %v1097_v62 = vadd.f32 1.0, %v1089_v56  ;;  %2200 = vpow2.f32 %v1204_v47  ;;  %v1193_v43 = vsub.f32 0.0, %v1081_v51 }
 0x461   : > { %v1116_v50 = vmul.f32 1.0614054, %v2617_v44  ;;  %v1123_v29 = vadd.f32 -1.4531521, %v1115_v28  ;;  %2202 = vrcp.f32 %v1096_v30  ;;  %vm1237_vm4 = vcmp.ge.f32.partialorder %v2579_v21, 0.0 }
 0x462   : > { %v1130_v52 = vmul.f32 %v2603_v25, %v1122_v45  ;;  %v2623_v54 = vpop.eup %2190  ;;  %2204 = vrcp.f32 %v1097_v62  ;;  %vm1238_vm5 = vcmp.ge.f32.partialorder %v2590_v33, 0.0  ;;  %vm1239_vm6 = vcmp.ge.f32.partialorder %v2595_v15, 0.0 }
 0x463   : > { %v1124_v16 = vadd.f32 -1.4531521, %v1116_v50  ;;  %v1131_v58 = vmul.f32 %v2611_v48, %v1123_v29  ;;  %v1117_v23 = vmul.f32 1.0614054, %v2623_v54  ;;  %v2193_v28 = vpop.eup %2192  ;;  %2206 = vpow2.f32 %v1208_v57 }
 0x464   : > { %v1138_v59 = vadd.f32 1.4214138, %v1130_v52  ;;  %v2639_v50 = vmul.f32 0.5, %v2573_v61  ;;  %2208 = vpow2.f32 %v1210_v31  ;;  %v1212_v52 = vmul.f32 1.442695, %v1199_v18 }
 0x465   : > { %v1132_v49 = vmul.f32 %v2617_v44, %v1124_v16  ;;  %v1139_v0 = vadd.f32 1.4214138, %v1131_v58  ;;  %v1125_v14 = vadd.f32 -1.4531521, %v1117_v23  ;;  %v1200_v61 = vmul.f32 %v1192_v27, %v1080_v20 }
 0x466   : > { %v1146_v7 = vmul.f32 %v2603_v25, %v1138_v59  ;;  %v1201_v58 = vmul.f32 %v1193_v43, %v1081_v51  ;;  %2210 = vpow2.f32 %v1212_v52  ;;  %vm1240_vm7 = vcmp.ge.f32.partialorder %v2608_v39, 0.0 }
 0x467   : > { %v1140_v19 = vadd.f32 1.4214138, %v1132_v49  ;;  %v1147_v32 = vmul.f32 %v2611_v48, %v1139_v0  ;;  %v1133_v37 = vmul.f32 %v2623_v54, %v1125_v14  ;;  %v2636_v47 = vpop.eup %2194  ;;  %vm1241_vm8 = vcmp.ge.f32.partialorder %v2614_v3, 0.0 }
 0x468   : > { %v1154_v35 = vadd.f32 -0.28449672, %v1146_v7  ;;  %v2641_v36 = vpop.eup %2196  ;;  %v1118_v55 = vmul.f32 1.0614054, %v2636_v47 }
 0x469   : > { %v1148_v17 = vmul.f32 %v2617_v44, %v1140_v19  ;;  %v1155_v45 = vadd.f32 -0.28449672, %v1147_v32  ;;  %v1141_v46 = vadd.f32 1.4214138, %v1133_v37  ;;  %v1119_v57 = vmul.f32 1.0614054, %v2641_v36  ;;  %v2199_v62 = vpop.eup %2198 }
 0x46a   : > { %v1162_v24 = vmul.f32 %v2603_v25, %v1154_v35  ;;  %v1126_v30 = vadd.f32 -1.4531521, %v1118_v55  ;;  %v2201_v14 = vpop.eup %2200  ;;  %v1214_v35 = vmul.f32 1.442695, %v1200_v61  ;;  %v1216_v37 = vmul.f32 1.442695, %v1201_v58 }
 0x46b   : > { %v1156_v29 = vadd.f32 -0.28449672, %v1148_v17  ;;  %v1163_v53 = vmul.f32 %v2611_v48, %v1155_v45  ;;  %v1149_v38 = vmul.f32 %v2623_v54, %v1141_v46  ;;  %v1127_v7 = vadd.f32 -1.4531521, %v1119_v57  ;;  %v2655_v31 = vpop.eup %2202 }
 0x46c   : > { %v1170_v16 = vadd.f32 0.2548296, %v1162_v24  ;;  %v1134_v51 = vmul.f32 %v2636_v47, %v1126_v30  ;;  %v2659_v17 = vpop.eup %2204  ;;  %2212 = vpow2.f32 %v1214_v35 }
 0x46d   : > { %v1164_v56 = vmul.f32 %v2617_v44, %v1156_v29  ;;  %v1171_v59 = vadd.f32 0.2548296, %v1163_v53  ;;  %v1157_v49 = vadd.f32 -0.28449672, %v1149_v38  ;;  %v1135_v32 = vmul.f32 %v2641_v36, %v1127_v7  ;;  %v2207_v53 = vpop.eup %2206 }
 0x46e   : > { %v1178_v23 = vmul.f32 %v2603_v25, %v1170_v16  ;;  %v1142_v24 = vadd.f32 1.4214138, %v1134_v51  ;;  %v1120_v29 = vmul.f32 1.0614054, %v2655_v31  ;;  %v1121_v52 = vmul.f32 1.0614054, %v2659_v17 }
 0x46f   : > { %v1172_v0 = vadd.f32 0.2548296, %v1164_v56  ;;  %v1179_v19 = vmul.f32 %v2611_v48, %v1171_v59  ;;  %v1165_v20 = vmul.f32 %v2623_v54, %v1157_v49  ;;  %v1143_v46 = vadd.f32 1.4214138, %v1135_v32  ;;  %v2209_v56 = vpop.eup %2208 }
 0x470   : > { %v1218_v18 = vmul.f32 %v2199_v62, %v1178_v23  ;;  %v1150_v55 = vmul.f32 %v2636_v47, %v1142_v24  ;;  %v1128_v58 = vadd.f32 -1.4531521, %v1120_v29  ;;  %v1129_v59 = vadd.f32 -1.4531521, %v1121_v52  ;;  %v2211_v51 = vpop.eup %2210 }
 0x471   : > { %v1180_v25 = vmul.f32 %v2617_v44, %v1172_v0  ;;  %v1219_v27 = vmul.f32 %v2201_v14, %v1179_v19  ;;  %v1173_v45 = vadd.f32 0.2548296, %v1165_v20  ;;  %v1151_v61 = vmul.f32 %v2641_v36, %v1143_v46 }
 0x472   : > { %v1226_v43 = vsub.f32 1.0, %v1218_v18  ;;  %v1158_v30 = vadd.f32 -0.28449672, %v1150_v55  ;;  %v1136_v14 = vmul.f32 %v2655_v31, %v1128_v58  ;;  %v1137_v20 = vmul.f32 %v2659_v17, %v1129_v59 }
 0x473   : > { %v1220_v48 = vmul.f32 %v2193_v28, %v1180_v25  ;;  %v1227_v44 = vsub.f32 1.0, %v1219_v27  ;;  %v1181_v38 = vmul.f32 %v2623_v54, %v1173_v45  ;;  %v1159_v7 = vadd.f32 -0.28449672, %v1151_v61 }
 0x474   : > { %v1242_v16 = vsub.f32 0.0, %v1226_v43  ;;  %v1166_v18 = vmul.f32 %v2636_v47, %v1158_v30  ;;  %v1144_v24 = vadd.f32 1.4214138, %v1136_v14  ;;  %v1145_v29 = vadd.f32 1.4214138, %v1137_v20 }
 0x475   : > { %v1228_v57 = vsub.f32 1.0, %v1220_v48  ;;  %v1243_v23 = vsub.f32 0.0, %v1227_v44  ;;  %v1221_v49 = vmul.f32 %v2207_v53, %v1181_v38  ;;  %v1167_v32 = vmul.f32 %v2641_v36, %v1159_v7 }
 0x476   : > { %v1250_v28 = vsel %vm1234_vm1, %v1226_v43, %v1242_v16  ;;  %v1174_v45 = vadd.f32 0.2548296, %v1166_v18  ;;  %v1152_v42 = vmul.f32 %v2655_v31, %v1144_v24  ;;  %2214 = vpow2.f32 %v1216_v37 }
 0x477   : > { %v1258_v62 = vadd.f32 1.0, %v1250_v28  ;;  %v1244_v0 = vsub.f32 0.0, %v1228_v57  ;;  %v1251_v54 = vsel %vm1235_vm2, %v1227_v44, %v1243_v23  ;;  %v1229_v19 = vsub.f32 1.0, %v1221_v49  ;;  %v2213_v49 = vpop.eup %2212 }
 0x478   : > { %v1259_v25 = vadd.f32 1.0, %v1251_v54  ;;  %v1175_v46 = vadd.f32 0.2548296, %v1167_v32  ;;  %v1182_v53 = vmul.f32 %v2636_v47, %v1174_v45  ;;  %v1153_v16 = vmul.f32 %v2659_v17, %v1145_v29 }
 0x479   : > { %v1252_v34 = vsel %vm1236_vm3, %v1228_v57, %v1244_v0  ;;  %v1266_v27 = vmul.f32 %v1258_v62, %v2600_v22  ;;  %v1245_v43 = vsub.f32 0.0, %v1229_v19  ;;  %v1160_v55 = vadd.f32 -0.28449672, %v1152_v42 }
 0x47a   : > { %v1267_v41 = vmul.f32 %v1259_v25, %v2605_v26  ;;  %v1260_v48 = vadd.f32 1.0, %v1252_v34  ;;  %v1183_v22 = vmul.f32 %v2641_v36, %v1175_v46  ;;  %v1222_v38 = vmul.f32 %v2209_v56, %v1182_v53 }
 0x47b   : > { %v1253_v52 = vsel %vm1237_vm4, %v1229_v19, %v1245_v43  ;;  %v1161_v61 = vadd.f32 -0.28449672, %v1153_v16  ;;  %v1168_v58 = vmul.f32 %v2655_v31, %v1160_v55  ;;  %v1062_v54 = vmul.f32 0.5, %v2585_v60 }
 0x47c   : > { %v1274_v44 = vpack.c.bf16 %v1267_v41, %v1266_v27  ;;  %v1261_v35 = vadd.f32 1.0, %v1253_v52  ;;  %v1268_v26 = vmul.f32 %v1260_v48, %v2632_v40  ;;  %v1223_v57 = vmul.f32 %v2211_v51, %v1183_v22 }
 0x47d   : > { %v1230_v47 = vsub.f32 1.0, %v1222_v38  ;;  %v1169_v23 = vmul.f32 %v2659_v17, %v1161_v61  ;;  %v1176_v28 = vadd.f32 0.2548296, %v1168_v58  ;;  %v1063_v19 = vmul.f32 0.5, %v2587_v63  ;;  %v1933_v61 = vld [vmem:[%s2815_s12] ss:$0 sm:$0xff] }
 0x47e   : > { %2063 = vmatprep.mubr.msk.bf16.mxu1 %vm452_vm0, %v1274_v44  ;;  %v1269_v21 = vmul.f32 %v1261_v35, %v2639_v50  ;;  %v1231_v59 = vsub.f32 1.0, %v1223_v57  ;;  %v1064_v63 = vmul.f32 0.5, %v2592_v6  ;;  %v1065_v45 = vmul.f32 0.5, %v2598_v1 }
 0x47f   : > { %v1246_v36 = vsub.f32 0.0, %v1230_v47  ;;  %v1177_v40 = vadd.f32 0.2548296, %v1169_v23  ;;  %v1184_v30 = vmul.f32 %v2655_v31, %v1176_v28 }
 0x480   : > { %v1275_v37 = vpack.c.bf16 %v1269_v21, %v1268_v26  ;;  %v1247_v56 = vsub.f32 0.0, %v1231_v59  ;;  %v2215_v14 = vpop.eup %2214 }
 0x481   : > { %v1254_v50 = vsel %vm1238_vm5, %v1230_v47, %v1246_v36  ;;  %v1185_v7 = vmul.f32 %v2659_v17, %v1177_v40  ;;  %v1224_v20 = vmul.f32 %v2213_v49, %v1184_v30 }
 0x482   : > { %2064 = vmatmul.mubr.msk.bf16.vlgmr.msra.gmra.mrb[8].mxu1 %vm452_vm0, %v1275_v37  ;;  %v1255_v62 = vsel %vm1239_vm6, %v1231_v59, %v1247_v56  ;;  %v1262_v0 = vadd.f32 1.0, %v1254_v50 }
 0x483   : > { %v1263_v18 = vadd.f32 1.0, %v1255_v62  ;;  %v1225_v51 = vmul.f32 %v2215_v14, %v1185_v7  ;;  %v1232_v34 = vsub.f32 1.0, %v1224_v20 }
 0x484   : > { %v1270_v33 = vmul.f32 %v1262_v0, %v1062_v54 }
 0x485   : > { %v1271_v25 = vmul.f32 %v1263_v18, %v1063_v19  ;;  %v1233_v32 = vsub.f32 1.0, %v1225_v51  ;;  %v1248_v27 = vsub.f32 0.0, %v1232_v34 }
 0x487   : > { %v1276_v15 = vpack.c.bf16 %v1271_v25, %v1270_v33  ;;  %v1249_v31 = vsub.f32 0.0, %v1233_v32  ;;  %v1256_v17 = vsel %vm1240_vm7, %v1232_v34, %v1248_v27 }
 0x488   : > { %v1264_v43 = vadd.f32 1.0, %v1256_v17 }
 0x489   : > { %2067 = vmatprep.mubr.msk.bf16.mxu1 %vm452_vm0, %v1276_v15  ;;  %v1257_v60 = vsel %vm1241_vm8, %v1233_v32, %v1249_v31 }
 0x48a   : > { %v1265_v24 = vadd.f32 1.0, %v1257_v60  ;;  %v1272_v41 = vmul.f32 %v1264_v43, %v1064_v63 }
 0x48c   : > { %v1273_v48 = vmul.f32 %v1265_v24, %v1065_v45 }
 0x48e   : > { %v1277_v46 = vpack.c.bf16 %v1273_v48, %v1272_v41 }
 0x490   : > { %2068 = vmatmul.mubr.msk.bf16.gmra.mrb[12].mxu1 %vm452_vm0, %v1277_v46 }
 0x555   : > { %v2065_v29 = vpop.f32.mrb[8].mxu1 }
 0x556   : > { %v1356_v39 = vpop.f32.mrb[9].mxu1 }
 0x557   : > { %v2066_v52 = vpop.f32.mrb[10].mxu1 }
 0x558   : > { %v1393_v53 = vpack.c.bf16 %v2066_v52, %v2065_v29  ;;  %v1359_v42 = vpop.f32.mrb[11].mxu1 }
 0x559   : > { %v1392_v44 = vpack.c.bf16 %v1359_v42, %v1356_v39 }
 0x55a   : > { %v1412_v6 = vsel %vm452_vm0, %v1393_v53, 0 }
 0x55b   : > { %2119 = vmatprep.subr.msk.bf16.mxu0 %vm452_vm0, %v1392_v44  ;;  %v1409_v3 = vsel %vm452_vm0, %v1392_v44, 0 }
 0x55c   : > { %2072 = vmatpush3.bf16.xpose.msra.mxu0 %v1409_v3 }
 0x55d   : > { %2120 = vmatprep.subr.msk.bf16.mxu0 %vm452_vm0, %v1393_v53 }
 0x563   : > { %v2069_v1 = vpop.f32.mrb[12].mxu1 }
 0x564   : > { %2074 = vmatpush3.bf16.xpose.msra.mxu0 %v1412_v6  ;;  %v1372_v35 = vpop.f32.mrb[13].mxu1 }
 0x565   : > { %v2070_v22 = vpop.f32.mrb[14].mxu1 }
 0x566   : > { %v1395_v16 = vpack.c.bf16 %v2070_v22, %v2069_v1  ;;  %v1375_v38 = vpop.f32.mrb[15].mxu1 }
 0x567   : > { %v1394_v55 = vpack.c.bf16 %v1375_v38, %v1372_v35 }
 0x568   : > { %v1418_v21 = vsel %vm452_vm0, %v1395_v16, 0 }
 0x569   : > { %2121 = vmatprep.subr.msk.bf16.mxu0 %vm452_vm0, %v1394_v55  ;;  %v1415_v26 = vsel %vm452_vm0, %v1394_v55, 0 }
 0x56c   : > { %2076 = vmatpush3.bf16.xpose.msra.mxu0 %v1415_v26 }
 0x56d   : > { %2122 = vmatprep.subr.msk.bf16.mxu0 %vm452_vm0, %v1395_v16 }
 0x574   : > { %2078 = vmatpush3.bf16.xpose.msra.mxu0 %v1418_v21 }
 0x57b   : > { %2080 = vmatmul.mubr.msk.bf16.vlgmr.msra.gmra.mrb[16].mxu0 %vm452_vm0, %v1389_v5 }
 0x57c   : > { %2083 = vmatprep.mubr.msk.bf16.mxu0 %vm452_vm0, %v1390_v13 }
 0x583   : > { %2084 = vmatmul.mubr.msk.bf16.gmra.mrb[20].mxu0 %vm452_vm0, %v1391_v11 }
 0x64e   : > { %v2081_v57 = vpop.f32.mrb[16].mxu0 }
 0x64f   : > { %v1487_v47 = vmul.f32 0.125, %v2081_v57  ;;  %v1454_v58 = vpop.f32.mrb[17].mxu0 }
 0x650   : > { %v1485_v2 = vmul.f32 0.125, %v1454_v58  ;;  %v2082_v4 = vpop.f32.mrb[18].mxu0 }
 0x651   : > { %v1488_v5 = vmul.f32 0.125, %v2082_v4  ;;  %v1457_v37 = vpop.f32.mrb[19].mxu0  ;;  %v1501_v59 = vadd.f32 %v1933_v61, %v1487_v47 }
 0x652   : > { %v1486_v9 = vmul.f32 0.125, %v1457_v37  ;;  %v1499_v23 = vadd.f32 %v1933_v61, %v1485_v2 }
 0x653   : > { %v1513_v12 = vsel %vm452_vm0, %v1501_v59, -inf  ;;  %v1502_v13 = vadd.f32 %v1933_v61, %v1488_v5 }
 0x654   : > { %1514 = vmax.xlane.f32.xlu0 %v1513_v12  ;;  %v1500_v10 = vadd.f32 %v1933_v61, %v1486_v9  ;;  %v1507_v49 = vsel %vm452_vm0, %v1499_v23, -inf }
 0x655   : > { %v1516_v8 = vsel %vm452_vm0, %v1502_v13, -inf }
 0x656   : > { %1517 = vmax.xlane.f32.xlu1 %v1516_v8  ;;  %v2085_v11 = vpop.f32.mrb[20].mxu0  ;;  %v1510_v30 = vsel %vm452_vm0, %v1500_v10, -inf }
 0x657   : > { %v1491_v36 = vmul.f32 0.125, %v2085_v11  ;;  %v1470_v28 = vpop.f32.mrb[21].mxu0 }
 0x658   : > { %v1489_v56 = vmul.f32 0.125, %v1470_v28  ;;  %1508 = vmax.xlane.f32.xlu0 %v1507_v49  ;;  %v2086_v40 = vpop.f32.mrb[22].mxu0  ;;  %v2148_v28 = vld [vmem:[%s2813_s10] sm:$0xff]   ;;  %v2149_v49 = vld [vmem:[%s2813_s10 + $0x8] sm:$0xff]  }
 0x659   : > { %v1473_v50 = vpop.f32.mrb[23].mxu0  ;;  %v1505_v62 = vadd.f32 %v1933_v61, %v1491_v36  ;;  %v1492_v18 = vmul.f32 0.125, %v2086_v40  ;;  %v2151_v40 = vld [vmem:[%s2813_s10 + $0x18] sm:$0xff]  }
 0x65a   : > { %v1490_v0 = vmul.f32 0.125, %v1473_v50  ;;  %1511 = vmax.xlane.f32.xlu1 %v1510_v30  ;;  %v1503_v14 = vadd.f32 %v1933_v61, %v1489_v56  ;;  %v2150_v56 = vld [vmem:[%s2813_s10 + $0x10] sm:$0xff]  }
 0x65b   : > { %v1525_v7 = vsel %vm452_vm0, %v1505_v62, -inf  ;;  %v1506_v20 = vadd.f32 %v1933_v61, %v1492_v18 }
 0x65c   : > { %v2731_v54 = vadd.f32 %v1933_v61, %v1490_v0  ;;  %1526 = vmax.xlane.f32.xlu0 %v1525_v7  ;;  %v1519_v19 = vsel %vm452_vm0, %v1503_v14, -inf }
 0x65d   : > { %v1528_v51 = vsel %vm452_vm0, %v1506_v20, -inf }
 0x65e   : > { %v1522_v33 = vsel %vm452_vm0, %v2731_v54, -inf }
 0x660   : > { %1520 = vmax.xlane.f32.xlu0 %v1519_v19 }
 0x66b   : > { %1589 = vrot.lane.b32.xlu1 %v1393_v53, %s2264_s19 }
 0x66f   : > { %1591 = vrot.lane.b32.xlu1 %v1394_v55, %s2264_s19 }
 0x676   : > { %1587 = vrot.lane.b32.xlu0 %v1392_v44, %s2264_s19 }
 0x693   : > { %1529 = vmax.xlane.f32.xlu1 %v1528_v51 }
 0x697   : > { %1523 = vmax.xlane.f32.xlu1 %v1522_v33 }
 0x6a8   : > { %1593 = vrot.lane.b32.xlu1 %v1395_v16, %s2264_s19  ;;  %s2774_s19 = scalar_lea.vmem %s2816_s13, %s1949_s27 }
 0x6e1   : > { %v1515_v25 = vpop.xlane.xlu0 %1514 }
 0x6e2   : > { %v1533_v34 = vsub.f32 %v1501_v59, %v1515_v25 }
 0x6e3   : > { %v1518_v32 = vpop.xlane.xlu1 %1517 }
 0x6e4   : > { %v1543_v31 = vmul.f32 1.442695, %v1533_v34  ;;  %v1534_v60 = vsub.f32 %v1502_v13, %v1518_v32 }
 0x6e5   : > { %v1509_v15 = vpop.xlane.xlu0 %1508 }
 0x6e6   : > { %v1531_v27 = vsub.f32 %v1499_v23, %v1509_v15  ;;  %v1545_v41 = vmul.f32 1.442695, %v1534_v60 }
 0x6e7   : > { %v1512_v17 = vpop.xlane.xlu1 %1511 }
 0x6e8   : > { %v1539_v43 = vmul.f32 1.442695, %v1531_v27  ;;  %v1532_v63 = vsub.f32 %v1500_v10, %v1512_v17 }
 0x6e9   : > { %v1527_v45 = vpop.xlane.xlu0 %1526 }
 0x6ea   : > { %2216 = vpow2.f32 %v1539_v43  ;;  %v1541_v24 = vmul.f32 1.442695, %v1532_v63  ;;  %v1537_v29 = vsub.f32 %v1505_v62, %v1527_v45 }
 0x6eb   : > { %2218 = vpow2.f32 %v1543_v31  ;;  %v1590_v52 = vpop.permute.xlu1 %1589 }
 0x6ec   : > { %2220 = vpow2.f32 %v1541_v24  ;;  %v1551_v44 = vmul.f32 1.442695, %v1537_v29 }
 0x6ed   : > { %v1521_v48 = vpop.xlane.xlu0 %1520  ;;  %2222 = vpow2.f32 %v1545_v41 }
 0x6ee   : > { %v1535_v46 = vsub.f32 %v1503_v14, %v1521_v48 }
 0x6ef   : > { %v1592_v35 = vpop.permute.xlu1 %1591 }
 0x6f0   : > { %v1547_v39 = vmul.f32 1.442695, %v1535_v46 }
 0x6f1   : > { %v1588_v53 = vpop.permute.xlu0 %1587 }
 0x6f2   : > { %2087 = vmatprep.subr.bf16.mxu1 %v1588_v53  ;;  %2224 = vpow2.f32 %v1547_v39 }
 0x6f3   : > { %2088 = vmatpush3.bf16.msra.mxu1 %v1588_v53  ;;  %2226 = vpow2.f32 %v1551_v44 }
 0x6f4   : > { %v2217_v42 = vpop.eup %2216  ;;  %2089 = vmatprep.subr.bf16.mxu1 %v1590_v52 }
 0x6f5   : > { %v2219_v3 = vpop.eup %2218  ;;  %v1555_v6 = vsel %vm452_vm0, %v2217_v42, 0.0 }
 0x6f6   : > { %v2221_v1 = vpop.eup %2220  ;;  %1556 = vadd.xlane.f32.xlu0 %v1555_v6  ;;  %v1561_v38 = vsel %vm452_vm0, %v2219_v3, 0.0 }
 0x6f7   : > { %2090 = vmatpush3.bf16.msra.mxu1 %v1590_v52  ;;  %v1558_v22 = vsel %vm452_vm0, %v2221_v1, 0.0  ;;  %v1579_v16 = vpack.c.bf16 %v2221_v1, %v2217_v42  ;;  %v2223_v55 = vpop.eup %2222 }
 0x6f8   : > { %2091 = vmatprep.subr.bf16.mxu1 %v1592_v35  ;;  %1559 = vadd.xlane.f32.xlu1 %v1558_v22  ;;  %v1564_v26 = vsel %vm452_vm0, %v2223_v55, 0.0  ;;  %v1580_v12 = vpack.c.bf16 %v2223_v55, %v2219_v3 }
 0x6f9   : > { %2095 = vmatprep.mubr.msk.bf16.mxu1 %vm452_vm0, %v1579_v16 }
 0x6fa   : > { %1562 = vadd.xlane.f32.xlu0 %v1561_v38 }
 0x6fb   : > { %2092 = vmatpush3.bf16.msra.mxu1 %v1592_v35  ;;  %v1938_v35 = vld [vmem:[%s2814_s11] ss:$0 sm:$0xff] }
 0x6fc   : > { %v2225_v21 = vpop.eup %2224 }
 0x6fd   : > { %v1567_v57 = vsel %vm452_vm0, %v2225_v21, 0.0  ;;  %v2227_v61 = vpop.eup %2226 }
 0x6fe   : > { %1565 = vadd.xlane.f32.xlu0 %v1564_v26  ;;  %v1573_v47 = vsel %vm452_vm0, %v2227_v61, 0.0 }
 0x702   : > { %1568 = vadd.xlane.f32.xlu0 %v1567_v57 }
 0x706   : > { %1574 = vadd.xlane.f32.xlu0 %v1573_v47 }
 0x720   : > { %v1530_v58 = vpop.xlane.xlu1 %1529 }
 0x721   : > { %v1538_v2 = vsub.f32 %v1506_v20, %v1530_v58  ;;  %v2249_v58 = vld [vmem:[%s2351_s30] sm:$0xff] }
 0x723   : > { %v1553_v4 = vmul.f32 1.442695, %v1538_v2 }
 0x724   : > { %v1524_v5 = vpop.xlane.xlu1 %1523 }
 0x725   : > { %v1536_v37 = vsub.f32 %v2731_v54, %v1524_v5  ;;  %2228 = vpow2.f32 %v1553_v4  ;;  %v2250_v5 = vld [vmem:[%s2351_s30 + $0x18] sm:$0xff] }
 0x727   : > { %v1549_v59 = vmul.f32 1.442695, %v1536_v37 }
 0x728   : > { %v1594_v9 = vpop.permute.xlu1 %1593 }
 0x729   : > { %2230 = vpow2.f32 %v1549_v59  ;;  %2093 = vmatprep.subr.bf16.mxu1 %v1594_v9  ;;  %v2251_v59 = vld [vmem:[%s2351_s30 + $0x8] sm:$0xff] }
 0x72a   : > { %2094 = vmatpush3.bf16.msra.mxu1 %v1594_v9 }
 0x72b   : > { %2103 = vmatprep.subr.bf16.mxu1 %v2148_v28 }
 0x72d   : > { %2096 = vmatmul.mubr.msk.bf16.vlgmr.msra.gmra.mrb[16].mxu1 %vm452_vm0, %v1580_v12 }
 0x72e   : > { %2104 = vmatpush3.bf16.msra.mxu1 %v2148_v28 }
 0x72f   : > { %v2229_v13 = vpop.eup %2228  ;;  %2105 = vmatprep.subr.bf16.mxu1 %v2149_v49 }
 0x730   : > { %v1582_v11 = vpack.c.bf16 %v2229_v13, %v2227_v61  ;;  %v1576_v36 = vsel %vm452_vm0, %v2229_v13, 0.0 }
 0x732   : > { %2106 = vmatpush3.bf16.msra.mxu1 %v2149_v49 }
 0x733   : > { %v2231_v23 = vpop.eup %2230  ;;  %2107 = vmatprep.subr.bf16.mxu1 %v2150_v56 }
 0x734   : > { %v1570_v8 = vsel %vm452_vm0, %v2231_v23, 0.0  ;;  %v1581_v10 = vpack.c.bf16 %v2231_v23, %v2225_v21  ;;  %v2248_v21 = vld [vmem:[%s2351_s30 + $0x10] sm:$0xff] }
 0x735   : > { %1571 = vadd.xlane.f32.xlu1 %v1570_v8 }
 0x736   : > { %2099 = vmatprep.mubr.msk.bf16.mxu1 %vm452_vm0, %v1581_v10  ;;  %2108 = vmatpush3.bf16.msra.mxu1 %v2150_v56  ;;  %v2253_v56 = vld [vmem:[%s2351_s30 + $0x20] sm:$0xff] }
 0x737   : > { %2100 = vmatmul.mubr.msk.bf16.gmra.mrb[20].mxu1 %vm452_vm0, %v1582_v11  ;;  %2109 = vmatprep.subr.bf16.mxu1 %v2151_v40  ;;  %v2252_v11 = vld [vmem:[%s2351_s30 + $0x30] sm:$0xff] }
 0x739   : > { %1577 = vadd.xlane.f32.xlu1 %v1576_v36 }
 0x73a   : > { %2110 = vmatpush3.bf16.msra.mxu1 %v2151_v40 }
 0x783   : > { %v1557_v50 = vpop.xlane.xlu0 %1556 }
 0x784   : > { %2232 = vrcp.f32 %v1557_v50 }
 0x785   : > { %v1560_v0 = vpop.xlane.xlu1 %1559 }
 0x787   : > { %v1563_v30 = vpop.xlane.xlu0 %1562 }
 0x788   : > { %2234 = vrcp.f32 %v1563_v30  ;;  %v2254_v30 = vld [vmem:[%s2351_s30 + $0x38] sm:$0xff] }
 0x78b   : > { %v1566_v62 = vpop.xlane.xlu0 %1565 }
 0x78c   : > { %2236 = vrcp.f32 %v1566_v62 }
 0x78d   : > { %2238 = vrcp.f32 %v1560_v0  ;;  %v2255_v0 = vld [vmem:[%s2351_s30 + $0x28] sm:$0xff] }
 0x78e   : > { %v2233_v18 = vpop.eup %2232 }
 0x78f   : > { %v1569_v7 = vpop.xlane.xlu0 %1568 }
 0x790   : > { %2240 = vrcp.f32 %v1569_v7 }
 0x792   : > { %v2235_v51 = vpop.eup %2234 }
 0x793   : > { %v1575_v54 = vpop.xlane.xlu0 %1574 }
 0x794   : > { %2242 = vrcp.f32 %v1575_v54 }
 0x796   : > { %v2237_v25 = vpop.eup %2236 }
 0x797   : > { %v2239_v32 = vpop.eup %2238 }
 0x79a   : > { %v2241_v45 = vpop.eup %2240 }
 0x79e   : > { %v2243_v41 = vpop.eup %2242 }
 0x7c2   : > { %v1572_v14 = vpop.xlane.xlu1 %1571 }
 0x7c6   : > { %v1578_v19 = vpop.xlane.xlu1 %1577 }
 0x7c7   : > { %2244 = vrcp.f32 %v1578_v19 }
 0x7c8   : > { %2246 = vrcp.f32 %v1572_v14 }
 0x7d1   : > { %v2245_v46 = vpop.eup %2244 }
 0x7d2   : > { %v2247_v39 = vpop.eup %2246 }
 0x800   : > { %v2097_v20 = vpop.f32.mrb[16].mxu1 }
 0x801   : > { %v1645_v33 = vpop.f32.mrb[17].mxu1  ;;  %v1686_v15 = vmul.f32 %v2235_v51, %v2097_v20 }
 0x802   : > { %v2098_v34 = vpop.f32.mrb[18].mxu1  ;;  %v1684_v17 = vmul.f32 %v2233_v18, %v1645_v33 }
 0x803   : > { %v1687_v27 = vmul.f32 %v2237_v25, %v2098_v34  ;;  %v1648_v31 = vpop.f32.mrb[19].mxu1 }
 0x804   : > { %v1685_v60 = vmul.f32 %v2239_v32, %v1648_v31 }
 0x805   : > { %v1693_v43 = vpack.c.bf16 %v1687_v27, %v1686_v15 }
 0x806   : > { %v1692_v63 = vpack.c.bf16 %v1685_v60, %v1684_v17 }
 0x808   : > { %2111 = vmatprep.mubr.msk.bf16.mxu1 %vm452_vm0, %v1692_v63 }
 0x809   : > { %2112 = vmatmul.mubr.msk.bf16.vlgmr.msra.gmra.mrb[24].mxu1 %vm452_vm0, %v1693_v43 }
 0x80a   : > { %v2101_v24 = vpop.f32.mrb[20].mxu1 }
 0x80b   : > { %v1661_v48 = vpop.f32.mrb[21].mxu1  ;;  %v1690_v52 = vmul.f32 %v2243_v41, %v2101_v24 }
 0x80c   : > { %v2102_v29 = vpop.f32.mrb[22].mxu1  ;;  %v1688_v44 = vmul.f32 %v2241_v45, %v1661_v48 }
 0x80d   : > { %v1691_v53 = vmul.f32 %v2245_v46, %v2102_v29  ;;  %v1664_v42 = vpop.f32.mrb[23].mxu1 }
 0x80e   : > { %v1689_v3 = vmul.f32 %v2247_v39, %v1664_v42 }
 0x80f   : > { %v1695_v6 = vpack.c.bf16 %v1691_v53, %v1690_v52 }
 0x810   : > { %v1694_v1 = vpack.c.bf16 %v1689_v3, %v1688_v44 }
 0x812   : > { %2115 = vmatprep.mubr.msk.bf16.mxu1 %vm452_vm0, %v1694_v1 }
 0x813   : > { %2116 = vmatmul.mubr.msk.bf16.gmra.mrb[28].mxu1 %vm452_vm0, %v1695_v6 }
 0x8dc   : > { %v2113_v22 = vpop.f32.mrb[24].mxu1 }
 0x8dd   : > { %v1790_v16 = vadd.f32 %v2113_v22, %v1938_v35  ;;  %v1781_v38 = vpop.f32.mrb[25].mxu1 }
 0x8de   : > { %v1782_v55 = vadd.f32 %v1938_v35, %v1781_v38  ;;  %v2114_v26 = vpop.f32.mrb[26].mxu1 }
 0x8df   : > { %v1814_v57 = vadd.f32 %v2248_v21, %v1790_v16  ;;  %v1793_v61 = vadd.f32 %v2114_v26, %v1938_v35  ;;  %v1784_v47 = vpop.f32.mrb[27].mxu1 }
 0x8e0   : > { %v1812_v2 = vadd.f32 %v2249_v58, %v1782_v55  ;;  %v1785_v4 = vadd.f32 %v1938_v35, %v1784_v47 }
 0x8e1   : > { %1822 = vst.msk [vmem:[%s2774_s19 + $0x10] sm:$0xff] %vm452_vm0, %v1814_v57  ;;  %v1815_v37 = vadd.f32 %v2250_v5, %v1793_v61 }
 0x8e2   : > { %1820 = vst.msk [vmem:[%s2774_s19] sm:$0xff] %vm452_vm0, %v1812_v2  ;;  %v1813_v9 = vadd.f32 %v2251_v59, %v1785_v4 }
 0x8e3   : > { %1823 = vst.msk [vmem:[%s2774_s19 + $0x18] sm:$0xff] %vm452_vm0, %v1815_v37 }
 0x8e4   : > { %1821 = vst.msk [vmem:[%s2774_s19 + $0x8] sm:$0xff] %vm452_vm0, %v1813_v9 }
 0x8e6   : > { %v2117_v12 = vpop.f32.mrb[28].mxu1 }
 0x8e7   : > { %v1806_v13 = vadd.f32 %v2117_v12, %v1938_v35  ;;  %v1797_v23 = vpop.f32.mrb[29].mxu1 }
 0x8e8   : > { %v1798_v8 = vadd.f32 %v1938_v35, %v1797_v23  ;;  %v2118_v10 = vpop.f32.mrb[30].mxu1 }
 0x8e9   : > { %v1818_v36 = vadd.f32 %v2252_v11, %v1806_v13  ;;  %v1809_v28 = vadd.f32 %v2118_v10, %v1938_v35  ;;  %v1800_v49 = vpop.f32.mrb[31].mxu1 }
 0x8ea   : > { %v1816_v40 = vadd.f32 %v2253_v56, %v1798_v8  ;;  %v1801_v50 = vadd.f32 %v1938_v35, %v1800_v49 }
 0x8eb   : > { %1826 = vst.msk [vmem:[%s2774_s19 + $0x30] sm:$0xff] %vm452_vm0, %v1818_v36  ;;  %v1819_v62 = vadd.f32 %v2254_v30, %v1809_v28 }
 0x8ec   : > { %1824 = vst.msk [vmem:[%s2774_s19 + $0x20] sm:$0xff] %vm452_vm0, %v1816_v40  ;;  %v1817_v7 = vadd.f32 %v2255_v0, %v1801_v50 }
 0x8ed   : > { %1827 = vst.msk [vmem:[%s2774_s19 + $0x38] sm:$0xff] %vm452_vm0, %v1819_v62 }
 0x8ee   : > { %1825 = vst.msk [vmem:[%s2774_s19 + $0x28] sm:$0xff] %vm452_vm0, %v1817_v7 }
 0x8ef PF: > { %s23_s25 = sadd.s32 1, %s2262_s25  }
 0x8f0   : > { %p20_p4 = scmp.ge.s32.totalorder %s23_s25, 4  }
 0x8f2   :  { %22 = sbr.rel (!%p20_p4) target bundleno = 1 (0x1), region = 102 }

// kernel: _lambda_.8
= control target key start
LH: loop header
LB: loop body
LE: loop exit
PB: predicated region body
PF: predicated region fallthrough
CT: control target
= control target key end

     0   :  { %s2621_s30 = smov 0   ;;  %s4104_s0 = inlined_call_operand.vmem [shape: f32[2,64,64], index: 0, kind: input, shape index: {}]   ;;  %s4105_s1 = inlined_call_operand.vmem [shape: f32[1,64], index: 1, kind: input, shape index: {}]   ;;  %s4106_s2 = inlined_call_operand.vmem [shape: f32[1,64], index: 2, kind: input, shape index: {}]   ;;  %s4107_s3 = inlined_call_operand.vmem [shape: bf16[64,256], index: 3, kind: input, shape index: {}]   ;;  %s4108_s4 = inlined_call_operand.vmem [shape: f32[1,256], index: 4, kind: input, shape index: {}]   ;;  %s4109_s5 = inlined_call_operand.vmem [shape: f32[9,256], index: 5, kind: input, shape index: {}]   ;;  %s4110_s6 = inlined_call_operand.vmem [shape: f32[1,256], index: 6, kind: input, shape index: {}]   ;;  %s4111_s7 = inlined_call_operand.vmem [shape: bf16[256,64], index: 7, kind: input, shape index: {}]   ;;  %s4112_s8 = inlined_call_operand.vmem [shape: f32[1,64], index: 8, kind: input, shape index: {}]   ;;  %s4113_s9 = inlined_call_operand.vmem [shape: f32[2,64,64], index: 9, kind: output, shape index: {}]  }
   0x1 LB: > { %s2627_s10 = sadd.s32 4294967295, %s2567_s30   ;;  %p2331_p0 = scmp.ge.s32.totalorder %s2567_s30, 1  ;;  %s2567_s30 = sphi %s2621_s30, %s19_s30  }
   0x2   : > { %p287_p1 = scmp.lt.s32.totalorder %s2567_s30, 3 }
   0x4   : > { %p288_p2 = pnand %p2331_p0, %p287_p1 }
   0x6   : > { %291 = sbr.rel (%p288_p2) target bundleno = 1100 (0x44c), region = 56 }
   0xd   : > { %p323_p3 = scmp.lt.s32.totalorder %s2627_s10, 1  ;;  %vm344_vm0 = vcmask 523264   ;;  %v2440_v56 = vld [vmem:[%s4107_s3 + $0x4] ss:$8 sps:$4 sm:$0xff]   ;;  %v2442_v57 = vld [vmem:[%s4107_s3] ss:$8 sps:$4 sm:$0xff]  }
   0xe   : > { %554 = vmatprep.subr.bf16.mxu0 %v2440_v56  ;;  %v2443_v58 = vld [vmem:[%s4107_s3 + $0x14] ss:$8 sps:$4 sm:$0xff]   ;;  %v2445_v59 = vld [vmem:[%s4107_s3 + $0x10] ss:$8 sps:$4 sm:$0xff]   ;;  %v2446_v60 = vld [vmem:[%s4107_s3 + $0x24] ss:$8 sps:$4 sm:$0xff]  }
   0xf   : > { %s324_s11 = scalar_select %p323_p3, %s2627_s10, 1  ;;  %555 = vmatpush1.bf16.msra.mxu0 %v2442_v57  ;;  %v2448_v61 = vld [vmem:[%s4107_s3 + $0x20] ss:$8 sps:$4 sm:$0xff]   ;;  %v2449_v62 = vld [vmem:[%s4107_s3 + $0x34] ss:$8 sps:$4 sm:$0xff]  }
  0x10   : > { %556 = vmatprep.subr.bf16.mxu0 %v2443_v58  ;;  %v2451_v63 = vld [vmem:[%s4107_s3 + $0x30] ss:$8 sps:$4 sm:$0xff]   ;;  %p2350_p4 = scmp.ne.s32.totalorder %s2627_s10, 0 }
  0x11   : > { %s2372_s12 = sshll.u32 %s324_s11, 6 }
  0x12   : > { %s327_s15 = scalar_lea.vmem %s4104_s0, %s2372_s12  ;;  %s2639_s18 = scalar_lea.vmem %s4113_s9, %s2372_s12 }
  0x13   : > { %v2641_v0 = vld [vmem:[%s327_s15] sm:$0xff]  ;;  %v2643_v1 = vld [vmem:[%s327_s15 + $0x10] sm:$0xff]  ;;  %v2645_v2 = vld [vmem:[%s327_s15 + $0x8] sm:$0xff]  ;;  %557 = vmatpush1.bf16.msra.mxu0 %v2445_v59 }
  0x14   : > { %4203 = vst [vmem:[#allocation3_spill] sm:$0xff] %v2641_v0  ;;  %4204 = vst [vmem:[#allocation4_spill] sm:$0xff] %v2643_v1  ;;  %v345_v3 = vsel %vm344_vm0, %v2641_v0, 0.0  ;;  %v351_v4 = vsel %vm344_vm0, %v2643_v1, 0.0  ;;  %v2651_v5 = vld [vmem:[%s327_s15 + $0x18] sm:$0xff]  ;;  %v348_v6 = vsel %vm344_vm0, %v2645_v2, 0.0  ;;  %558 = vmatprep.subr.bf16.mxu0 %v2446_v60 }
  0x15   : > { %4205 = vst [vmem:[#allocation5_spill] sm:$0xff] %v2645_v2  ;;  %4206 = vst [vmem:[#allocation6_spill] sm:$0xff] %v2651_v5  ;;  %346 = vadd.xlane.f32.xlu0 %v345_v3  ;;  %352 = vadd.xlane.f32.xlu1 %v351_v4  ;;  %v354_v7 = vsel %vm344_vm0, %v2651_v5, 0.0  ;;  %v2657_v8 = vld [vmem:[%s327_s15 + $0x20] sm:$0xff]  ;;  %v2659_v9 = vld [vmem:[%s327_s15 + $0x28] sm:$0xff]  ;;  %v2569_v3 = vmov 0  }
  0x16   : > { %4207 = vst [vmem:[#allocation7_spill] sm:$0xff] %v2657_v8  ;;  %4208 = vst [vmem:[#allocation8_spill] sm:$0xff] %v2659_v9  ;;  %v357_v10 = vsel %vm344_vm0, %v2657_v8, 0.0  ;;  %v360_v11 = vsel %vm344_vm0, %v2659_v9, 0.0  ;;  %v2665_v12 = vld [vmem:[%s327_s15 + $0x30] sm:$0xff]  ;;  %v2667_v13 = vld [vmem:[%s327_s15 + $0x38] sm:$0xff]  ;;  %586 = vmatprep.mubr.bf16.mxu0 %v2569_v3 }
  0x17   : > { %4209 = vst [vmem:[#allocation9_spill] sm:$0xff] %v2665_v12  ;;  %4210 = vst [vmem:[#allocation10_spill] sm:$0xff] %v2667_v13  ;;  %v363_v14 = vsel %vm344_vm0, %v2665_v12, 0.0  ;;  %v366_v15 = vsel %vm344_vm0, %v2667_v13, 0.0  ;;  %559 = vmatpush1.bf16.msra.mxu0 %v2448_v61 }
  0x18   : > { %560 = vmatprep.subr.bf16.mxu0 %v2449_v62 }
  0x19   : > { %349 = vadd.xlane.f32.xlu0 %v348_v6  ;;  %355 = vadd.xlane.f32.xlu1 %v354_v7 }
  0x1b   : > { %561 = vmatpush1.bf16.msra.mxu0 %v2451_v63 }
  0x1d   : > { %358 = vadd.xlane.f32.xlu0 %v357_v10  ;;  %361 = vadd.xlane.f32.xlu1 %v360_v11 }
  0x21   : > { %364 = vadd.xlane.f32.xlu0 %v363_v14  ;;  %367 = vadd.xlane.f32.xlu1 %v366_v15 }
  0xa2   : > { %v347_v16 = vpop.xlane.xlu0 %346  ;;  %v353_v17 = vpop.xlane.xlu1 %352 }
  0xa3   : > { %v370_v18 = vmul.f32 0.015625, %v347_v16  ;;  %v372_v19 = vmul.f32 0.015625, %v353_v17 }
  0xa5   : > { %v2674_v20 = vsub.f32 %v2641_v0, %v370_v18  ;;  %v2677_v21 = vsub.f32 %v2643_v1, %v372_v19 }
  0xa6   : > { %v350_v22 = vpop.xlane.xlu0 %349  ;;  %v356_v23 = vpop.xlane.xlu1 %355 }
  0xa7   : > { %v371_v24 = vmul.f32 0.015625, %v350_v22  ;;  %v373_v25 = vmul.f32 0.015625, %v356_v23  ;;  %v386_v26 = vmul.f32 %v2674_v20, %v2674_v20  ;;  %v388_v27 = vmul.f32 %v2677_v21, %v2677_v21 }
  0xa9   : > { %v2684_v28 = vsub.f32 %v2645_v2, %v371_v24  ;;  %v2687_v29 = vsub.f32 %v2651_v5, %v373_v25  ;;  %v394_v30 = vsel %vm344_vm0, %v386_v26, 0.0  ;;  %v400_v33 = vsel %vm344_vm0, %v388_v27, 0.0 }
  0xaa   : > { %395 = vadd.xlane.f32.xlu0 %v394_v30  ;;  %v359_v31 = vpop.xlane.xlu0 %358  ;;  %v362_v32 = vpop.xlane.xlu1 %361 }
  0xab   : > { %v374_v34 = vmul.f32 0.015625, %v359_v31  ;;  %v375_v35 = vmul.f32 0.015625, %v362_v32  ;;  %v387_v36 = vmul.f32 %v2684_v28, %v2684_v28  ;;  %v389_v37 = vmul.f32 %v2687_v29, %v2687_v29 }
  0xad   : > { %v2696_v38 = vsub.f32 %v2657_v8, %v374_v34  ;;  %v2699_v39 = vsub.f32 %v2659_v9, %v375_v35  ;;  %v397_v40 = vsel %vm344_vm0, %v387_v36, 0.0  ;;  %v403_v43 = vsel %vm344_vm0, %v389_v37, 0.0  ;;  %v2336_v36 = vld [vmem:[%s4105_s1] ss:$0 sm:$0xff] }
  0xae   : > { %401 = vadd.xlane.f32.xlu0 %v400_v33  ;;  %398 = vadd.xlane.f32.xlu1 %v397_v40  ;;  %v365_v41 = vpop.xlane.xlu0 %364  ;;  %v368_v42 = vpop.xlane.xlu1 %367 }
  0xaf   : > { %v376_v44 = vmul.f32 0.015625, %v365_v41  ;;  %v377_v45 = vmul.f32 0.015625, %v368_v42  ;;  %v390_v46 = vmul.f32 %v2696_v38, %v2696_v38  ;;  %v391_v47 = vmul.f32 %v2699_v39, %v2699_v39 }
  0xb1   : > { %v2708_v48 = vsub.f32 %v2665_v12, %v376_v44  ;;  %v2711_v49 = vsub.f32 %v2667_v13, %v377_v45  ;;  %v406_v50 = vsel %vm344_vm0, %v390_v46, 0.0  ;;  %v409_v51 = vsel %vm344_vm0, %v391_v47, 0.0 }
  0xb2   : > { %404 = vadd.xlane.f32.xlu1 %v403_v43  ;;  %407 = vadd.xlane.f32.xlu0 %v406_v50 }
  0xb3   : > { %v392_v52 = vmul.f32 %v2708_v48, %v2708_v48  ;;  %v393_v53 = vmul.f32 %v2711_v49, %v2711_v49 }
  0xb5   : > { %v412_v54 = vsel %vm344_vm0, %v392_v52, 0.0  ;;  %v415_v55 = vsel %vm344_vm0, %v393_v53, 0.0 }
  0xb6   : > { %410 = vadd.xlane.f32.xlu1 %v409_v51  ;;  %413 = vadd.xlane.f32.xlu0 %v412_v54 }
  0xba   : > { %416 = vadd.xlane.f32.xlu1 %v415_v55 }
 0x137   : > { %v396_v4 = vpop.xlane.xlu0 %395 }
 0x138   : > { %v418_v6 = vmul.f32 0.015625, %v396_v4 }
 0x13a   : > { %v426_v7 = vadd.f32 1e-06, %v418_v6 }
 0x13b   : > { %v399_v10 = vpop.xlane.xlu1 %398  ;;  %v402_v11 = vpop.xlane.xlu0 %401 }
 0x13c   : > { %2452 = vrsqrt.f32 %v426_v7  ;;  %v419_v14 = vmul.f32 0.015625, %v399_v10  ;;  %v420_v15 = vmul.f32 0.015625, %v402_v11 }
 0x13e   : > { %v427_v16 = vadd.f32 1e-06, %v419_v14  ;;  %v428_v17 = vadd.f32 1e-06, %v420_v15 }
 0x13f   : > { %v405_v18 = vpop.xlane.xlu1 %404  ;;  %v408_v19 = vpop.xlane.xlu0 %407 }
 0x140   : > { %2454 = vrsqrt.f32 %v427_v16  ;;  %v421_v22 = vmul.f32 0.015625, %v405_v18  ;;  %v422_v24 = vmul.f32 0.015625, %v408_v19  ;;  %v492_v18 = vlaneseq }
 0x141   : > { %2456 = vrsqrt.f32 %v428_v17 }
 0x142   : > { %v429_v23 = vadd.f32 1e-06, %v421_v22  ;;  %v430_v30 = vadd.f32 1e-06, %v422_v24  ;;  %v2767_v19 = vshrl.u32 %v492_v18, 7 }
 0x143   : > { %v411_v25 = vpop.xlane.xlu1 %410  ;;  %v414_v33 = vpop.xlane.xlu0 %413 }
 0x144   : > { %2458 = vrsqrt.f32 %v429_v23  ;;  %v423_v26 = vmul.f32 0.015625, %v411_v25  ;;  %v424_v40 = vmul.f32 0.015625, %v414_v33  ;;  %4211 = vst [vmem:[#allocation11_spill] sm:$0xff] %v2767_v19  ;;  %v2776_v22 = vsub.s32 1, %v2767_v19 }
 0x146   : > { %v2453_v27 = vpop.eup %2452  ;;  %v431_v31 = vadd.f32 1e-06, %v423_v26  ;;  %v432_v47 = vadd.f32 1e-06, %v424_v40 }
 0x147   : > { %v442_v32 = vmul.f32 %v2453_v27, %v2674_v20  ;;  %v417_v34 = vpop.xlane.xlu1 %416  ;;  %v2337_v20 = vld [vmem:[%s4106_s2] ss:$0 sm:$0xff] }
 0x148   : > { %2460 = vrsqrt.f32 %v431_v31  ;;  %v425_v35 = vmul.f32 0.015625, %v417_v34 }
 0x149   : > { %2462 = vrsqrt.f32 %v430_v30  ;;  %v456_v42 = vmul.f32 %v2336_v36, %v442_v32 }
 0x14a   : > { %v2455_v37 = vpop.eup %2454  ;;  %v433_v44 = vadd.f32 1e-06, %v425_v35 }
 0x14b   : > { %v443_v41 = vmul.f32 %v2455_v37, %v2684_v28  ;;  %v2457_v43 = vpop.eup %2456  ;;  %v470_v52 = vadd.f32 %v2337_v20, %v456_v42 }
 0x14c   : > { %v444_v50 = vmul.f32 %v2457_v43, %v2677_v21  ;;  %2464 = vrsqrt.f32 %v433_v44 }
 0x14d   : > { %v457_v45 = vmul.f32 %v2336_v36, %v443_v41  ;;  %2466 = vrsqrt.f32 %v432_v47 }
 0x14e   : > { %v2459_v46 = vpop.eup %2458  ;;  %v458_v56 = vmul.f32 %v2336_v36, %v444_v50 }
 0x14f   : > { %v445_v51 = vmul.f32 %v2459_v46, %v2687_v29  ;;  %v471_v53 = vadd.f32 %v2337_v20, %v457_v45 }
 0x150   : > { %v472_v60 = vadd.f32 %v2337_v20, %v458_v56 }
 0x151   : > { %v478_v54 = vpack.c.bf16 %v471_v53, %v470_v52  ;;  %v459_v55 = vmul.f32 %v2336_v36, %v445_v51 }
 0x152   : > { %v2461_v28 = vpop.eup %2460 }
 0x153   : > { %2346 = vmatmul.mubr.msk.bf16.vlgmr.msra.gmra.mrb[0].mxu0 %vm344_vm0, %v478_v54  ;;  %v2463_v57 = vpop.eup %2462  ;;  %v447_v58 = vmul.f32 %v2461_v28, %v2699_v39  ;;  %v473_v59 = vadd.f32 %v2337_v20, %v459_v55 }
 0x154   : > { %596 = vmatprep.mubr.bf16.mxu0 %v2569_v3  ;;  %v446_v21 = vmul.f32 %v2463_v57, %v2696_v38 }
 0x155   : > { %v479_v29 = vpack.c.bf16 %v473_v59, %v472_v60  ;;  %v461_v61 = vmul.f32 %v2336_v36, %v447_v58 }
 0x156   : > { %v2465_v62 = vpop.eup %2464  ;;  %v460_v63 = vmul.f32 %v2336_v36, %v446_v21  ;;  %v2570_v21 = vmov (!%p2350_p4), 0.0  }
 0x157   : > { %v2467_v4 = vpop.eup %2466  ;;  %v449_v6 = vmul.f32 %v2465_v62, %v2711_v49  ;;  %v475_v7 = vadd.f32 %v2337_v20, %v461_v61  ;;  %v2770_v49 = vsub.s32 0, %v2767_v19  ;;  %631 = vst [vmem:[#allocation2] sm:$0xff] (!%p2350_p4), %v2570_v21  ;;  %632 = vst [vmem:[#allocation2 + $0x8] sm:$0xff] (!%p2350_p4), %v2570_v21 }
 0x158   : > { %v448_v10 = vmul.f32 %v2467_v4, %v2708_v48  ;;  %v474_v11 = vadd.f32 %v2337_v20, %v460_v63  ;;  %v490_v48 = vld [vmem:[%s4108_s4] sm:$0x3]  ;;  %633 = vst [vmem:[#allocation2 + $0x10] sm:$0xff] (!%p2350_p4), %v2570_v21  ;;  %634 = vst [vmem:[#allocation2 + $0x18] sm:$0xff] (!%p2350_p4), %v2570_v21 }
 0x159   : > { %v463_v14 = vmul.f32 %v2336_v36, %v449_v6  ;;  %v499_v23 = vrot.slane %v490_v48, %v2776_v22  ;;  %635 = vst [vmem:[#allocation2 + $0xa0] sm:$0xff] (!%p2350_p4), %v2570_v21  ;;  %636 = vst [vmem:[#allocation2 + $0xa8] sm:$0xff] (!%p2350_p4), %v2570_v21 }
 0x15a   : > { %v480_v39 = vpack.c.bf16 %v475_v7, %v474_v11  ;;  %v462_v38 = vmul.f32 %v2336_v36, %v448_v10  ;;  %637 = vst [vmem:[#allocation2 + $0xb0] sm:$0xff] (!%p2350_p4), %v2570_v21  ;;  %638 = vst [vmem:[#allocation2 + $0xb8] sm:$0xff] (!%p2350_p4), %v2570_v21 }
 0x15b   : > { %2347 = vmatmul.mubr.msk.bf16.gmra.mrb[4].mxu0 %vm344_vm0, %v479_v29  ;;  %v477_v15 = vadd.f32 %v2337_v20, %v463_v14 }
 0x15c   : > { %606 = vmatprep.mubr.bf16.mxu0 %v2569_v3  ;;  %v476_v16 = vadd.f32 %v2337_v20, %v462_v38 }
 0x15e   : > { %v481_v17 = vpack.c.bf16 %v477_v15, %v476_v16 }
 0x163   : > { %2348 = vmatmul.mubr.msk.bf16.gmra.mrb[8].mxu0 %vm344_vm0, %v480_v39 }
 0x164   : > { %616 = vmatprep.mubr.bf16.mxu0 %v2569_v3  ;;  %v495_v3 = vrot.slane %v490_v48, %v2770_v49 }
 0x16b   : > { %2349 = vmatmul.mubr.msk.bf16.gmra.mrb[12].mxu0 %vm344_vm0, %v481_v17 }
 0x226   : > { %v588_v24 = vpop.f32.mrb[0].mxu0 }
 0x227   : > { %v2780_v25 = vadd.f32 %v588_v24, %v495_v3  ;;  %v590_v26 = vpop.f32.mrb[1].mxu0 }
 0x228   : > { %v2782_v27 = vadd.f32 %v590_v26, %v499_v23  ;;  %v592_v30 = vpop.f32.mrb[2].mxu0 }
 0x229   : > { %v2784_v31 = vadd.f32 %v592_v30, %v495_v3  ;;  %v594_v32 = vpop.f32.mrb[3].mxu0 }
 0x22a   : > { %v2786_v33 = vadd.f32 %v594_v32, %v499_v23 }
 0x22e   : > { %v598_v34 = vpop.f32.mrb[4].mxu0 }
 0x22f   : > { %v2788_v35 = vadd.f32 %v598_v34, %v495_v3  ;;  %v600_v36 = vpop.f32.mrb[5].mxu0 }
 0x230   : > { %v2790_v37 = vadd.f32 %v600_v36, %v499_v23  ;;  %v602_v40 = vpop.f32.mrb[6].mxu0 }
 0x231   : > { %v2792_v41 = vadd.f32 %v602_v40, %v495_v3  ;;  %v604_v42 = vpop.f32.mrb[7].mxu0 }
 0x232   : > { %v2794_v43 = vadd.f32 %v604_v42, %v499_v23 }
 0x236   : > { %v608_v44 = vpop.f32.mrb[8].mxu0 }
 0x237   : > { %v2796_v20 = vadd.f32 %v608_v44, %v495_v3  ;;  %v610_v45 = vpop.f32.mrb[9].mxu0 }
 0x238   : > { %v2798_v46 = vadd.f32 %v610_v45, %v499_v23  ;;  %v612_v47 = vpop.f32.mrb[10].mxu0 }
 0x239   : > { %v2800_v50 = vadd.f32 %v612_v47, %v495_v3  ;;  %v614_v51 = vpop.f32.mrb[11].mxu0 }
 0x23a   : > { %v2802_v52 = vadd.f32 %v614_v51, %v499_v23 }
 0x23e   : > { %v618_v53 = vpop.f32.mrb[12].mxu0  ;;  %630 = sbr.rel (%p2350_p4) target bundleno = 581 (0x245), region = 60 }
 0x23f   : > { %v2804_v54 = vadd.f32 %v618_v53, %v495_v3  ;;  %v620_v55 = vpop.f32.mrb[13].mxu0 }
 0x240   : > { %v2806_v28 = vadd.f32 %v620_v55, %v499_v23  ;;  %v622_v56 = vpop.f32.mrb[14].mxu0 }
 0x241   : > { %4212 = vst [vmem:[#allocation12_spill] sm:$0xff] %v2804_v54  ;;  %v623_v57 = vadd.f32 %v622_v56, %v495_v3  ;;  %v624_v58 = vpop.f32.mrb[15].mxu0 }
 0x242   : > { %v2808_v59 = vadd.f32 %v624_v58, %v499_v23 }
 0x244   : > { %4213 = vst [vmem:[#allocation13_spill] sm:$0xff] %v2808_v59 }
 0x245 PF: > { %v2468_v60 = vld [vmem:[%s4111_s7 + $0x40] sm:$0xff]   ;;  %640 = vst [vmem:[#allocation2 + $0x28] sm:$0xff] %v2782_v27  ;;  %642 = vst [vmem:[#allocation2 + $0x38] sm:$0xff] %v2786_v33  ;;  %v2470_v61 = vld [vmem:[%s4111_s7 + $0x48] sm:$0xff]   ;;  %v658_v4 = vadd.s32 16, %v2767_v19  ;;  %v659_v10 = vadd.s32 24, %v2767_v19 }
 0x246   : > { %644 = vst [vmem:[#allocation2 + $0x48] sm:$0xff] %v2790_v37  ;;  %650 = vst [vmem:[#allocation2 + $0x78] sm:$0xff] %v2802_v52  ;;  %v2469_v29 = vld [vmem:[%s4111_s7] sm:$0xff]   ;;  %2414 = vmatprep.subr.bf16.mxu1 %v2468_v60  ;;  %2374 = vmatprep.subr.bf16.mxu0 %v2468_v60  ;;  %v2471_v62 = vld [vmem:[%s4111_s7 + $0x8] sm:$0xff]   ;;  %v2852_v15 = vadd.s32 32, %v2767_v19  ;;  %v2855_v16 = vadd.s32 40, %v2767_v19 }
 0x247   : > { %639 = vst [vmem:[#allocation2 + $0x20] sm:$0xff] %v2780_v25  ;;  %641 = vst [vmem:[#allocation2 + $0x30] sm:$0xff] %v2784_v31  ;;  %2422 = vmatpush3.bf16.msra.mxu1 %v2469_v29  ;;  %2375 = vmatpush3.bf16.msra.mxu0 %v2469_v29  ;;  %v2472_v63 = vld [vmem:[%s4111_s7 + $0x50] sm:$0xff]   ;;  %v2474_v7 = vld [vmem:[%s4111_s7 + $0x58] sm:$0xff]   ;;  %v682_v11 = vand.u32 7, %v658_v4  ;;  %v689_v38 = vand.u32 7, %v659_v10 }
 0x248   : > { %643 = vst [vmem:[#allocation2 + $0x40] sm:$0xff] %v2788_v35  ;;  %649 = vst [vmem:[#allocation2 + $0x70] sm:$0xff] %v2800_v50  ;;  %2415 = vmatprep.subr.bf16.mxu1 %v2470_v61  ;;  %2376 = vmatprep.subr.bf16.mxu0 %v2470_v61  ;;  %v2473_v6 = vld [vmem:[%s4111_s7 + $0x10] sm:$0xff]   ;;  %v2475_v39 = vld [vmem:[%s4111_s7 + $0x18] sm:$0xff]   ;;  %vm832_vm2 = vcmask 1040384   ;;  %v2877_v24 = vrot.slane %v2782_v27, 7 }
 0x249   : > { %652 = vst [vmem:[#allocation2 + $0x88] sm:$0xff] %v2806_v28  ;;  %654 = vst [vmem:[#allocation2 + $0x98] sm:$0xff] %v2808_v59  ;;  %v2476_v14 = vld [vmem:[%s4111_s7 + $0x60] sm:$0xff]   ;;  %vm2857_vm1 = vcmp.ge.s32.totalorder %v682_v11, 1  ;;  %v2478_v48 = vld [vmem:[%s4111_s7 + $0x68] sm:$0xff]   ;;  %vm2867_vm3 = vcmp.ge.s32.totalorder %v689_v38, 1 }
 0x24a   : > { %651 = vst [vmem:[#allocation2 + $0x80] sm:$0xff] %v2804_v54  ;;  %653 = vst [vmem:[#allocation2 + $0x90] sm:$0xff] %v623_v57  ;;  %v2477_v18 = vld [vmem:[%s4111_s7 + $0x20] sm:$0xff]   ;;  %v2874_v23 = vld [vmem:[%s4109_s5 + $0x8] sm:$0xff]  ;;  %v2880_v26 = vrot.slane %v2786_v33, 7  ;;  %v849_v30 = vrot.slane %v2790_v37, 7 }
 0x24b   : > { %2423 = vmatpush3.bf16.msra.mxu1 %v2471_v62  ;;  %2377 = vmatpush3.bf16.msra.mxu0 %v2471_v62  ;;  %4218 = vst [vmem:[#allocation14_spill] sm:$0xff] %v2877_v24  ;;  %v2885_v32 = vrot.slane %v2874_v23, %v2770_v49  ;;  %v2889_v34 = vrot.slane %v2874_v23, %v2776_v22  ;;  %v2479_v40 = vld [vmem:[%s4111_s7 + $0x28] sm:$0xff]   ;;  %v696_v42 = vand.u32 7, %v2852_v15  ;;  %v4115_v44 = vand.u32 7, %v2855_v16  ;;  %v2480_v51 = vld [vmem:[%s4111_s7 + $0x70] sm:$0xff]   ;;  %v2482_v10 = vld [vmem:[%s4111_s7 + $0x78] sm:$0xff]  }
 0x24c   : > { %2416 = vmatprep.subr.bf16.mxu1 %v2472_v63  ;;  %2378 = vmatprep.subr.bf16.mxu0 %v2472_v63  ;;  %4219 = vst [vmem:[#allocation15_spill] sm:$0xff] %v2880_v26  ;;  %v2894_v36 = vsel %vm832_vm2, %v2877_v24, %v2880_v26  ;;  %v2898_v27 = vsel %vm832_vm2, %v2880_v26, %v849_v30  ;;  %vm2914_vm4 = vcmp.le.s32.totalorder %v682_v11, 6  ;;  %v853_v55 = vrot.slane %v2794_v43, 7  ;;  %v3050_v9 = vld [vmem:[%s4109_s5 + $0x18] ss:$0 sm:$0xff] }
 0x24d   : > { %4220 = vst [vmem:[#allocation16_spill] sm:$0xff] %v2885_v32  ;;  %4221 = vst [vmem:[#allocation17_spill] sm:$0xff] %v2889_v34  ;;  %v888_v45 = vsel %vm2857_vm1, %v2894_v36, 0.0  ;;  %v890_v47 = vsel %vm2867_vm3, %v2898_v27, 0.0  ;;  %v2921_v57 = vrot.slane %v2786_v33, 1  ;;  %v954_v21 = vmul.f32 %v2889_v34, %v2786_v33  ;;  %v2481_v33 = vld [vmem:[%s4111_s7 + $0x30] sm:$0xff]  }
 0x24e   : > { %4222 = vst [vmem:[#allocation18_spill] sm:$0xff] %v2894_v36  ;;  %4223 = vst [vmem:[#allocation19_spill] sm:$0xff] %v2898_v27  ;;  %v912_v56 = vmul.f32 %v2885_v32, %v888_v45  ;;  %v914_v58 = vmul.f32 %v2885_v32, %v890_v47  ;;  %v956_v60 = vmul.f32 %v2889_v34, %v2790_v37  ;;  %vm1007_vm5 = vcmask 1046528   ;;  %v3258_v17 = vld [vmem:[%s4109_s5 + $0x10] ss:$0 sm:$0xff] }
 0x24f   : > { %2424 = vmatpush3.bf16.msra.mxu1 %v2473_v6  ;;  %2379 = vmatpush3.bf16.msra.mxu0 %v2473_v6  ;;  %4226 = vst [vmem:[#allocation20_spill] sm:$0xff] %v2921_v57  ;;  %vm2928_vm6 = vcmp.le.s32.totalorder %v689_v38, 6  ;;  %v4114_v61 = vrot.slane %v2798_v46, 7  ;;  %v1020_v62 = vrot.slane %v2790_v37, 1  ;;  %v2935_v63 = vrot.slane %v2794_v43, 1  ;;  %4238 = vst [vmem:[#allocation23_spill] sm:$0xff] %v3050_v9 }
 0x250   : > { %2417 = vmatprep.subr.bf16.mxu1 %v2474_v7  ;;  %2380 = vmatprep.subr.bf16.mxu0 %v2474_v7  ;;  %vm2940_vm7 = vcmp.ge.s32.totalorder %v696_v42, 1  ;;  %v4117_v6 = vrot.slane %v2798_v46, 1  ;;  %v4116_v7 = vsub.s32 2, %v2767_v19  ;;  %v854_v11 = vsel %vm832_vm2, %v849_v30, %v853_v55  ;;  %4263 = vst [vmem:[#allocation40_spill] sm:$0xff] %v3258_v17 }
 0x251   : > { %4229 = vst [vmem:[#allocation21_spill] sm:$0xff] %v2935_v63  ;;  %v1025_v38 = vsel %vm1007_vm5, %v1020_v62, %v2935_v63  ;;  %v972_v15 = vadd.f32 %v956_v60, %v914_v58  ;;  %vm2968_vm8 = vcmp.ge.s32.totalorder %v4115_v44, 1  ;;  %v2975_v45 = vsel %vm832_vm2, %v853_v55, %v4114_v61 }
 0x252   : > { %v2964_v30 = vrot.slane %v2874_v23, %v4116_v7  ;;  %v892_v47 = vsel %vm2940_vm7, %v854_v11, 0.0  ;;  %v1145_v55 = vsel %vm2857_vm1, %v2898_v27, 0.0  ;;  %v4118_v60 = vsub.s32 3, %v2767_v19 }
 0x253   : > { %2425 = vmatpush3.bf16.msra.mxu1 %v2475_v39  ;;  %2381 = vmatpush3.bf16.msra.mxu0 %v2475_v39  ;;  %v970_v39 = vadd.f32 %v954_v21, %v912_v56  ;;  %v2983_v56 = vsel %vm1007_vm5, %v2935_v63, %v4117_v6  ;;  %v1271_v44 = vsel %vm2914_vm4, %v1025_v38, 0.0  ;;  %vm3000_vm9 = vcmp.le.s32.totalorder %v696_v42, 6 }
 0x254   : > { %2418 = vmatprep.subr.bf16.mxu1 %v2476_v14  ;;  %2382 = vmatprep.subr.bf16.mxu0 %v2476_v14  ;;  %v2952_v14 = vsel %vm1007_vm5, %v2921_v57, %v1020_v62  ;;  %v1147_v62 = vsel %vm2867_vm3, %v854_v11, 0.0  ;;  %v1273_v61 = vsel %vm2928_vm6, %v2983_v56, 0.0  ;;  %v4237_v42 = vsub.s32 4, %v2767_v19 }
 0x255   : > { %4232 = vst [vmem:[#allocation22_spill] sm:$0xff] %v2952_v14  ;;  %v4127_v0 = vsub.s32 7, %v2767_v19 }
 0x257   : > { %2426 = vmatpush3.bf16.msra.mxu1 %v2477_v18  ;;  %2383 = vmatpush3.bf16.msra.mxu0 %v2477_v18  ;;  %v1063_v18 = vsel %vm2914_vm4, %v2952_v14, 0.0  ;;  %v4251_v14 = vrot.slane %v2796_v20, 7 }
 0x258   : > { %2419 = vmatprep.subr.bf16.mxu1 %v2478_v48  ;;  %2384 = vmatprep.subr.bf16.mxu0 %v2478_v48  ;;  %v1065_v48 = vsel %vm2928_vm6, %v1025_v38, 0.0  ;;  %v1087_v58 = vmul.f32 %v2964_v30, %v1063_v18  ;;  %v4120_v18 = vsub.s32 5, %v2767_v19  ;;  %v894_v38 = vsel %vm2968_vm8, %v2975_v45, 0.0 }
 0x259   : > { %v1089_v21 = vmul.f32 %v2964_v30, %v1065_v48 }
 0x25a   : > { %v1103_v7 = vadd.f32 %v1087_v58, %v970_v39  ;;  %v3023_v39 = vrot.slane %v2874_v23, %v4120_v18 }
 0x25b   : > { %2427 = vmatpush3.bf16.msra.mxu1 %v2479_v40  ;;  %2385 = vmatpush3.bf16.msra.mxu0 %v2479_v40  ;;  %v1105_v6 = vadd.f32 %v1089_v21, %v972_v15  ;;  %v1353_v15 = vsel %vm2857_vm1, %v854_v11, 0.0 }
 0x25c   : > { %2420 = vmatprep.subr.bf16.mxu1 %v2480_v51  ;;  %2386 = vmatprep.subr.bf16.mxu0 %v2480_v51  ;;  %v2483_v51 = vld [vmem:[%s4111_s7 + $0x38] sm:$0xff]   ;;  %v1295_v11 = vmul.f32 %v3023_v39, %v1271_v44  ;;  %v1297_v12 = vmul.f32 %v3023_v39, %v1273_v61 }
 0x25f   : > { %2428 = vmatpush3.bf16.msra.mxu1 %v2481_v33  ;;  %2387 = vmatpush3.bf16.msra.mxu0 %v2481_v33  ;;  %v3007_v33 = vrot.slane %v2874_v23, %v4118_v60  ;;  %v1355_v60 = vsel %vm2867_vm3, %v2975_v45, 0.0 }
 0x260   : > { %2421 = vmatprep.subr.bf16.mxu1 %v2482_v10  ;;  %2388 = vmatprep.subr.bf16.mxu0 %v2482_v10  ;;  %v3018_v10 = vrot.slane %v2874_v23, %v4237_v42  ;;  %v4125_v42 = vsub.s32 6, %v2767_v19 }
 0x261   : > { %v1169_v58 = vmul.f32 %v3007_v33, %v1145_v55  ;;  %v1171_v21 = vmul.f32 %v3007_v33, %v1147_v62 }
 0x262   : > { %v1211_v13 = vmul.f32 %v3018_v10, %v2790_v37  ;;  %v1213_v18 = vmul.f32 %v3018_v10, %v2794_v43  ;;  %v3042_v62 = vrot.slane %v2874_v23, %v4125_v42  ;;  %v4126_v37 = vrot.slane %v2802_v52, 1 }
 0x263   : > { %2429 = vmatpush3.bf16.msra.mxu1 %v2483_v51  ;;  %2389 = vmatpush3.bf16.msra.mxu0 %v2483_v51  ;;  %v1185_v55 = vadd.f32 %v1169_v58, %v1103_v7  ;;  %v1187_v2 = vadd.f32 %v1171_v21, %v1105_v6  ;;  %v916_v51 = vmul.f32 %v2885_v32, %v892_v47  ;;  %v4240_v21 = vrot.slane %v2798_v46, 1 }
 0x264   : > { %v1377_v6 = vmul.f32 %v3042_v62, %v1353_v15  ;;  %v1379_v7 = vmul.f32 %v3042_v62, %v1355_v60  ;;  %v958_v58 = vmul.f32 %v2889_v34, %v2794_v43  ;;  %v3059_v47 = vrot.slane %v2874_v23, %v4127_v0 }
 0x265   : > { %v1227_v44 = vadd.f32 %v1211_v13, %v1185_v55  ;;  %v1229_v61 = vadd.f32 %v1213_v18, %v1187_v2  ;;  %v3066_v42 = vsel %vm1007_vm5, %v4240_v21, %v4126_v37  ;;  %v1537_v60 = vsel %vm2914_vm4, %v2983_v56, 0.0 }
 0x266   : > { %4239 = vst [vmem:[#allocation24_spill] sm:$0xff] %v3059_v47  ;;  %v1539_v18 = vsel %vm2928_vm6, %v3066_v42, 0.0  ;;  %v1419_v23 = vmul.f32 %v3059_v47, %v2794_v43  ;;  %v1421_v15 = vmul.f32 %v3059_v47, %v2798_v46  ;;  %v1561_v55 = vmul.f32 %v3050_v9, %v1537_v60 }
 0x267   : > { %v1311_v2 = vadd.f32 %v1295_v11, %v1227_v44  ;;  %v1313_v13 = vadd.f32 %v1297_v12, %v1229_v61  ;;  %v1563_v21 = vmul.f32 %v3050_v9, %v1539_v18  ;;  %v1588_v12 = vld [vmem:[%s4110_s6] sm:$0x3]  ;;  %v3084_v61 = vrot.slane %v2780_v25, 7 }
 0x268   : > { %v3087_v37 = vrot.slane %v2784_v31, 7  ;;  %v918_v43 = vmul.f32 %v2885_v32, %v894_v38  ;;  %v960_v0 = vmul.f32 %v2889_v34, %v2798_v46  ;;  %v1067_v60 = vsel %vm3000_vm9, %v2983_v56, 0.0 }
 0x269   : > { %v1393_v11 = vadd.f32 %v1377_v6, %v1311_v2  ;;  %v1395_v44 = vadd.f32 %v1379_v7, %v1313_v13  ;;  %4241 = vst [vmem:[#allocation25_spill] sm:$0xff] %v3084_v61  ;;  %v3098_v6 = vld [vmem:[%s4109_s5] sm:$0xff]  ;;  %v847_v25 = vrot.slane %v2788_v35, 7  ;;  %v3102_v13 = vrot.slane %v1588_v12, %v2776_v22 }
 0x26a   : > { %4242 = vst [vmem:[#allocation26_spill] sm:$0xff] %v3087_v37  ;;  %v3107_v38 = vsel %vm832_vm2, %v3084_v61, %v3087_v37  ;;  %v974_v18 = vadd.f32 %v958_v58, %v916_v51  ;;  %v3115_v1 = vrot.slane %v3098_v6, %v2770_v49  ;;  %v1149_v51 = vsel %vm2940_vm7, %v2975_v45, 0.0 }
 0x26b   : > { %v1435_v7 = vadd.f32 %v1419_v23, %v1393_v11  ;;  %v1437_v2 = vadd.f32 %v1421_v15, %v1395_v44  ;;  %4243 = vst [vmem:[#allocation27_spill] sm:$0xff] %v3102_v13  ;;  %4244 = vst [vmem:[#allocation28_spill] sm:$0xff] %v3107_v38  ;;  %v3111_v56 = vsel %vm832_vm2, %v3087_v37, %v847_v25  ;;  %v887_v58 = vsel %vm2857_vm1, %v3107_v38, 0.0 }
 0x26c   : > { %4245 = vst [vmem:[#allocation29_spill] sm:$0xff] %v3111_v56  ;;  %v3119_v23 = vrot.slane %v3098_v6, %v2776_v22  ;;  %v3121_v15 = vadd.f32 %v960_v0, %v918_v43  ;;  %v1091_v11 = vmul.f32 %v2964_v30, %v1067_v60  ;;  %v851_v22 = vrot.slane %v2792_v41, 7 }
 0x26d   : > { %v1577_v8 = vadd.f32 %v1561_v55, %v1435_v7  ;;  %v1579_v5 = vadd.f32 %v1563_v21, %v1437_v2  ;;  %v889_v0 = vsel %vm2867_vm3, %v3111_v56, 0.0  ;;  %v3142_v45 = vrot.slane %v2784_v31, 1 }
 0x26e   : > { %4246 = vst [vmem:[#allocation30_spill] sm:$0xff] %v3119_v23  ;;  %v1018_v43 = vrot.slane %v2788_v35, 1  ;;  %v3146_v60 = vrot.slane %v2792_v41, 1  ;;  %v911_v7 = vmul.f32 %v3115_v1, %v887_v58  ;;  %v953_v2 = vmul.f32 %v3119_v23, %v2784_v31 }
 0x26f   : > { %v3131_v55 = vadd.f32 %v3102_v13, %v1577_v8  ;;  %v3134_v21 = vadd.f32 %v3102_v13, %v1579_v5  ;;  %4247 = vst [vmem:[#allocation31_spill] sm:$0xff] %v3142_v45  ;;  %v913_v44 = vmul.f32 %v3115_v1, %v889_v0  ;;  %v955_v37 = vmul.f32 %v3119_v23, %v2788_v35 }
 0x270   : > { %4248 = vst [vmem:[#allocation32_spill] sm:$0xff] %v3146_v60  ;;  %v3162_v38 = vsel %vm1007_vm5, %v3142_v45, %v1018_v43  ;;  %v1023_v61 = vsel %vm1007_vm5, %v1018_v43, %v3146_v60  ;;  %v3166_v63 = vadd.f32 %v1091_v11, %v974_v18  ;;  %v3169_v27 = vmul.f32 %v3007_v33, %v1149_v51 }
 0x271   : > { %v3149_v8 = vmul.f32 0.70710677, %v3131_v55  ;;  %v3152_v5 = vmul.f32 0.70710677, %v3134_v21  ;;  %4249 = vst [vmem:[#allocation33_spill] sm:$0xff] %v3162_v38  ;;  %v1026_v0 = vrot.slane %v2796_v20, 1  ;;  %v3187_v36 = vsel %vm832_vm2, %v851_v22, %v4251_v14 }
 0x272   : > { %v1062_v26 = vsel %vm2914_vm4, %v3162_v38, 0.0  ;;  %v1064_v45 = vsel %vm2928_vm6, %v1023_v61, 0.0  ;;  %v4250_v43 = vsub.s32 2, %v2767_v19  ;;  %v969_v57 = vadd.f32 %v953_v2, %v911_v7 }
 0x273   : > { %v1653_v58 = vand.u32 2147483647, %v3149_v8  ;;  %v1655_v31 = vand.u32 2147483647, %v3152_v5  ;;  %v852_v34 = vsel %vm832_vm2, %v847_v25, %v851_v22  ;;  %v971_v24 = vadd.f32 %v955_v37, %v913_v44 }
 0x274   : > { %v3182_v18 = vrot.slane %v3098_v6, %v4250_v43  ;;  %v3193_v23 = vrot.slane %v1588_v12, %v2770_v49  ;;  %v891_v47 = vsel %vm2940_vm7, %v852_v34, 0.0  ;;  %v3202_v37 = vsel %vm1007_vm5, %v3146_v60, %v1026_v0 }
 0x275   : > { %v1669_v11 = vmul.f32 0.3275911, %v1653_v58  ;;  %v1671_v51 = vmul.f32 0.3275911, %v1655_v31  ;;  %v1877_v9 = vsub.f32 0.0, %v1653_v58  ;;  %v1879_v59 = vsub.f32 0.0, %v1655_v31 }
 0x276   : > { %v1086_v38 = vmul.f32 %v3182_v18, %v1062_v26  ;;  %v1088_v54 = vmul.f32 %v3182_v18, %v1064_v45  ;;  %4252 = vst [vmem:[#allocation34_spill] sm:$0xff] %v3193_v23  ;;  %v1144_v49 = vsel %vm2857_vm1, %v3111_v56, 0.0  ;;  %v1146_v12 = vsel %vm2867_vm3, %v852_v34, 0.0  ;;  %v797_v56 = vld [vmem:[#allocation2 + $0x88] sm:$0x7f] }
 0x277   : > { %v1685_v43 = vadd.f32 1.0, %v1669_v11  ;;  %v1687_v13 = vadd.f32 1.0, %v1671_v51  ;;  %v4253_v22 = vsub.s32 3, %v2767_v19  ;;  %v4255_v45 = vsub.s32 4, %v2767_v19 }
 0x278   : > { %v1102_v26 = vadd.f32 %v1086_v38, %v969_v57  ;;  %v1104_v25 = vadd.f32 %v1088_v54, %v971_v24  ;;  %v1893_v57 = vmul.f32 %v1877_v9, %v1653_v58  ;;  %v1270_v38 = vsel %vm2914_vm4, %v1023_v61, 0.0 }
 0x279   : > { %2484 = vrcp.f32 %v1685_v43  ;;  %v3212_v44 = vrot.slane %v3098_v6, %v4253_v22  ;;  %v3217_v7 = vrot.slane %v3098_v6, %v4255_v45  ;;  %v1272_v2 = vsel %vm2928_vm6, %v3202_v37, 0.0 }
 0x27a   : > { %2486 = vrcp.f32 %v1687_v13  ;;  %v4257_v54 = vsub.s32 5, %v2767_v19  ;;  %v1895_v13 = vmul.f32 %v1879_v59, %v1655_v31  ;;  %v1352_v22 = vsel %vm2857_vm1, %v852_v34, 0.0 }
 0x27b   : > { %4254 = vst [vmem:[#allocation35_spill] sm:$0xff] %v3212_v44  ;;  %4256 = vst [vmem:[#allocation36_spill] sm:$0xff] %v3217_v7  ;;  %v1168_v11 = vmul.f32 %v3212_v44, %v1144_v49  ;;  %v1170_v51 = vmul.f32 %v3212_v44, %v1146_v12  ;;  %v1210_v9 = vmul.f32 %v3217_v7, %v2788_v35  ;;  %v1354_v59 = vsel %vm2867_vm3, %v3187_v36, 0.0 }
 0x27c   : > { %v3227_v24 = vrot.slane %v3098_v6, %v4257_v54  ;;  %v1212_v61 = vmul.f32 %v3217_v7, %v2792_v41  ;;  %v4259_v31 = vsub.s32 6, %v2767_v19  ;;  %v4261_v49 = vsub.s32 7, %v2767_v19 }
 0x27d   : > { %v1184_v45 = vadd.f32 %v1168_v11, %v1102_v26  ;;  %v1186_v54 = vadd.f32 %v1170_v51, %v1104_v25  ;;  %vm1973_vm12 = vcmp.ge.f32.partialorder %v3149_v8, 0.0  ;;  %vm1975_vm13 = vcmp.ge.f32.partialorder %v3152_v5, 0.0 }
 0x27e   : > { %4258 = vst [vmem:[#allocation37_spill] sm:$0xff] %v3227_v24  ;;  %v1294_v58 = vmul.f32 %v3227_v24, %v1270_v38  ;;  %v1296_v43 = vmul.f32 %v3227_v24, %v1272_v2  ;;  %v3245_v35 = vrot.slane %v3098_v6, %v4259_v31  ;;  %v3250_v12 = vrot.slane %v3098_v6, %v4261_v49 }
 0x27f   : > { %v3253_v38 = vrot.slane %v2800_v50, 1  ;;  %v1226_v3 = vadd.f32 %v1210_v9, %v1184_v45  ;;  %v1228_v34 = vadd.f32 %v1212_v61, %v1186_v54  ;;  %v1536_v9 = vsel %vm2914_vm4, %v3202_v37, 0.0 }
 0x280   : > { %4260 = vst [vmem:[#allocation38_spill] sm:$0xff] %v3245_v35  ;;  %4262 = vst [vmem:[#allocation39_spill] sm:$0xff] %v3250_v12  ;;  %v1376_v26 = vmul.f32 %v3245_v35, %v1352_v22  ;;  %v1378_v25 = vmul.f32 %v3245_v35, %v1354_v59  ;;  %v1418_v2 = vmul.f32 %v3250_v12, %v2792_v41  ;;  %v1914_v45 = vmul.f32 1.442695, %v1893_v57 }
 0x281   : > { %v1420_v6 = vmul.f32 %v3250_v12, %v2796_v20  ;;  %v3268_v11 = vsel %vm1007_vm5, %v1026_v0, %v3253_v38  ;;  %v1310_v51 = vadd.f32 %v1294_v58, %v1226_v3  ;;  %v1312_v31 = vadd.f32 %v1296_v43, %v1228_v34 }
 0x282   : > { %v1538_v61 = vsel %vm2928_vm6, %v3268_v11, 0.0  ;;  %v1918_v54 = vmul.f32 1.442695, %v1895_v13  ;;  %v1560_v59 = vmul.f32 %v3258_v17, %v1536_v9  ;;  %v3280_v49 = vadd.s32 48, %v2767_v19 }
 0x283   : > { %v3276_v22 = vpop.eup %2484  ;;  %v1392_v43 = vadd.f32 %v1376_v26, %v1310_v51  ;;  %v1394_v53 = vadd.f32 %v1378_v25, %v1312_v31  ;;  %v1562_v3 = vmul.f32 %v3258_v17, %v1538_v61  ;;  %v3288_v34 = vmul.f32 %v3115_v1, %v891_v47 }
 0x284   : > { %v3282_v0 = vpop.eup %2486  ;;  %v1733_v58 = vmul.f32 1.0614054, %v3276_v22  ;;  %v4165_v57 = vand.u32 7, %v3280_v49  ;;  %v1066_v9 = vsel %vm3000_vm9, %v3202_v37, 0.0  ;;  %2488 = vpow2.f32 %v1914_v45 }
 0x285   : > { %v1735_v29 = vmul.f32 1.0614054, %v3282_v0  ;;  %v1434_v14 = vadd.f32 %v1418_v2, %v1392_v43  ;;  %v1436_v60 = vadd.f32 %v1420_v6, %v1394_v53  ;;  %v4264_v26 = vand.u32 7, %v2855_v16 }
 0x286   : > { %v1749_v13 = vadd.f32 -1.4531521, %v1733_v58  ;;  %v861_v47 = vrot.slane %v2802_v52, 7  ;;  %2490 = vpow2.f32 %v1918_v54  ;;  %vm3305_vm11 = vcmp.ge.s32.totalorder %v4165_v57, 1 }
 0x287   : > { %v1751_v19 = vadd.f32 -1.4531521, %v1735_v29  ;;  %vm3296_vm10 = vcmp.le.s32.totalorder %v4264_v26, 6  ;;  %v1576_v31 = vadd.f32 %v1560_v59, %v1434_v14  ;;  %v1578_v61 = vadd.f32 %v1562_v3, %v1436_v60 }
 0x288   : > { %v1765_v51 = vmul.f32 %v3276_v22, %v1749_v13  ;;  %v865_v16 = vrot.slane %v797_v56, 7  ;;  %v1069_v14 = vsel %vm3296_vm10, %v3066_v42, 0.0  ;;  %v3317_v60 = vmul.f32 0.5, %v3131_v55 }
 0x289   : > { %v1767_v37 = vmul.f32 %v3282_v0, %v1751_v19  ;;  %v1604_v45 = vadd.f32 %v3193_v23, %v1576_v31  ;;  %v3311_v58 = vadd.f32 %v3193_v23, %v1578_v61  ;;  %v4269_v54 = vsel %vm2968_vm8, %v3187_v36, 0.0 }
 0x28a   : > { %v1781_v6 = vadd.f32 1.4214138, %v1765_v51  ;;  %v3324_v56 = vmul.f32 %v3115_v1, %v4269_v54  ;;  %v4270_v59 = vrot.slane %v2798_v46, 7  ;;  %v3332_v53 = vmul.f32 0.5, %v3134_v21 }
 0x28b   : > { %v1783_v19 = vadd.f32 1.4214138, %v1767_v37  ;;  %v3335_v55 = vmul.f32 0.70710677, %v1604_v45  ;;  %v3342_v26 = vmul.f32 %v3182_v18, %v1066_v9  ;;  %v3345_v51 = vmul.f32 0.70710677, %v3311_v58 }
 0x28c   : > { %v3329_v43 = vsel %vm832_vm2, %v4270_v59, %v861_v47  ;;  %v1797_v3 = vmul.f32 %v3276_v22, %v1781_v6  ;;  %v1093_v31 = vmul.f32 %v2964_v30, %v1069_v14  ;;  %v3353_v6 = vsel %vm832_vm2, %v861_v47, %v865_v16 }
 0x28d   : > { %v896_v29 = vsel %vm3305_vm11, %v3329_v43, 0.0  ;;  %v1799_v13 = vmul.f32 %v3282_v0, %v1783_v19  ;;  %v1652_v37 = vand.u32 2147483647, %v3335_v55  ;;  %4271 = vst [vmem:[#allocation41_spill] sm:$0xff] %v3353_v6  ;;  %v1654_v19 = vand.u32 2147483647, %v3345_v51 }
 0x28e   : > { %v1813_v21 = vadd.f32 -0.28449672, %v1797_v3  ;;  %v3357_v9 = vmul.f32 %v2885_v32, %v896_v29  ;;  %v3360_v59 = vrot.slane %v2806_v28, 1  ;;  %v1151_v61 = vsel %vm2968_vm8, %v3329_v43, 0.0  ;;  %v2489_v23 = vpop.eup %2488 }
 0x28f   : > { %v1815_v54 = vadd.f32 -0.28449672, %v1799_v13  ;;  %v1668_v3 = vmul.f32 0.3275911, %v1652_v37  ;;  %v1876_v57 = vsub.f32 0.0, %v1652_v37  ;;  %v1109_v29 = vadd.f32 %v1093_v31, %v3121_v15 }
 0x290   : > { %4272 = vst [vmem:[#allocation42_spill] sm:$0xff] %v3357_v9  ;;  %4273 = vst [vmem:[#allocation43_spill] sm:$0xff] %v3360_v59  ;;  %v1829_v14 = vmul.f32 %v3276_v22, %v1813_v21  ;;  %v1670_v13 = vmul.f32 0.3275911, %v1654_v19  ;;  %v3370_v9 = vrot.slane %v2806_v28, 7  ;;  %v2491_v6 = vpop.eup %2490  ;;  %v1878_v17 = vsub.f32 0.0, %v1654_v19 }
 0x291   : > { %v1831_v16 = vmul.f32 %v3282_v0, %v1815_v54  ;;  %v1684_v21 = vadd.f32 1.0, %v1668_v3  ;;  %v1175_v12 = vmul.f32 %v3007_v33, %v1151_v61  ;;  %v1892_v7 = vmul.f32 %v1876_v57, %v1652_v37 }
 0x292   : > { %4274 = vst [vmem:[#allocation44_spill] sm:$0xff] %v3370_v9  ;;  %v1845_v32 = vadd.f32 0.2548296, %v1829_v14  ;;  %v1686_v24 = vadd.f32 1.0, %v1670_v13  ;;  %v4275_v54 = vrot.slane %v2802_v52, 1  ;;  %v3381_v31 = vmul.f32 0.5, %v1604_v45 }
 0x293   : > { %v1847_v35 = vadd.f32 0.2548296, %v1831_v16  ;;  %2492 = vrcp.f32 %v1684_v21  ;;  %v1189_v14 = vadd.f32 %v3169_v27, %v3166_v63  ;;  %v3388_v57 = vsel %vm832_vm2, %v861_v47, %v3370_v9 }
 0x294   : > { %v3378_v44 = vsel %vm1007_vm5, %v4275_v54, %v3360_v59  ;;  %v1861_v15 = vmul.f32 %v3276_v22, %v1845_v32  ;;  %2494 = vrcp.f32 %v1686_v24  ;;  %v1191_v61 = vadd.f32 %v1175_v12, %v1109_v29 }
 0x295   : > { %v1863_v3 = vmul.f32 %v3282_v0, %v1847_v35  ;;  %v1894_v16 = vmul.f32 %v1878_v17, %v1654_v19  ;;  %v4276_v13 = vand.u32 7, %v3280_v49  ;;  %v4277_v32 = vmov 0 }
 0x296   : > { %v1941_v37 = vmul.f32 %v2489_v23, %v1861_v15  ;;  %v1215_v22 = vmul.f32 %v3018_v10, %v2798_v46  ;;  %v1217_v27 = vmul.f32 %v3018_v10, %v2802_v52  ;;  %v1912_v24 = vmul.f32 1.442695, %v1892_v7  ;;  %v4280_v15 = vld [vmem:[#allocation24_spill] sm:$0xff] }
 0x297   : > { %vm3392_vm14 = vcmp.le.s32.totalorder %v4276_v13, 6  ;;  %v1943_v63 = vmul.f32 %v2491_v6, %v1863_v3  ;;  %v1275_v35 = vsel %vm3000_vm9, %v3066_v42, 0.0  ;;  %v1277_v23 = vsel %vm3296_vm10, %v3378_v44, 0.0 }
 0x298   : > { %v4278_v32 = vsel %vm3392_vm14, 4294967295, %v4277_v32  ;;  %v1957_v12 = vsub.f32 1.0, %v1941_v37  ;;  %v1231_v17 = vadd.f32 %v1215_v22, %v1189_v14  ;;  %v1233_v49 = vadd.f32 %v1217_v27, %v1191_v61  ;;  %v4281_v37 = vld [vmem:[#allocation13_spill] sm:$0xff] }
 0x299   : > { %4279 = vst [vmem:[#allocation45_spill] sm:$0xff] %v4278_v32  ;;  %v1299_v0 = vmul.f32 %v3023_v39, %v1275_v35  ;;  %v1959_v47 = vsub.f32 1.0, %v1943_v63  ;;  %v1301_v46 = vmul.f32 %v3023_v39, %v1277_v23  ;;  %v1357_v7 = vsel %vm2940_vm7, %v3329_v43, 0.0 }
 0x29a   : > { %v1359_v42 = vsel %vm2968_vm8, %v3388_v57, 0.0  ;;  %v1989_v45 = vsub.f32 0.0, %v1957_v12  ;;  %v1381_v19 = vmul.f32 %v3042_v62, %v1357_v7  ;;  %v1423_v14 = vmul.f32 %v4280_v15, %v2802_v52  ;;  %v4282_v7 = vld [vmem:[#allocation23_spill] sm:$0xff] }
 0x29b   : > { %v1315_v6 = vadd.f32 %v1299_v0, %v1231_v17  ;;  %v1383_v29 = vmul.f32 %v3042_v62, %v1359_v42  ;;  %v1991_v21 = vsub.f32 0.0, %v1959_v47  ;;  %v1317_v54 = vadd.f32 %v1301_v46, %v1233_v49 }
 0x29c   : > { %v1425_v3 = vmul.f32 %v4280_v15, %v2806_v28  ;;  %v2005_v43 = vsel %vm1973_vm12, %v1957_v12, %v1989_v45  ;;  %v4182_v13 = vrot.slane %v4281_v37, 1  ;;  %v1916_v63 = vmul.f32 1.442695, %v1894_v16 }
 0x29d   : > { %v1397_v61 = vadd.f32 %v1381_v19, %v1315_v6  ;;  %v2007_v22 = vsel %vm1975_vm13, %v1959_v47, %v1991_v21  ;;  %v2021_v27 = vadd.f32 1.0, %v2005_v43  ;;  %v1399_v35 = vadd.f32 %v1383_v29, %v1317_v54  ;;  %v3425_v23 = vpop.eup %2492 }
 0x29e   : > { %v2023_v17 = vadd.f32 1.0, %v2007_v22  ;;  %v1507_v52 = vsel %vm1007_vm5, %v3360_v59, %v4182_v13  ;;  %v3431_v28 = vpop.eup %2494  ;;  %v1732_v12 = vmul.f32 1.0614054, %v3425_v23  ;;  %v1541_v16 = vsel %vm3000_vm9, %v3378_v44, 0.0  ;;  %v1115_v59 = vld [vmem:[#allocation2 + $0x18] sm:$0x80] }
 0x29f   : > { %v1439_v49 = vadd.f32 %v1423_v14, %v1397_v61  ;;  %v2037_v8 = vmul.f32 %v2021_v27, %v3317_v60  ;;  %v1441_v5 = vadd.f32 %v1425_v3, %v1399_v35  ;;  %v1734_v47 = vmul.f32 1.0614054, %v3431_v28  ;;  %v4284_v61 = vld [vmem:[#allocation27_spill] sm:$0xff] }
 0x2a0   : > { %v2039_v0 = vmul.f32 %v2023_v17, %v3332_v53  ;;  %v1543_v46 = vsel %vm3296_vm10, %v1507_v52, 0.0  ;;  %v1565_v42 = vmul.f32 %v4282_v7, %v1541_v16  ;;  %v3444_v45 = vmul.f32 0.5, %v3311_v58  ;;  %v796_v27 = vld [vmem:[#allocation2 + $0x80] sm:$0x7f] }
 0x2a1   : > { %v1748_v60 = vadd.f32 -1.4531521, %v1732_v12  ;;  %v1071_v6 = vsel %vm3392_vm14, %v3378_v44, 0.0  ;;  %v1567_v19 = vmul.f32 %v4282_v7, %v1543_v46  ;;  %v1750_v21 = vadd.f32 -1.4531521, %v1734_v47 }
 0x2a2   : > { %v2051_v29 = vpack.c.bf16 %v2039_v0, %v2037_v8  ;;  %v1581_v53 = vadd.f32 %v1565_v42, %v1439_v49  ;;  %v3451_v54 = vrot.slane %v2800_v50, 7  ;;  %2496 = vpow2.f32 %v1912_v24  ;;  %v4285_v24 = vld [vmem:[#allocation30_spill] sm:$0xff] }
 0x2a3   : > { %v1764_v14 = vmul.f32 %v3425_v23, %v1748_v60  ;;  %v1153_v58 = vsel %vm3305_vm11, %v3388_v57, 0.0  ;;  %v1583_v3 = vadd.f32 %v1567_v19, %v1441_v5  ;;  %v1766_v43 = vmul.f32 %v3431_v28, %v1750_v21  ;;  %v4288_v19 = vld [vmem:[#allocation12_spill] sm:$0xff] }
 0x2a4   : > { %2231 = vmatprep.mubr.bf16.mxu1 %v2051_v29  ;;  %2498 = vpow2.f32 %v1916_v63  ;;  %v3459_v44 = vmul.f32 %v2964_v30, %v1071_v6  ;;  %v3462_v22 = vadd.f32 %v4284_v61, %v1581_v53  ;;  %v957_v49 = vmul.f32 %v4285_v24, %v2792_v41 }
 0x2a5   : > { %v1780_v35 = vadd.f32 1.4214138, %v1764_v14  ;;  %v3465_v17 = vadd.f32 %v4284_v61, %v1583_v3  ;;  %v1782_v57 = vadd.f32 1.4214138, %v1766_v43  ;;  %v3470_v52 = vmul.f32 %v3007_v33, %v1153_v58 }
 0x2a6   : > { %4283 = vst [vmem:[#allocation24_spill] sm:$0xff] %v3459_v44  ;;  %v3473_v63 = vmul.f32 0.70710677, %v3462_v22  ;;  %v4287_v8 = vrot.slane %v2796_v20, 7  ;;  %v863_v0 = vrot.slane %v796_v27, 7  ;;  %v959_v41 = vmul.f32 %v4285_v24, %v2796_v20 }
 0x2a7   : > { %4286 = vst [vmem:[#allocation23_spill] sm:$0xff] %v3470_v52  ;;  %v1796_v5 = vmul.f32 %v3425_v23, %v1780_v35  ;;  %v3483_v16 = vmul.f32 0.70710677, %v3465_v17  ;;  %v1798_v47 = vmul.f32 %v3431_v28, %v1782_v57  ;;  %v973_v6 = vadd.f32 %v957_v49, %v3288_v34 }
 0x2a8   : > { %v3479_v12 = vsel %vm832_vm2, %v4287_v8, %v3451_v54  ;;  %v1657_v46 = vand.u32 2147483647, %v3473_v63  ;;  %v3495_v29 = vrot.slane %v4288_v19, 1  ;;  %v1068_v58 = vsel %vm3296_vm10, %v3268_v11, 0.0 }
 0x2a9   : > { %v895_v7 = vsel %vm3305_vm11, %v3479_v12, 0.0  ;;  %v1812_v42 = vadd.f32 -0.28449672, %v1796_v5  ;;  %v1659_v60 = vand.u32 2147483647, %v3483_v16  ;;  %v975_v35 = vadd.f32 %v959_v41, %v3324_v56 }
 0x2aa   : > { %4289 = vst [vmem:[#allocation27_spill] sm:$0xff] %v3495_v29  ;;  %v1814_v21 = vadd.f32 -0.28449672, %v1798_v47  ;;  %v1673_v53 = vmul.f32 0.3275911, %v1657_v46  ;;  %v1881_v14 = vsub.f32 0.0, %v1657_v46  ;;  %v1092_v8 = vmul.f32 %v3182_v18, %v1068_v58 }
 0x2ab   : > { %v1828_v3 = vmul.f32 %v3425_v23, %v1812_v42  ;;  %v1675_v43 = vmul.f32 0.3275911, %v1659_v60  ;;  %v1883_v27 = vsub.f32 0.0, %v1659_v60  ;;  %vm1972_vm15 = vcmp.ge.f32.partialorder %v3335_v55, 0.0 }
 0x2ac   : > { %v1830_v57 = vmul.f32 %v3431_v28, %v1814_v21  ;;  %v1689_v34 = vadd.f32 1.0, %v1673_v53  ;;  %v1897_v49 = vmul.f32 %v1881_v14, %v1657_v46  ;;  %v2497_v5 = vpop.eup %2496  ;;  %vm1974_vm1 = vcmp.ge.f32.partialorder %v3345_v51, 0.0 }
 0x2ad   : > { %v1844_v47 = vadd.f32 0.2548296, %v1828_v3  ;;  %v1691_v13 = vadd.f32 1.0, %v1675_v43  ;;  %v3508_v42 = vsel %vm832_vm2, %v3451_v54, %v863_v0  ;;  %v3511_v37 = vmul.f32 %v3115_v1, %v895_v7 }
 0x2ae   : > { %4290 = vst [vmem:[#allocation30_spill] sm:$0xff] %v3508_v42  ;;  %v2499_v56 = vpop.eup %2498  ;;  %v1846_v41 = vadd.f32 0.2548296, %v1830_v57  ;;  %2500 = vrcp.f32 %v1689_v34  ;;  %v1899_v21 = vmul.f32 %v1883_v27, %v1659_v60  ;;  %v3516_v46 = vsel %vm1007_vm5, %v3253_v38, %v3495_v29  ;;  %v4316_v29 = vld [vmem:[#allocation16_spill] sm:$0xff] }
 0x2af   : > { %4291 = vst [vmem:[#allocation12_spill] sm:$0xff] %v3511_v37  ;;  %v1860_v53 = vmul.f32 %v3425_v23, %v1844_v47  ;;  %2502 = vrcp.f32 %v1691_v13  ;;  %v1106_v14 = vadd.f32 %v3342_v26, %v973_v6  ;;  %v1108_v58 = vadd.f32 %v1092_v8, %v975_v35  ;;  %v4294_v13 = vld [vmem:[#allocation35_spill] sm:$0xff]  ;;  %v4295_v35 = vld [vmem:[#allocation36_spill] sm:$0xff] }
 0x2b0   : > { %v1862_v0 = vmul.f32 %v3431_v28, %v1846_v41  ;;  %v1922_v3 = vmul.f32 1.442695, %v1897_v49  ;;  %v3522_v7 = vrot.slane %v4288_v19, 7  ;;  %v1150_v60 = vsel %vm2968_vm8, %v3479_v12, 0.0 }
 0x2b1   : > { %v1940_v43 = vmul.f32 %v2497_v5, %v1860_v53  ;;  %v1070_v27 = vsel %vm3392_vm14, %v3516_v46, 0.0  ;;  %v4293_v26 = vsel %vm2940_vm7, %v3187_v36, 0.0  ;;  %v1174_v28 = vmul.f32 %v4294_v13, %v1150_v60  ;;  %v4296_v53 = vld [vmem:[#allocation37_spill] sm:$0xff] }
 0x2b2   : > { %4292 = vst [vmem:[#allocation46_spill] sm:$0xff] %v3522_v7  ;;  %v1172_v23 = vmul.f32 %v4294_v13, %v4293_v26  ;;  %v1942_v6 = vmul.f32 %v2499_v56, %v1862_v0  ;;  %v1926_v19 = vmul.f32 1.442695, %v1899_v21  ;;  %v1214_v57 = vmul.f32 %v4295_v35, %v2796_v20 }
 0x2b3   : > { %v1216_v34 = vmul.f32 %v4295_v35, %v2800_v50  ;;  %v1956_v49 = vsub.f32 1.0, %v1940_v43  ;;  %v3543_v8 = vsel %vm832_vm2, %v3451_v54, %v3522_v7  ;;  %v1190_v36 = vadd.f32 %v1174_v28, %v1108_v58  ;;  %v4297_v43 = vld [vmem:[#allocation38_spill] sm:$0xff] }
 0x2b4   : > { %v1188_v5 = vadd.f32 %v1172_v23, %v1106_v14  ;;  %v1958_v47 = vsub.f32 1.0, %v1942_v6  ;;  %2504 = vpow2.f32 %v1922_v3  ;;  %v1274_v56 = vsel %vm3000_vm9, %v3268_v11, 0.0 }
 0x2b5   : > { %v1276_v20 = vsel %vm3296_vm10, %v3516_v46, 0.0  ;;  %v1988_v41 = vsub.f32 0.0, %v1956_v49  ;;  %v1232_v21 = vadd.f32 %v1216_v34, %v1190_v36  ;;  %v1298_v0 = vmul.f32 %v4296_v53, %v1274_v56  ;;  %v4299_v34 = vld [vmem:[#allocation39_spill] sm:$0xff]  ;;  %v2558_v46 = vld [vmem:[#allocation2 + $0x78] sm:$0xff] }
 0x2b6   : > { %v1230_v50 = vadd.f32 %v1214_v57, %v1188_v5  ;;  %v1990_v60 = vsub.f32 0.0, %v1958_v47  ;;  %v1300_v54 = vmul.f32 %v4296_v53, %v1276_v20  ;;  %v1356_v14 = vsel %vm2940_vm7, %v3479_v12, 0.0  ;;  %v3567_v12 = vld [vmem:[#allocation2 + $0x70] sm:$0xff]  ;;  %v3574_v56 = vld [vmem:[#allocation2 + $0x80] sm:$0xff] }
 0x2b7   : > { %v1358_v11 = vsel %vm2968_vm8, %v3543_v8, 0.0  ;;  %v2004_v58 = vsel %vm1972_vm15, %v1956_v49, %v1988_v41  ;;  %v1380_v26 = vmul.f32 %v4297_v43, %v1356_v14  ;;  %4298 = vst [vmem:[#allocation35_spill] sm:$0xff] %v3567_v12  ;;  %v1422_v40 = vmul.f32 %v3567_v12, %v4299_v34  ;;  %4300 = vst [vmem:[#allocation36_spill] sm:$0xff] %v3574_v56 }
 0x2b8   : > { %v1314_v3 = vadd.f32 %v1298_v0, %v1230_v50  ;;  %v1382_v23 = vmul.f32 %v4297_v43, %v1358_v11  ;;  %v3563_v28 = vpop.eup %2500  ;;  %v2006_v6 = vsel %vm1974_vm1, %v1958_v47, %v1990_v60  ;;  %v2020_v57 = vadd.f32 1.0, %v2004_v58 }
 0x2b9   : > { %v1316_v4 = vadd.f32 %v1300_v54, %v1232_v21  ;;  %v3571_v5 = vpop.eup %2502  ;;  %v2022_v55 = vadd.f32 1.0, %v2006_v6  ;;  %v1737_v49 = vmul.f32 1.0614054, %v3563_v28  ;;  %v1424_v20 = vmul.f32 %v3574_v56, %v4299_v34  ;;  %v3582_v54 = vld [vmem:[#allocation2 + $0x90] sm:$0xff] }
 0x2ba   : > { %v1396_v36 = vadd.f32 %v1380_v26, %v1314_v3  ;;  %v2036_v51 = vmul.f32 %v2020_v57, %v3381_v31  ;;  %v1739_v47 = vmul.f32 1.0614054, %v3571_v5  ;;  %v1500_v50 = vrot.slane %v3574_v56, 1  ;;  %4301 = vst [vmem:[#allocation37_spill] sm:$0xff] %v3582_v54  ;;  %v4302_v26 = vld [vmem:[#allocation11_spill] sm:$0xff] }
 0x2bb   : > { %v1398_v41 = vadd.f32 %v1382_v23, %v1316_v4  ;;  %v2038_v21 = vmul.f32 %v2022_v55, %v3444_v45  ;;  %v1753_v0 = vadd.f32 -1.4531521, %v1737_v49  ;;  %v4184_v14 = vrot.slane %v3582_v54, 1  ;;  %v781_v4 = vld [vmem:[#allocation2 + $0x8] sm:$0x80] }
 0x2bc   : > { %v1438_v60 = vadd.f32 %v1422_v40, %v1396_v36  ;;  %v1755_v11 = vadd.f32 -1.4531521, %v1739_v47  ;;  %v1501_v3 = vsel %vm1007_vm5, %v3253_v38, %v1500_v50  ;;  %v657_v31 = vadd.s32 8, %v4302_v26  ;;  %v4303_v49 = vld [vmem:[#allocation40_spill] sm:$0xff] }
 0x2bd   : > { %v1440_v58 = vadd.f32 %v1424_v20, %v1398_v41  ;;  %v2050_v6 = vpack.c.bf16 %v2038_v21, %v2036_v51  ;;  %v1769_v23 = vmul.f32 %v3563_v28, %v1753_v0  ;;  %v1505_v45 = vsel %vm1007_vm5, %v1500_v50, %v4184_v14  ;;  %v783_v50 = vld [vmem:[#allocation2 + $0x18] sm:$0xff] }
 0x2be   : > { %v1540_v57 = vsel %vm3000_vm9, %v1501_v3, 0.0  ;;  %v2505_v40 = vpop.eup %2504  ;;  %v1771_v55 = vmul.f32 %v3571_v5, %v1755_v11  ;;  %2506 = vpow2.f32 %v1926_v19  ;;  %v1542_v38 = vsel %vm3296_vm10, %v1505_v45, 0.0 }
 0x2bf   : > { %v1564_v36 = vmul.f32 %v4303_v49, %v1540_v57  ;;  %2232 = vmatmul.mubr.bf16.vlgmr.msra.gmra.mrb[0].mxu1 %v2050_v6  ;;  %v1785_v20 = vadd.f32 1.4214138, %v1769_v23  ;;  %v1566_v51 = vmul.f32 %v4303_v49, %v1542_v38  ;;  %v668_v47 = vand.u32 7, %v4302_v26  ;;  %v984_v49 = vld [vmem:[#allocation2 + $0x98] sm:$0x1] }
 0x2c0   : > { %v675_v41 = vand.u32 7, %v657_v31  ;;  %v3601_v48 = vmul.f32 0.5, %v3462_v22  ;;  %v1787_v21 = vadd.f32 1.4214138, %v1771_v55  ;;  %v836_v11 = vrot.slane %v781_v4, 7 }
 0x2c1   : > { %v1580_v0 = vadd.f32 %v1564_v36, %v1438_v60  ;;  %v3604_v19 = vmul.f32 0.5, %v3465_v17  ;;  %v1801_v25 = vmul.f32 %v3563_v28, %v1785_v20  ;;  %v3612_v3 = vmul.f32 %v3182_v18, %v1070_v27  ;;  %v4305_v60 = vld [vmem:[#allocation34_spill] sm:$0xff] }
 0x2c2   : > { %v1582_v31 = vadd.f32 %v1566_v51, %v1440_v58  ;;  %v1803_v6 = vmul.f32 %v3571_v5, %v1787_v21  ;;  %v837_v17 = vrot.slane %v783_v50, 7  ;;  %vm3624_vm3 = vcmp.ge.s32.totalorder %v668_v47, 1  ;;  %v982_v58 = vld [vmem:[#allocation2 + $0x18] sm:$0xfe] }
 0x2c3   : > { %4304 = vst [vmem:[#allocation39_spill] sm:$0xff] %v3612_v3  ;;  %v3619_v23 = vadd.f32 %v4305_v60, %v1580_v0  ;;  %v1817_v45 = vadd.f32 -0.28449672, %v1801_v25  ;;  %vm3628_vm4 = vcmp.ge.s32.totalorder %v675_v41, 1  ;;  %vm3635_vm6 = vcmp.le.s32.totalorder %v668_v47, 6  ;;  %v4314_v21 = vld [vmem:[#allocation14_spill] sm:$0xff] }
 0x2c4   : > { %v3622_v57 = vadd.f32 %v4305_v60, %v1582_v31  ;;  %v1819_v4 = vadd.f32 -0.28449672, %v1803_v6  ;;  %vm3639_vm7 = vcmp.le.s32.totalorder %v675_v41, 6  ;;  %v838_v36 = vsel %vm832_vm2, %v836_v11, %v837_v17  ;;  %v4315_v25 = vld [vmem:[#allocation17_spill] sm:$0xff]  ;;  %v2551_v11 = vld [vmem:[#allocation2 + $0x28] sm:$0xff] }
 0x2c5   : > { %v3633_v55 = vmul.f32 0.70710677, %v3619_v23  ;;  %v1833_v20 = vmul.f32 %v3563_v28, %v1817_v45  ;;  %v842_v0 = vsel %vm832_vm2, %v837_v17, %v4314_v21  ;;  %v950_v31 = vmul.f32 %v4315_v25, %v783_v50 }
 0x2c6   : > { %v3646_v51 = vmul.f32 0.70710677, %v3622_v57  ;;  %v1835_v47 = vmul.f32 %v3571_v5, %v1819_v4  ;;  %vm1977_vm8 = vcmp.ge.f32.partialorder %v3473_v63, 0.0  ;;  %v884_v6 = vsel %vm3624_vm3, %v838_v36, 0.0 }
 0x2c7   : > { %v1656_v41 = vand.u32 2147483647, %v3633_v55  ;;  %v952_v45 = vmul.f32 %v2551_v11, %v4315_v25  ;;  %v1849_v14 = vadd.f32 0.2548296, %v1833_v20  ;;  %vm1979_vm9 = vcmp.ge.f32.partialorder %v3483_v16, 0.0 }
 0x2c8   : > { %v1658_v22 = vand.u32 2147483647, %v3646_v51  ;;  %v886_v50 = vsel %vm3628_vm4, %v842_v0, 0.0  ;;  %v1011_v17 = vrot.slane %v982_v58, 1  ;;  %v2507_v4 = vpop.eup %2506  ;;  %v1851_v54 = vadd.f32 0.2548296, %v1835_v47 }
 0x2c9   : > { %v1672_v3 = vmul.f32 0.3275911, %v1656_v41  ;;  %v1880_v7 = vsub.f32 0.0, %v1656_v41  ;;  %v908_v37 = vmul.f32 %v4316_v29, %v884_v6  ;;  %v1865_v36 = vmul.f32 %v3563_v28, %v1849_v14 }
 0x2ca   : > { %v1674_v56 = vmul.f32 0.3275911, %v1658_v22  ;;  %v1882_v12 = vsub.f32 0.0, %v1658_v22  ;;  %v910_v20 = vmul.f32 %v4316_v29, %v886_v50  ;;  %v1867_v42 = vmul.f32 %v3571_v5, %v1851_v54  ;;  %v4317_v54 = vld [vmem:[#allocation20_spill] sm:$0xff] }
 0x2cb   : > { %v1688_v32 = vadd.f32 1.0, %v1672_v3  ;;  %v1896_v52 = vmul.f32 %v1880_v7, %v1656_v41  ;;  %v966_v9 = vadd.f32 %v950_v31, %v908_v37  ;;  %v1945_v0 = vmul.f32 %v2505_v40, %v1865_v36  ;;  %v4318_v3 = vld [vmem:[#allocation18_spill] sm:$0xff]  ;;  %v1323_v31 = vld [vmem:[#allocation2 + $0x28] sm:$0x80] }
 0x2cc   : > { %v1690_v58 = vadd.f32 1.0, %v1674_v56  ;;  %v1898_v60 = vmul.f32 %v1882_v12, %v1658_v22  ;;  %v968_v47 = vadd.f32 %v952_v45, %v910_v20  ;;  %v1947_v44 = vmul.f32 %v2507_v4, %v1867_v42  ;;  %v2552_v4 = vld [vmem:[#allocation2 + $0x38] sm:$0xff] }
 0x2cd   : > { %2508 = vrcp.f32 %v1688_v32  ;;  %v1920_v25 = vmul.f32 1.442695, %v1896_v52  ;;  %v1012_v6 = vrot.slane %v2551_v11, 1  ;;  %v1961_v26 = vsub.f32 1.0, %v1945_v0 }
 0x2ce   : > { %2510 = vrcp.f32 %v1690_v58  ;;  %v1924_v28 = vmul.f32 1.442695, %v1898_v60  ;;  %v1124_v14 = vrot.slane %v1115_v59, 7  ;;  %v1963_v43 = vsub.f32 1.0, %v1947_v44 }
 0x2cf   : > { %2512 = vpow2.f32 %v1920_v25  ;;  %v1013_v5 = vsel %vm1007_vm5, %v1011_v17, %v1012_v6  ;;  %v1017_v37 = vsel %vm1007_vm5, %v1012_v6, %v4317_v54  ;;  %v1993_v7 = vsub.f32 0.0, %v1961_v26  ;;  %v1239_v25 = vld [vmem:[#allocation2 + $0x28] sm:$0xfe] }
 0x2d0   : > { %2514 = vpow2.f32 %v1924_v28  ;;  %v1059_v12 = vsel %vm3635_vm6, %v1013_v5, 0.0  ;;  %v1061_v32 = vsel %vm3639_vm7, %v1017_v37, 0.0  ;;  %v1995_v52 = vsub.f32 0.0, %v1963_v43  ;;  %v4320_v5 = vld [vmem:[#allocation15_spill] sm:$0xff] }
 0x2d1   : > { %v1083_v42 = vmul.f32 %v2964_v30, %v1059_v12  ;;  %v1085_v59 = vmul.f32 %v2964_v30, %v1061_v32  ;;  %v1125_v44 = vsel %vm832_vm2, %v1124_v14, %v4314_v21  ;;  %v2009_v56 = vsel %vm1977_vm8, %v1961_v26, %v1993_v7  ;;  %v4321_v37 = vld [vmem:[#allocation19_spill] sm:$0xff] }
 0x2d2   : > { %v1141_v40 = vsel %vm3624_vm3, %v1125_v44, 0.0  ;;  %v1143_v22 = vsel %vm3628_vm4, %v4318_v3, 0.0  ;;  %v1207_v60 = vmul.f32 %v2551_v11, %v3018_v10  ;;  %v2011_v41 = vsel %vm1979_vm9, %v1963_v43, %v1995_v52  ;;  %v4319_v11 = vld [vmem:[#allocation22_spill] sm:$0xff] }
 0x2d3   : > { %v2025_v45 = vadd.f32 1.0, %v2009_v56  ;;  %v1099_v50 = vadd.f32 %v1083_v42, %v966_v9  ;;  %v1101_v21 = vadd.f32 %v1085_v59, %v968_v47  ;;  %v2027_v17 = vadd.f32 1.0, %v2011_v41  ;;  %v1447_v44 = vld [vmem:[#allocation2 + $0x38] sm:$0xfe]  ;;  %v1449_v56 = vld [vmem:[#allocation2 + $0x48] sm:$0xff] }
 0x2d4   : > { %v1165_v63 = vmul.f32 %v3007_v33, %v1141_v40  ;;  %v1167_v26 = vmul.f32 %v3007_v33, %v1143_v22  ;;  %v1209_v36 = vmul.f32 %v2552_v4, %v3018_v10  ;;  %v1250_v0 = vrot.slane %v1239_v25, 1 }
 0x2d5   : > { %v2041_v20 = vmul.f32 %v2025_v45, %v3601_v48  ;;  %v1269_v58 = vsel %vm3639_vm7, %v4319_v11, 0.0  ;;  %v1332_v16 = vrot.slane %v1323_v31, 7  ;;  %v2043_v43 = vmul.f32 %v2027_v17, %v3604_v19  ;;  %v780_v31 = vld [vmem:[#allocation2] sm:$0x80]  ;;  %v782_v17 = vld [vmem:[#allocation2 + $0x10] sm:$0xff] }
 0x2d6   : > { %v1181_v9 = vadd.f32 %v1165_v63, %v1099_v50  ;;  %v1183_v47 = vadd.f32 %v1167_v26, %v1101_v21  ;;  %v1293_v6 = vmul.f32 %v3023_v39, %v1269_v58  ;;  %v1251_v14 = vsel %vm1007_vm5, %v1250_v0, %v4317_v54  ;;  %v2553_v26 = vld [vmem:[#allocation2 + $0x48] sm:$0xff] }
 0x2d7   : > { %v3695_v28 = vpop.eup %2508  ;;  %v1333_v48 = vsel %vm832_vm2, %v1332_v16, %v4320_v5  ;;  %v1351_v7 = vsel %vm3628_vm4, %v4321_v37, 0.0  ;;  %v1415_v12 = vmul.f32 %v2552_v4, %v4280_v15  ;;  %v2053_v19 = vpack.c.bf16 %v2043_v43, %v2041_v20 }
 0x2d8   : > { %v3705_v32 = vpop.eup %2510  ;;  %v1736_v52 = vmul.f32 1.0614054, %v3695_v28  ;;  %v1223_v42 = vadd.f32 %v1207_v60, %v1181_v9  ;;  %v1225_v59 = vadd.f32 %v1209_v36, %v1183_v47  ;;  %v1267_v3 = vsel %vm3635_vm6, %v1251_v14, 0.0  ;;  %v4322_v47 = vld [vmem:[#allocation21_spill] sm:$0xff] }
 0x2d9   : > { %v3708_v40 = vpop.eup %2512  ;;  %v1738_v54 = vmul.f32 1.0614054, %v3705_v32  ;;  %v1349_v22 = vsel %vm3624_vm3, %v1333_v48, 0.0  ;;  %v1375_v25 = vmul.f32 %v3042_v62, %v1351_v7  ;;  %2239 = vmatprep.mubr.bf16.mxu1 %v2053_v19  ;;  %v1291_v45 = vmul.f32 %v3023_v39, %v1267_v3 }
 0x2da   : > { %v3716_v41 = vpop.eup %2514  ;;  %v1752_v60 = vadd.f32 -1.4531521, %v1736_v52  ;;  %v1309_v50 = vadd.f32 %v1293_v6, %v1225_v59  ;;  %v1373_v21 = vmul.f32 %v3042_v62, %v1349_v22  ;;  %v1417_v4 = vmul.f32 %v2553_v26, %v4280_v15  ;;  %v4323_v22 = vld [vmem:[#allocation25_spill] sm:$0xff] }
 0x2db   : > { %v1754_v63 = vadd.f32 -1.4531521, %v1738_v54  ;;  %v1485_v36 = vrot.slane %v1447_v44, 1  ;;  %v1486_v20 = vrot.slane %v1449_v56, 1  ;;  %v1307_v11 = vadd.f32 %v1291_v45, %v1223_v42  ;;  %v3733_v42 = vld [vmem:[%s4109_s5 + $0x18] ss:$0 sm:$0xff] }
 0x2dc   : > { %v1768_v0 = vmul.f32 %v3695_v28, %v1752_v60  ;;  %v1391_v58 = vadd.f32 %v1375_v25, %v1309_v50  ;;  %v833_v16 = vrot.slane %v780_v31, 7  ;;  %v834_v14 = vrot.slane %v782_v17, 7  ;;  %v981_v31 = vld [vmem:[#allocation2 + $0x10] sm:$0xfe] }
 0x2dd   : > { %v1770_v43 = vmul.f32 %v3705_v32, %v1754_v63  ;;  %v1487_v9 = vsel %vm1007_vm5, %v1485_v36, %v1486_v20  ;;  %v1491_v6 = vsel %vm1007_vm5, %v1486_v20, %v4322_v47  ;;  %v1389_v48 = vadd.f32 %v1373_v21, %v1307_v11 }
 0x2de   : > { %v1784_v5 = vadd.f32 1.4214138, %v1768_v0  ;;  %v1433_v37 = vadd.f32 %v1417_v4, %v1391_v58  ;;  %v1533_v7 = vsel %vm3635_vm6, %v1487_v9, 0.0  ;;  %v1535_v52 = vsel %vm3639_vm7, %v1491_v6, 0.0  ;;  %v2555_v9 = vld [vmem:[#allocation2 + $0x20] sm:$0xff] }
 0x2df   : > { %v1786_v19 = vadd.f32 1.4214138, %v1770_v43  ;;  %v1557_v59 = vmul.f32 %v3733_v42, %v1533_v7  ;;  %v835_v44 = vsel %vm832_vm2, %v833_v16, %v834_v14  ;;  %v1431_v54 = vadd.f32 %v1415_v12, %v1389_v48  ;;  %v1114_v48 = vld [vmem:[#allocation2 + $0x10] sm:$0x80] }
 0x2e0   : > { %v1800_v56 = vmul.f32 %v3695_v28, %v1784_v5  ;;  %v1559_v3 = vmul.f32 %v3733_v42, %v1535_v52  ;;  %v840_v25 = vsel %vm832_vm2, %v834_v14, %v4323_v22  ;;  %v883_v45 = vsel %vm3624_vm3, %v835_v44, 0.0  ;;  %v4325_v44 = vld [vmem:[#allocation31_spill] sm:$0xff] }
 0x2e1   : > { %v1802_v60 = vmul.f32 %v3705_v32, %v1786_v19  ;;  %v885_v50 = vsel %vm3628_vm4, %v840_v25, 0.0  ;;  %v949_v21 = vmul.f32 %v4285_v24, %v782_v17  ;;  %v1573_v26 = vadd.f32 %v1557_v59, %v1431_v54 }
 0x2e2   : > { %v1816_v63 = vadd.f32 -0.28449672, %v1800_v56  ;;  %v1575_v4 = vadd.f32 %v1559_v3, %v1433_v37  ;;  %v907_v12 = vmul.f32 %v3115_v1, %v883_v45  ;;  %v4324_v36 = vsel %vm3305_vm11, %v3543_v8, 0.0 }
 0x2e3   : > { %v3753_v20 = vmul.f32 %v4294_v13, %v4324_v36  ;;  %v1818_v0 = vadd.f32 -0.28449672, %v1802_v60  ;;  %v909_v11 = vmul.f32 %v3115_v1, %v885_v50  ;;  %v1008_v58 = vrot.slane %v981_v31, 1 }
 0x2e4   : > { %v1832_v16 = vmul.f32 %v3695_v28, %v1816_v63  ;;  %v3758_v17 = vadd.f32 %v4284_v61, %v1573_v26  ;;  %v3761_v43 = vadd.f32 %v4284_v61, %v1575_v4  ;;  %v951_v47 = vmul.f32 %v2555_v9, %v4285_v24 }
 0x2e5   : > { %v1624_v8 = vmul.f32 0.5, %v3619_v23  ;;  %v3766_v6 = vmul.f32 0.5, %v3622_v57  ;;  %v1834_v14 = vmul.f32 %v3705_v32, %v1818_v0  ;;  %v1009_v5 = vrot.slane %v2555_v9, 1 }
 0x2e6   : > { %v1848_v37 = vadd.f32 0.2548296, %v1832_v16  ;;  %vm1976_vm10 = vcmp.ge.f32.partialorder %v3633_v55, 0.0  ;;  %v3771_v7 = vmul.f32 0.70710677, %v3758_v17  ;;  %v965_v19 = vadd.f32 %v949_v21, %v907_v12 }
 0x2e7   : > { %v1850_v52 = vadd.f32 0.2548296, %v1834_v14  ;;  %v3774_v59 = vmul.f32 0.70710677, %v3761_v43  ;;  %v1010_v23 = vsel %vm1007_vm5, %v1008_v58, %v1009_v5  ;;  %v1015_v57 = vsel %vm1007_vm5, %v1009_v5, %v4325_v44 }
 0x2e8   : > { %v1864_v56 = vmul.f32 %v3695_v28, %v1848_v37  ;;  %v1649_v54 = vand.u32 2147483647, %v3771_v7  ;;  %v967_v3 = vadd.f32 %v951_v47, %v909_v11  ;;  %v1058_v25 = vsel %vm3635_vm6, %v1010_v23, 0.0 }
 0x2e9   : > { %v1866_v31 = vmul.f32 %v3705_v32, %v1850_v52  ;;  %v1651_v60 = vand.u32 2147483647, %v3774_v59  ;;  %v1060_v45 = vsel %vm3639_vm7, %v1015_v57, 0.0  ;;  %v1122_v50 = vrot.slane %v1114_v48, 7 }
 0x2ea   : > { %v1944_v21 = vmul.f32 %v3708_v40, %v1864_v56  ;;  %v1665_v63 = vmul.f32 0.3275911, %v1649_v54  ;;  %v1873_v26 = vsub.f32 0.0, %v1649_v54  ;;  %v1082_v28 = vmul.f32 %v3182_v18, %v1058_v25 }
 0x2eb   : > { %v1946_v4 = vmul.f32 %v3716_v41, %v1866_v31  ;;  %v1667_v12 = vmul.f32 0.3275911, %v1651_v60  ;;  %v1875_v36 = vsub.f32 0.0, %v1651_v60  ;;  %v1084_v0 = vmul.f32 %v3182_v18, %v1060_v45  ;;  %v1238_v31 = vld [vmem:[#allocation2 + $0x20] sm:$0xfe] }
 0x2ec   : > { %v1960_v11 = vsub.f32 1.0, %v1944_v21  ;;  %vm1978_vm12 = vcmp.ge.f32.partialorder %v3646_v51, 0.0  ;;  %v1681_v32 = vadd.f32 1.0, %v1665_v63  ;;  %v1889_v58 = vmul.f32 %v1873_v26, %v1649_v54  ;;  %v4326_v54 = vld [vmem:[#allocation28_spill] sm:$0xff]  ;;  %v1322_v45 = vld [vmem:[#allocation2 + $0x20] sm:$0x80] }
 0x2ed   : > { %v1962_v16 = vsub.f32 1.0, %v1946_v4  ;;  %v1683_v47 = vadd.f32 1.0, %v1667_v12  ;;  %v1891_v14 = vmul.f32 %v1875_v36, %v1651_v60  ;;  %v1098_v5 = vadd.f32 %v1082_v28, %v965_v19  ;;  %v2556_v63 = vld [vmem:[#allocation2 + $0x30] sm:$0xff] }
 0x2ee   : > { %v1992_v40 = vsub.f32 0.0, %v1960_v11  ;;  %2516 = vrcp.f32 %v1681_v32  ;;  %v1906_v48 = vmul.f32 1.442695, %v1889_v58  ;;  %v1123_v37 = vsel %vm832_vm2, %v1122_v50, %v4323_v22  ;;  %v4327_v36 = vld [vmem:[#allocation33_spill] sm:$0xff] }
 0x2ef   : > { %v1994_v41 = vsub.f32 0.0, %v1962_v16  ;;  %2518 = vrcp.f32 %v1683_v47  ;;  %v1100_v52 = vadd.f32 %v1084_v0, %v967_v3  ;;  %v1140_v23 = vsel %vm3624_vm3, %v1123_v37, 0.0  ;;  %v4328_v47 = vld [vmem:[#allocation29_spill] sm:$0xff]  ;;  %v4329_v37 = vld [vmem:[#allocation26_spill] sm:$0xff] }
 0x2f0   : > { %v2008_v57 = vsel %vm1976_vm10, %v1960_v11, %v1992_v40  ;;  %v3798_v56 = vmul.f32 1.442695, %v1891_v14  ;;  %v1142_v19 = vsel %vm3628_vm4, %v4326_v54, 0.0  ;;  %v1164_v25 = vmul.f32 %v4294_v13, %v1140_v23  ;;  %v1448_v40 = vld [vmem:[#allocation2 + $0x40] sm:$0xff] }
 0x2f1   : > { %v2010_v22 = vsel %vm1978_vm12, %v1962_v16, %v1994_v41  ;;  %v2024_v60 = vadd.f32 1.0, %v2008_v57  ;;  %2520 = vpow2.f32 %v1906_v48  ;;  %v1166_v3 = vmul.f32 %v4294_v13, %v1142_v19  ;;  %v2557_v54 = vld [vmem:[#allocation2 + $0x40] sm:$0xff] }
 0x2f2   : > { %v2026_v50 = vadd.f32 1.0, %v2010_v22  ;;  %v1180_v55 = vadd.f32 %v1164_v25, %v1098_v5  ;;  %v1206_v21 = vmul.f32 %v2555_v9, %v4295_v35  ;;  %v1208_v26 = vmul.f32 %v2556_v63, %v4295_v35  ;;  %v1446_v5 = vld [vmem:[#allocation2 + $0x30] sm:$0xfe] }
 0x2f3   : > { %v2040_v28 = vmul.f32 %v2024_v60, %v1624_v8  ;;  %v1182_v4 = vadd.f32 %v1166_v3, %v1100_v52  ;;  %v1248_v12 = vrot.slane %v1238_v31, 1  ;;  %v1268_v51 = vsel %vm3639_vm7, %v4327_v36, 0.0  ;;  %v4330_v52 = vld [vmem:[#allocation38_spill] sm:$0xff]  ;;  %v4331_v3 = vld [vmem:[#allocation11_spill] sm:$0xff]  ;;  %v4333_v36 = vld [vmem:[#allocation32_spill] sm:$0xff] }
 0x2f4   : > { %v2042_v0 = vmul.f32 %v2026_v50, %v3766_v6  ;;  %v1222_v11 = vadd.f32 %v1206_v21, %v1180_v55  ;;  %v1292_v32 = vmul.f32 %v4296_v53, %v1268_v51  ;;  %v1330_v58 = vrot.slane %v1322_v45, 7 }
 0x2f5   : > { %v1224_v16 = vadd.f32 %v1208_v26, %v1182_v4  ;;  %v1249_v9 = vsel %vm1007_vm5, %v1248_v12, %v4325_v44  ;;  %v1350_v8 = vsel %vm3628_vm4, %v4328_v47, 0.0  ;;  %v1414_v14 = vmul.f32 %v2556_v63, %v4299_v34  ;;  %v4332_v26 = vld [vmem:[#allocation17_spill] sm:$0xff] }
 0x2f6   : > { %v2052_v48 = vpack.c.bf16 %v2042_v0, %v2040_v28  ;;  %v1266_v6 = vsel %vm3635_vm6, %v1249_v9, 0.0  ;;  %v1331_v41 = vsel %vm832_vm2, %v1330_v58, %v4329_v37  ;;  %v1374_v23 = vmul.f32 %v4330_v52, %v1350_v8 }
 0x2f7   : > { %v1290_v57 = vmul.f32 %v4296_v53, %v1266_v6  ;;  %v1308_v44 = vadd.f32 %v1292_v32, %v1224_v16  ;;  %v1348_v27 = vsel %vm3624_vm3, %v1331_v41, 0.0  ;;  %v1416_v19 = vmul.f32 %v2557_v54, %v4299_v34  ;;  %v1117_v41 = vld [vmem:[#allocation2 + $0x98] sm:$0x7f] }
 0x2f8   : > { %v3829_v25 = vpop.eup %2516  ;;  %2240 = vmatmul.mubr.bf16.gmra.mrb[4].mxu1 %v2052_v48  ;;  %v1372_v31 = vmul.f32 %v4330_v52, %v1348_v27  ;;  %v1482_v22 = vrot.slane %v1446_v5, 1  ;;  %v1483_v60 = vrot.slane %v1448_v40, 1  ;;  %v663_v45 = vadd.s32 56, %v4331_v3  ;;  %v3850_v5 = vld [vmem:[%s4109_s5 + $0x10] ss:$0 sm:$0xff]  ;;  %v2560_v27 = vld [vmem:[#allocation2 + $0x88] sm:$0xff] }
 0x2f9   : > { %v3833_v50 = vpop.eup %2518  ;;  %v1729_v55 = vmul.f32 1.0614054, %v3829_v25  ;;  %v1306_v21 = vadd.f32 %v1290_v57, %v1222_v11  ;;  %v1390_v63 = vadd.f32 %v1374_v23, %v1308_v44  ;;  %v962_v28 = vmul.f32 %v2558_v46, %v4332_v26  ;;  %v4336_v57 = vld [vmem:[#allocation41_spill] sm:$0xff] }
 0x2fa   : > { %v1731_v4 = vmul.f32 1.0614054, %v3833_v50  ;;  %v1484_v12 = vsel %vm1007_vm5, %v1482_v22, %v1483_v60  ;;  %v1489_v51 = vsel %vm1007_vm5, %v1483_v60, %v4333_v36  ;;  %v717_v0 = vand.u32 7, %v663_v45 }
 0x2fb   : > { %v3841_v32 = vpop.eup %2520  ;;  %v1745_v58 = vadd.f32 -1.4531521, %v1729_v55  ;;  %v1388_v16 = vadd.f32 %v1372_v31, %v1306_v21  ;;  %v1432_v9 = vadd.f32 %v1416_v19, %v1390_v63  ;;  %v1532_v11 = vsel %vm3635_vm6, %v1484_v12, 0.0  ;;  %v4337_v19 = vld [vmem:[#allocation42_spill] sm:$0xff]  ;;  %v4338_v55 = vld [vmem:[#allocation24_spill] sm:$0xff] }
 0x2fc   : > { %v1747_v47 = vadd.f32 -1.4531521, %v1731_v4  ;;  %v1534_v8 = vsel %vm3639_vm7, %v1489_v51, 0.0  ;;  %v1556_v40 = vmul.f32 %v3850_v5, %v1532_v11  ;;  %vm3853_vm13 = vcmp.ge.s32.totalorder %v717_v0, 1  ;;  %v4339_v4 = vld [vmem:[#allocation34_spill] sm:$0xff] }
 0x2fd   : > { %v1761_v6 = vmul.f32 %v3829_v25, %v1745_v58  ;;  %2522 = vpow2.f32 %v3798_v56  ;;  %v1430_v38 = vadd.f32 %v1414_v14, %v1388_v16  ;;  %v1558_v37 = vmul.f32 %v3850_v5, %v1534_v8  ;;  %v4343_v58 = vld [vmem:[#allocation44_spill] sm:$0xff] }
 0x2fe   : > { %v1763_v23 = vmul.f32 %v3833_v50, %v1747_v47  ;;  %v898_v44 = vsel %vm3853_vm13, %v4336_v57, 0.0  ;;  %v964_v54 = vmul.f32 %v2560_v27, %v4332_v26  ;;  %v978_v31 = vadd.f32 %v962_v28, %v4337_v19 }
 0x2ff   : > { %v1777_v22 = vadd.f32 1.4214138, %v1761_v6  ;;  %v1572_v60 = vadd.f32 %v1556_v40, %v1430_v38  ;;  %v1574_v3 = vadd.f32 %v1558_v37, %v1432_v9  ;;  %v922_v56 = vmul.f32 %v4316_v29, %v898_v44  ;;  %v4342_v29 = vld [vmem:[#allocation43_spill] sm:$0xff] }
 0x300   : > { %v1779_v14 = vadd.f32 1.4214138, %v1763_v23  ;;  %v1040_v45 = vrot.slane %v984_v49, 1  ;;  %v1111_v21 = vadd.f32 %v4338_v55, %v978_v31  ;;  %v1132_v63 = vrot.slane %v1117_v41, 7  ;;  %v4344_v9 = vld [vmem:[#allocation23_spill] sm:$0xff] }
 0x301   : > { %v1793_v46 = vmul.f32 %v3829_v25, %v1777_v22  ;;  %v3870_v12 = vadd.f32 %v4339_v4, %v1572_v60  ;;  %v3873_v36 = vadd.f32 %v4339_v4, %v1574_v3  ;;  %vm3875_vm15 = vcmp.le.s32.totalorder %v717_v0, 6 }
 0x302   : > { %v1795_v28 = vmul.f32 %v3833_v50, %v1779_v14  ;;  %v1041_v51 = vsel %vm1007_vm5, %v4342_v29, %v1040_v45  ;;  %v1133_v16 = vsel %vm832_vm2, %v4343_v58, %v1132_v63  ;;  %v1193_v11 = vadd.f32 %v4344_v9, %v1111_v21 }
 0x303   : > { %v3886_v47 = vmul.f32 0.5, %v3758_v17  ;;  %v1809_v8 = vadd.f32 -0.28449672, %v1793_v46  ;;  %v3889_v40 = vmul.f32 0.70710677, %v3870_v12  ;;  %v980_v0 = vadd.f32 %v964_v54, %v922_v56 }
 0x304   : > { %v1811_v6 = vadd.f32 -0.28449672, %v1795_v28  ;;  %v3892_v38 = vmul.f32 0.70710677, %v3873_v36  ;;  %v1073_v37 = vsel %vm3875_vm15, %v1041_v51, 0.0  ;;  %v1155_v49 = vsel %vm3853_vm13, %v1133_v16, 0.0 }
 0x305   : > { %v3899_v41 = vmul.f32 0.5, %v3761_v43  ;;  %v1825_v17 = vmul.f32 %v3829_v25, %v1809_v8  ;;  %v1648_v23 = vand.u32 2147483647, %v3889_v40  ;;  %v1097_v57 = vmul.f32 %v2964_v30, %v1073_v37  ;;  %v1197_v28 = vld [vmem:[#allocation2 + $0x98] sm:$0xff]  ;;  %v1241_v8 = vld [vmem:[#allocation2 + $0xa8] sm:$0x1] }
 0x306   : > { %v1827_v44 = vmul.f32 %v3833_v50, %v1811_v6  ;;  %vm1969_vm1 = vcmp.ge.f32.partialorder %v3771_v7, 0.0  ;;  %v1650_v54 = vand.u32 2147483647, %v3892_v38  ;;  %v1179_v19 = vmul.f32 %v3007_v33, %v1155_v49 }
 0x307   : > { %v2523_v31 = vpop.eup %2522  ;;  %v1841_v22 = vadd.f32 0.2548296, %v1825_v17  ;;  %v1664_v60 = vmul.f32 0.3275911, %v1648_v23  ;;  %v1872_v3 = vsub.f32 0.0, %v1648_v23  ;;  %v1113_v43 = vadd.f32 %v1097_v57, %v980_v0 }
 0x308   : > { %v1843_v56 = vadd.f32 0.2548296, %v1827_v44  ;;  %v1666_v14 = vmul.f32 0.3275911, %v1650_v54  ;;  %v1874_v45 = vsub.f32 0.0, %v1650_v54  ;;  %v1219_v55 = vmul.f32 %v2560_v27, %v3018_v10 }
 0x309   : > { %v1857_v30 = vmul.f32 %v3829_v25, %v1841_v22  ;;  %v1680_v21 = vadd.f32 1.0, %v1664_v60  ;;  %v1888_v63 = vmul.f32 %v1872_v3, %v1648_v23  ;;  %v1195_v46 = vadd.f32 %v1179_v19, %v1113_v43  ;;  %v1325_v27 = vld [vmem:[#allocation2 + $0xa8] sm:$0x7f] }
 0x30a   : > { %v1859_v51 = vmul.f32 %v3833_v50, %v1843_v56  ;;  %v1682_v16 = vadd.f32 1.0, %v1666_v14  ;;  %v1890_v33 = vmul.f32 %v1874_v45, %v1650_v54  ;;  %v1221_v9 = vmul.f32 %v3018_v10, %v1197_v28 }
 0x30b   : > { %v1937_v0 = vmul.f32 %v3841_v32, %v1857_v30  ;;  %vm1971_vm3 = vcmp.ge.f32.partialorder %v3774_v59, 0.0  ;;  %2524 = vrcp.f32 %v1680_v21  ;;  %v1904_v6 = vmul.f32 1.442695, %v1888_v63  ;;  %v1405_v30 = vld [vmem:[#allocation2 + $0xa8] sm:$0xff] }
 0x30c   : > { %v1939_v37 = vmul.f32 %v2523_v31, %v1859_v51  ;;  %2526 = vrcp.f32 %v1682_v16  ;;  %v3914_v25 = vmul.f32 1.442695, %v1890_v33  ;;  %v1235_v49 = vadd.f32 %v1219_v55, %v1193_v11 }
 0x30d   : > { %v1953_v17 = vsub.f32 1.0, %v1937_v0  ;;  %v1237_v23 = vadd.f32 %v1221_v9, %v1195_v46  ;;  %v1254_v50 = vrot.slane %v1197_v28, 1  ;;  %v1258_v57 = vrot.slane %v1241_v8, 1 }
 0x30e   : > { %v1955_v44 = vsub.f32 1.0, %v1939_v37  ;;  %2528 = vpow2.f32 %v1904_v6  ;;  %v1336_v10 = vrot.slane %v1197_v28, 7  ;;  %v1340_v54 = vrot.slane %v1325_v27, 7 }
 0x30f   : > { %v1985_v19 = vsub.f32 0.0, %v1953_v17  ;;  %v1255_v32 = vsel %vm1007_vm5, %v4342_v29, %v1254_v50  ;;  %v1259_v22 = vsel %vm1007_vm5, %v1254_v50, %v1258_v57  ;;  %v1427_v31 = vmul.f32 %v4280_v15, %v1197_v28  ;;  %v1463_v28 = vld [vmem:[#allocation2 + $0xb8] sm:$0x1]  ;;  %v4347_v57 = vld [vmem:[#allocation13_spill] sm:$0xff] }
 0x310   : > { %v1987_v60 = vsub.f32 0.0, %v1955_v44  ;;  %v1279_v11 = vsel %vm3392_vm14, %v1255_v32, 0.0  ;;  %v1281_v43 = vsel %vm3875_vm15, %v1259_v22, 0.0  ;;  %v1337_v56 = vsel %vm832_vm2, %v4343_v58, %v1336_v10  ;;  %v983_v32 = vld [vmem:[#allocation2 + $0x90] sm:$0x1] }
 0x311   : > { %v2001_v14 = vsel %vm1969_vm1, %v1953_v17, %v1985_v19  ;;  %v1303_v45 = vmul.f32 %v3023_v39, %v1279_v11  ;;  %v1305_v29 = vmul.f32 %v3023_v39, %v1281_v43  ;;  %v1341_v55 = vsel %vm832_vm2, %v1336_v10, %v1340_v54  ;;  %v4346_v17 = vld [vmem:[#allocation30_spill] sm:$0xff]  ;;  %v1116_v22 = vld [vmem:[#allocation2 + $0x90] sm:$0x7f] }
 0x312   : > { %v2003_v21 = vsel %vm1971_vm3, %v1955_v44, %v1987_v60  ;;  %v2017_v63 = vadd.f32 1.0, %v2001_v14  ;;  %v1361_v46 = vsel %vm3305_vm11, %v1337_v56, 0.0  ;;  %v1363_v58 = vsel %vm3853_vm13, %v1341_v55, 0.0 }
 0x313   : > { %v2019_v7 = vadd.f32 1.0, %v2003_v21  ;;  %v1319_v51 = vadd.f32 %v1303_v45, %v1235_v49  ;;  %v1321_v16 = vadd.f32 %v1305_v29, %v1237_v23  ;;  %v1385_v33 = vmul.f32 %v3042_v62, %v1361_v46  ;;  %v4349_v29 = vld [vmem:[#allocation35_spill] sm:$0xff]  ;;  %v4350_v21 = vld [vmem:[#allocation36_spill] sm:$0xff] }
 0x314   : > { %v2033_v39 = vmul.f32 %v2017_v63, %v3886_v47  ;;  %v1387_v9 = vmul.f32 %v3042_v62, %v1363_v58  ;;  %v1429_v59 = vmul.f32 %v4280_v15, %v1405_v30  ;;  %v1510_v8 = vrot.slane %v1405_v30, 1 }
 0x315   : > { %v3941_v0 = vpop.eup %2524  ;;  %v2035_v6 = vmul.f32 %v2019_v7, %v3899_v41  ;;  %v1401_v27 = vadd.f32 %v1385_v33, %v1319_v51  ;;  %v1514_v37 = vrot.slane %v1463_v28, 1  ;;  %v897_v49 = vsel %vm3853_vm13, %v4346_v17, 0.0 }
 0x316   : > { %v3947_v23 = vpop.eup %2526  ;;  %v1728_v50 = vmul.f32 1.0614054, %v3941_v0  ;;  %v1403_v47 = vadd.f32 %v1387_v9, %v1321_v16  ;;  %v4348_v62 = vrot.slane %v4347_v57, 1  ;;  %v921_v44 = vmul.f32 %v3115_v1, %v897_v49  ;;  %v4351_v16 = vld [vmem:[#allocation12_spill] sm:$0xff] }
 0x317   : > { %v2049_v10 = vpack.c.bf16 %v2035_v6, %v2033_v39  ;;  %v1730_v41 = vmul.f32 1.0614054, %v3947_v23  ;;  %v1443_v54 = vadd.f32 %v1427_v31, %v1401_v27  ;;  %v1515_v19 = vsel %vm1007_vm5, %v1510_v8, %v1514_v37 }
 0x318   : > { %v1511_v15 = vsel %vm1007_vm5, %v4348_v62, %v1510_v8  ;;  %v3956_v60 = vpop.eup %2528  ;;  %v1744_v11 = vadd.f32 -1.4531521, %v1728_v50  ;;  %v1445_v43 = vadd.f32 %v1429_v59, %v1403_v47  ;;  %v1547_v14 = vsel %vm3875_vm15, %v1515_v19, 0.0  ;;  %v4353_v59 = vld [vmem:[#allocation46_spill] sm:$0xff]  ;;  %v4354_v50 = vld [vmem:[#allocation39_spill] sm:$0xff] }
 0x319   : > { %v1545_v56 = vsel %vm3392_vm14, %v1511_v15, 0.0  ;;  %2223 = vmatprep.mubr.bf16.mxu0 %v2049_v10  ;;  %v1746_v1 = vadd.f32 -1.4531521, %v1730_v41  ;;  %v1571_v31 = vmul.f32 %v3733_v42, %v1547_v14  ;;  %v961_v55 = vmul.f32 %v4349_v29, %v4285_v24 }
 0x31a   : > { %v1569_v45 = vmul.f32 %v3733_v42, %v1545_v56  ;;  %v1760_v30 = vmul.f32 %v3941_v0, %v1744_v11  ;;  %v963_v63 = vmul.f32 %v4350_v21, %v4285_v24  ;;  %v1038_v46 = vrot.slane %v983_v32, 1  ;;  %v4352_v42 = vld [vmem:[#allocation27_spill] sm:$0xff] }
 0x31b   : > { %v1130_v58 = vrot.slane %v1116_v22, 7  ;;  %v1762_v28 = vmul.f32 %v3947_v23, %v1746_v1  ;;  %v1587_v51 = vadd.f32 %v1571_v31, %v1445_v43  ;;  %v977_v33 = vadd.f32 %v961_v55, %v4351_v16  ;;  %v1240_v1 = vld [vmem:[#allocation2 + $0xa0] sm:$0x1] }
 0x31c   : > { %v1585_v7 = vadd.f32 %v1569_v45, %v1443_v54  ;;  %v1776_v39 = vadd.f32 1.4214138, %v1760_v30  ;;  %2530 = vpow2.f32 %v3914_v25  ;;  %v1039_v9 = vsel %vm1007_vm5, %v4352_v42, %v1038_v46 }
 0x31d   : > { %v1131_v8 = vsel %vm832_vm2, %v4353_v59, %v1130_v58  ;;  %v1778_v6 = vadd.f32 1.4214138, %v1762_v28  ;;  %v3980_v27 = vadd.f32 %v4284_v61, %v1587_v51  ;;  %v1072_v37 = vsel %vm3875_vm15, %v1039_v9, 0.0 }
 0x31e   : > { %v3977_v24 = vadd.f32 %v4284_v61, %v1585_v7  ;;  %v1792_v17 = vmul.f32 %v3941_v0, %v1776_v39  ;;  %v979_v49 = vadd.f32 %v963_v63, %v921_v44  ;;  %v1096_v25 = vmul.f32 %v3182_v18, %v1072_v37 }
 0x31f   : > { %v1110_v47 = vadd.f32 %v4354_v50, %v977_v33  ;;  %v1794_v57 = vmul.f32 %v3947_v23, %v1778_v6  ;;  %v1154_v15 = vsel %vm3853_vm13, %v1131_v8, 0.0  ;;  %v3994_v10 = vmul.f32 0.70710677, %v3980_v27 }
 0x320   : > { %v3989_v62 = vmul.f32 0.70710677, %v3977_v24  ;;  %v1808_v61 = vadd.f32 -0.28449672, %v1792_v17  ;;  %v3997_v41 = vmul.f32 0.5, %v3870_v12  ;;  %v1112_v22 = vadd.f32 %v1096_v25, %v979_v49 }
 0x321   : > { %v1810_v44 = vadd.f32 -0.28449672, %v1794_v57  ;;  %v1192_v54 = vadd.f32 %v3753_v20, %v1110_v47  ;;  %v1663_v32 = vand.u32 2147483647, %v3994_v10  ;;  %v1178_v11 = vmul.f32 %v4294_v13, %v1154_v15  ;;  %v1196_v20 = vld [vmem:[#allocation2 + $0x90] sm:$0xff] }
 0x322   : > { %v1661_v18 = vand.u32 2147483647, %v3989_v62  ;;  %v1824_v19 = vmul.f32 %v3941_v0, %v1808_v61  ;;  %v4005_v43 = vmul.f32 0.5, %v3873_v36  ;;  %vm1968_vm4 = vcmp.ge.f32.partialorder %v3889_v40, 0.0 }
 0x323   : > { %v1826_v56 = vmul.f32 %v3947_v23, %v1810_v44  ;;  %v1679_v31 = vmul.f32 0.3275911, %v1663_v32  ;;  %v1218_v29 = vmul.f32 %v4350_v21, %v4295_v35  ;;  %vm1970_vm6 = vcmp.ge.f32.partialorder %v3892_v38, 0.0 }
 0x324   : > { %v1677_v14 = vmul.f32 0.3275911, %v1661_v18  ;;  %v1885_v12 = vsub.f32 0.0, %v1661_v18  ;;  %v1840_v45 = vadd.f32 0.2548296, %v1824_v19  ;;  %v1887_v30 = vsub.f32 0.0, %v1663_v32 }
 0x325   : > { %v1842_v55 = vadd.f32 0.2548296, %v1826_v56  ;;  %v1695_v46 = vadd.f32 1.0, %v1679_v31  ;;  %v1194_v58 = vadd.f32 %v1178_v11, %v1112_v22  ;;  %v1220_v28 = vmul.f32 %v4295_v35, %v1196_v20  ;;  %v1404_v19 = vld [vmem:[#allocation2 + $0xa0] sm:$0xff]  ;;  %v1462_v22 = vld [vmem:[#allocation2 + $0xb0] sm:$0x1] }
 0x326   : > { %v1693_v13 = vadd.f32 1.0, %v1677_v14  ;;  %v2531_v36 = vpop.eup %2530  ;;  %v1856_v63 = vmul.f32 %v3941_v0, %v1840_v45  ;;  %v1901_v51 = vmul.f32 %v1885_v12, %v1661_v18  ;;  %v1252_v16 = vrot.slane %v1196_v20, 1  ;;  %v1324_v0 = vld [vmem:[#allocation2 + $0xa0] sm:$0x7f] }
 0x327   : > { %v1858_v7 = vmul.f32 %v3947_v23, %v1842_v55  ;;  %v1234_v21 = vadd.f32 %v1218_v29, %v1192_v54  ;;  %v1256_v39 = vrot.slane %v1240_v1, 1  ;;  %v1903_v8 = vmul.f32 %v1887_v30, %v1663_v32 }
 0x328   : > { %2532 = vrcp.f32 %v1693_v13  ;;  %v1936_v33 = vmul.f32 %v3956_v60, %v1856_v63  ;;  %v1253_v6 = vsel %vm1007_vm5, %v4352_v42, %v1252_v16  ;;  %v1334_v37 = vrot.slane %v1196_v20, 7 }
 0x329   : > { %2534 = vrcp.f32 %v1695_v46  ;;  %v1938_v9 = vmul.f32 %v2531_v36, %v1858_v7  ;;  %v1236_v49 = vadd.f32 %v1220_v28, %v1194_v58  ;;  %v1257_v35 = vsel %vm1007_vm5, %v1252_v16, %v1256_v39  ;;  %v4355_v46 = vld [vmem:[#allocation37_spill] sm:$0xff] }
 0x32a   : > { %v1952_v17 = vsub.f32 1.0, %v1936_v33  ;;  %v1278_v23 = vsel %vm3392_vm14, %v1253_v6, 0.0  ;;  %v1280_v60 = vsel %vm3875_vm15, %v1257_v35, 0.0  ;;  %v1335_v47 = vsel %vm832_vm2, %v4353_v59, %v1334_v37 }
 0x32b   : > { %v1954_v25 = vsub.f32 1.0, %v1938_v9  ;;  %v1302_v50 = vmul.f32 %v4296_v53, %v1278_v23  ;;  %v1304_v42 = vmul.f32 %v4296_v53, %v1280_v60  ;;  %v1338_v15 = vrot.slane %v1324_v0, 7 }
 0x32c   : > { %v1984_v57 = vsub.f32 0.0, %v1952_v17  ;;  %v1360_v61 = vsel %vm3305_vm11, %v1335_v47, 0.0  ;;  %v1426_v32 = vmul.f32 %v4299_v34, %v1196_v20  ;;  %v1428_v53 = vmul.f32 %v4299_v34, %v1404_v19 }
 0x32d   : > { %v1986_v44 = vsub.f32 0.0, %v1954_v25  ;;  %v1318_v18 = vadd.f32 %v1302_v50, %v1234_v21  ;;  %v1384_v54 = vmul.f32 %v4330_v52, %v1360_v61  ;;  %v1320_v56 = vadd.f32 %v1304_v42, %v1236_v49 }
 0x32e   : > { %v2000_v11 = vsel %vm1968_vm4, %v1952_v17, %v1984_v57  ;;  %v1339_v59 = vsel %vm832_vm2, %v1334_v37, %v1338_v15  ;;  %v1508_v20 = vrot.slane %v1404_v19, 1  ;;  %v1512_v29 = vrot.slane %v1462_v22, 1 }
 0x32f   : > { %v2002_v2 = vsel %vm1970_vm6, %v1954_v25, %v1986_v44  ;;  %v2016_v14 = vadd.f32 1.0, %v2000_v11  ;;  %v1362_v12 = vsel %vm3853_vm13, %v1339_v59, 0.0  ;;  %v1400_v1 = vadd.f32 %v1384_v54, %v1318_v18 }
 0x330   : > { %v2018_v45 = vadd.f32 1.0, %v2002_v2  ;;  %v1386_v31 = vmul.f32 %v4330_v52, %v1362_v12  ;;  %v1930_v13 = vmul.f32 1.442695, %v1901_v51  ;;  %v1934_v30 = vmul.f32 1.442695, %v1903_v8 }
 0x331   : > { %v2032_v55 = vmul.f32 %v2016_v14, %v3997_v41  ;;  %v4356_v58 = vrot.slane %v4355_v46, 1  ;;  %v1442_v7 = vadd.f32 %v1426_v32, %v1400_v1  ;;  %v1513_v52 = vsel %vm1007_vm5, %v1508_v20, %v1512_v29 }
 0x332   : > { %v2533_v40 = vpop.eup %2532  ;;  %v2034_v34 = vmul.f32 %v2018_v45, %v4005_v43  ;;  %v1402_v63 = vadd.f32 %v1386_v31, %v1320_v56  ;;  %v1546_v21 = vsel %vm3875_vm15, %v1513_v52, 0.0  ;;  %2536 = vpow2.f32 %v1930_v13 }
 0x333   : > { %v2535_v36 = vpop.eup %2534  ;;  %v1741_v38 = vmul.f32 1.0614054, %v2533_v40  ;;  %v1509_v48 = vsel %vm1007_vm5, %v4356_v58, %v1508_v20  ;;  %v1570_v9 = vmul.f32 %v3850_v5, %v1546_v21  ;;  %2538 = vpow2.f32 %v1934_v30 }
 0x334   : > { %v1743_v28 = vmul.f32 1.0614054, %v2535_v36  ;;  %v1544_v16 = vsel %vm3392_vm14, %v1509_v48, 0.0  ;;  %v2048_v33 = vpack.c.bf16 %v2034_v34, %v2032_v55  ;;  %v1444_v51 = vadd.f32 %v1428_v53, %v1402_v63 }
 0x335   : > { %v1757_v41 = vadd.f32 -1.4531521, %v1741_v38  ;;  %v1568_v39 = vmul.f32 %v3850_v5, %v1544_v16  ;;  %vm1981_vm2 = vcmp.ge.f32.partialorder %v3989_v62, 0.0  ;;  %vm1983_vm5 = vcmp.ge.f32.partialorder %v3994_v10, 0.0 }
 0x336   : > { %v1759_v43 = vadd.f32 -1.4531521, %v1743_v28  ;;  %2224 = vmatmul.mubr.bf16.vlgmr.msra.gmra.mrb[16].mxu0 %v2048_v33  ;;  %v1586_v37 = vadd.f32 %v1570_v9, %v1444_v51  ;;  %v1629_v31 = vmul.f32 0.5, %v3977_v24  ;;  %v1631_v29 = vmul.f32 0.5, %v3980_v27 }
 0x337   : > { %v1773_v8 = vmul.f32 %v2533_v40, %v1757_v41  ;;  %v1584_v0 = vadd.f32 %v1568_v39, %v1442_v7 }
 0x338   : > { %v1775_v6 = vmul.f32 %v2535_v36, %v1759_v43  ;;  %v4056_v26 = vadd.f32 %v4339_v4, %v1586_v37 }
 0x339   : > { %v1789_v17 = vadd.f32 1.4214138, %v1773_v8  ;;  %v4053_v49 = vadd.f32 %v4339_v4, %v1584_v0 }
 0x33a   : > { %v1791_v3 = vadd.f32 1.4214138, %v1775_v6  ;;  %v4062_v60 = vmul.f32 0.70710677, %v4056_v26 }
 0x33b   : > { %v1805_v35 = vmul.f32 %v2533_v40, %v1789_v17  ;;  %v4059_v25 = vmul.f32 0.70710677, %v4053_v49 }
 0x33c   : > { %v1807_v23 = vmul.f32 %v2535_v36, %v1791_v3  ;;  %v1662_v42 = vand.u32 2147483647, %v4062_v60  ;;  %v2537_v18 = vpop.eup %2536  ;;  %vm1982_vm14 = vcmp.ge.f32.partialorder %v4062_v60, 0.0 }
 0x33d   : > { %v1821_v5 = vadd.f32 -0.28449672, %v1805_v35  ;;  %v1660_v47 = vand.u32 2147483647, %v4059_v25  ;;  %v2539_v32 = vpop.eup %2538  ;;  %vm1980_vm11 = vcmp.ge.f32.partialorder %v4059_v25, 0.0 }
 0x33e   : > { %v1823_v50 = vadd.f32 -0.28449672, %v1807_v23  ;;  %v1678_v4 = vmul.f32 0.3275911, %v1662_v42  ;;  %v1886_v45 = vsub.f32 0.0, %v1662_v42 }
 0x33f   : > { %v1837_v57 = vmul.f32 %v2533_v40, %v1821_v5  ;;  %v1676_v61 = vmul.f32 0.3275911, %v1660_v47  ;;  %v1884_v12 = vsub.f32 0.0, %v1660_v47  ;;  %v2353_v25 = vld [vmem:[%s4112_s8] ss:$0 sm:$0xff] }
 0x340   : > { %v1839_v15 = vmul.f32 %v2535_v36, %v1823_v50  ;;  %v1694_v11 = vadd.f32 1.0, %v1678_v4  ;;  %v1902_v34 = vmul.f32 %v1886_v45, %v1662_v42  ;;  %v1628_v42 = vmul.f32 0.5, %v4053_v49 }
 0x341   : > { %v1853_v44 = vadd.f32 0.2548296, %v1837_v57  ;;  %v1692_v19 = vadd.f32 1.0, %v1676_v61  ;;  %v1900_v30 = vmul.f32 %v1884_v12, %v1660_v47  ;;  %v1630_v61 = vmul.f32 0.5, %v4056_v26 }
 0x342   : > { %v1855_v54 = vadd.f32 0.2548296, %v1839_v15  ;;  %v1932_v52 = vmul.f32 1.442695, %v1902_v34 }
 0x343   : > { %v1869_v22 = vmul.f32 %v2533_v40, %v1853_v44  ;;  %2540 = vrcp.f32 %v1692_v19  ;;  %v1928_v10 = vmul.f32 1.442695, %v1900_v30 }
 0x344   : > { %v1871_v56 = vmul.f32 %v2535_v36, %v1855_v54  ;;  %2542 = vrcp.f32 %v1694_v11 }
 0x345   : > { %v1949_v59 = vmul.f32 %v2537_v18, %v1869_v22  ;;  %2544 = vpow2.f32 %v1928_v10 }
 0x346   : > { %v1951_v53 = vmul.f32 %v2539_v32, %v1871_v56  ;;  %2546 = vpow2.f32 %v1932_v52 }
 0x347   : > { %v1965_v2 = vsub.f32 1.0, %v1949_v59 }
 0x348   : > { %v1967_v14 = vsub.f32 1.0, %v1951_v53 }
 0x349   : > { %v1997_v1 = vsub.f32 0.0, %v1965_v2 }
 0x34a   : > { %v1999_v20 = vsub.f32 0.0, %v1967_v14 }
 0x34b   : > { %v2013_v40 = vsel %vm1981_vm2, %v1965_v2, %v1997_v1  ;;  %v4357_v2 = vld [vmem:[#allocation4_spill] sm:$0xff]  ;;  %v4358_v1 = vld [vmem:[#allocation6_spill] sm:$0xff] }
 0x34c   : > { %v2015_v55 = vsel %vm1983_vm5, %v1967_v14, %v1999_v20  ;;  %v2029_v13 = vadd.f32 1.0, %v2013_v40 }
 0x34d   : > { %v2031_v36 = vadd.f32 1.0, %v2015_v55  ;;  %v2541_v38 = vpop.eup %2540 }
 0x34e   : > { %v2045_v63 = vmul.f32 %v2029_v13, %v1629_v31  ;;  %v2543_v46 = vpop.eup %2542  ;;  %v1740_v58 = vmul.f32 1.0614054, %v2541_v38 }
 0x34f   : > { %v2047_v62 = vmul.f32 %v2031_v36, %v1631_v29  ;;  %v1742_v48 = vmul.f32 1.0614054, %v2543_v46  ;;  %v2545_v0 = vpop.eup %2544  ;;  %v4359_v36 = vld [vmem:[#allocation7_spill] sm:$0xff] }
 0x350   : > { %v1756_v7 = vadd.f32 -1.4531521, %v1740_v58  ;;  %v2547_v17 = vpop.eup %2546 }
 0x351   : > { %v2055_v28 = vpack.c.bf16 %v2047_v62, %v2045_v63  ;;  %v1758_v24 = vadd.f32 -1.4531521, %v1742_v48  ;;  %v4360_v63 = vld [vmem:[#allocation8_spill] sm:$0xff] }
 0x352   : > { %v1772_v16 = vmul.f32 %v2541_v38, %v1756_v7 }
 0x353   : > { %2247 = vmatprep.mubr.bf16.mxu1 %v2055_v28  ;;  %v1774_v27 = vmul.f32 %v2543_v46, %v1758_v24  ;;  %v4361_v24 = vld [vmem:[#allocation3_spill] sm:$0xff] }
 0x354   : > { %v1788_v33 = vadd.f32 1.4214138, %v1772_v16 }
 0x355   : > { %v1790_v41 = vadd.f32 1.4214138, %v1774_v27 }
 0x356   : > { %v1804_v51 = vmul.f32 %v2541_v38, %v1788_v33  ;;  %v4362_v33 = vld [vmem:[#allocation5_spill] sm:$0xff] }
 0x357   : > { %v1806_v21 = vmul.f32 %v2543_v46, %v1790_v41 }
 0x358   : > { %v1820_v43 = vadd.f32 -0.28449672, %v1804_v51 }
 0x359   : > { %v1822_v39 = vadd.f32 -0.28449672, %v1806_v21 }
 0x35a   : > { %v1836_v9 = vmul.f32 %v2541_v38, %v1820_v43 }
 0x35b   : > { %v1838_v8 = vmul.f32 %v2543_v46, %v1822_v39 }
 0x35c   : > { %v1852_v6 = vadd.f32 0.2548296, %v1836_v9 }
 0x35d   : > { %v1854_v37 = vadd.f32 0.2548296, %v1838_v8 }
 0x35e   : > { %v1868_v3 = vmul.f32 %v2541_v38, %v1852_v6 }
 0x35f   : > { %v1870_v35 = vmul.f32 %v2543_v46, %v1854_v37 }
 0x360   : > { %v1948_v23 = vmul.f32 %v2545_v0, %v1868_v3  ;;  %v4363_v0 = vld [vmem:[#allocation9_spill] sm:$0xff]  ;;  %v4364_v3 = vld [vmem:[#allocation10_spill] sm:$0xff] }
 0x361   : > { %v1950_v5 = vmul.f32 %v2547_v17, %v1870_v35 }
 0x362   : > { %v1964_v50 = vsub.f32 1.0, %v1948_v23 }
 0x363   : > { %v1966_v47 = vsub.f32 1.0, %v1950_v5 }
 0x364   : > { %v1996_v57 = vsub.f32 0.0, %v1964_v50 }
 0x365   : > { %v1998_v15 = vsub.f32 0.0, %v1966_v47 }
 0x366   : > { %v2012_v44 = vsel %vm1980_vm11, %v1964_v50, %v1996_v57 }
 0x367   : > { %v2014_v4 = vsel %vm1982_vm14, %v1966_v47, %v1998_v15  ;;  %v2028_v18 = vadd.f32 1.0, %v2012_v44 }
 0x368   : > { %v2030_v54 = vadd.f32 1.0, %v2014_v4 }
 0x369   : > { %v2044_v19 = vmul.f32 %v2028_v18, %v1628_v42 }
 0x36a   : > { %v2046_v32 = vmul.f32 %v2030_v54, %v1630_v61 }
 0x36c   : > { %v2054_v22 = vpack.c.bf16 %v2046_v32, %v2044_v19 }
 0x36e   : > { %2248 = vmatmul.mubr.bf16.gmra.mrb[8].mxu1 %v2054_v22 }
 0x392   : > { %v2396_v11 = vpop.f32.mrb[0].mxu1 }
 0x393   : > { %v2397_v60 = vpop.f32.mrb[1].mxu1 }
 0x394   : > { %v2398_v49 = vadd.f32 %v2397_v60, %v2396_v11  ;;  %v2399_v56 = vpop.f32.mrb[2].mxu1 }
 0x395   : > { %v2400_v59 = vpop.f32.mrb[3].mxu1 }
 0x396   : > { %v2234_v26 = vadd.f32 %v2398_v49, %v2353_v25  ;;  %v2401_v53 = vadd.f32 %v2400_v59, %v2399_v56 }
 0x398   : > { %v2258_v14 = vadd.f32 %v2234_v26, %v4357_v2  ;;  %v2237_v12 = vadd.f32 %v2401_v53, %v2353_v25 }
 0x39a   : > { %2266 = vst.msk [vmem:[%s2639_s18 + $0x10] sm:$0xff] %vm344_vm0, %v2258_v14  ;;  %v2259_v45 = vadd.f32 %v2237_v12, %v4358_v1 }
 0x39c   : > { %2267 = vst.msk [vmem:[%s2639_s18 + $0x18] sm:$0xff] %vm344_vm0, %v2259_v45 }
 0x3cb   : > { %v2402_v31 = vpop.f32.mrb[4].mxu1 }
 0x3cc   : > { %v2403_v20 = vpop.f32.mrb[5].mxu1 }
 0x3cd   : > { %v2404_v29 = vadd.f32 %v2403_v20, %v2402_v31  ;;  %v2405_v40 = vpop.f32.mrb[6].mxu1 }
 0x3ce   : > { %v2406_v55 = vpop.f32.mrb[7].mxu1 }
 0x3cf   : > { %v2242_v13 = vadd.f32 %v2404_v29, %v2353_v25  ;;  %v2407_v30 = vadd.f32 %v2406_v55, %v2405_v40 }
 0x3d1   : > { %v2260_v34 = vadd.f32 %v2242_v13, %v4359_v36  ;;  %v2245_v38 = vadd.f32 %v2407_v30, %v2353_v25 }
 0x3d3   : > { %2268 = vst.msk [vmem:[%s2639_s18 + $0x20] sm:$0xff] %vm344_vm0, %v2260_v34  ;;  %v2261_v46 = vadd.f32 %v2245_v38, %v4360_v63 }
 0x3d5   : > { %2269 = vst.msk [vmem:[%s2639_s18 + $0x28] sm:$0xff] %vm344_vm0, %v2261_v46 }
 0x409   : > { %v2390_v62 = vpop.f32.mrb[16].mxu0 }
 0x40a   : > { %v2391_v58 = vpop.f32.mrb[17].mxu0 }
 0x40b   : > { %v2392_v48 = vadd.f32 %v2391_v58, %v2390_v62  ;;  %v2393_v10 = vpop.f32.mrb[18].mxu0 }
 0x40c   : > { %v2394_v28 = vpop.f32.mrb[19].mxu0 }
 0x40d   : > { %v2226_v7 = vadd.f32 %v2392_v48, %v2353_v25  ;;  %v2395_v52 = vadd.f32 %v2394_v28, %v2393_v10 }
 0x40f   : > { %v2256_v16 = vadd.f32 %v2226_v7, %v4361_v24  ;;  %v2229_v27 = vadd.f32 %v2395_v52, %v2353_v25 }
 0x411   : > { %2264 = vst.msk [vmem:[%s2639_s18] sm:$0xff] %vm344_vm0, %v2256_v16  ;;  %v2257_v41 = vadd.f32 %v2229_v27, %v4362_v33 }
 0x413   : > { %2265 = vst.msk [vmem:[%s2639_s18 + $0x8] sm:$0xff] %vm344_vm0, %v2257_v41 }
 0x441   : > { %v2408_v51 = vpop.f32.mrb[8].mxu1 }
 0x442   : > { %v2409_v21 = vpop.f32.mrb[9].mxu1 }
 0x443   : > { %v2410_v43 = vadd.f32 %v2409_v21, %v2408_v51  ;;  %v2411_v39 = vpop.f32.mrb[10].mxu1 }
 0x444   : > { %v2412_v9 = vpop.f32.mrb[11].mxu1 }
 0x445   : > { %v2250_v8 = vadd.f32 %v2410_v43, %v2353_v25  ;;  %v2413_v6 = vadd.f32 %v2412_v9, %v2411_v39 }
 0x447   : > { %v2262_v37 = vadd.f32 %v2250_v8, %v4363_v0  ;;  %v2253_v17 = vadd.f32 %v2413_v6, %v2353_v25 }
 0x449   : > { %2270 = vst.msk [vmem:[%s2639_s18 + $0x30] sm:$0xff] %vm344_vm0, %v2262_v37  ;;  %v2263_v35 = vadd.f32 %v2253_v17, %v4364_v3 }
 0x44b   : > { %2271 = vst.msk [vmem:[%s2639_s18 + $0x38] sm:$0xff] %vm344_vm0, %v2263_v35 }
 0x44c PF: > { %s19_s30 = sadd.s32 1, %s2567_s30  }
 0x44d   : > { %p16_p5 = scmp.ge.s32.totalorder %s19_s30, 4  }
 0x44f   :  { %18 = sbr.rel (!%p16_p5) target bundleno = 1 (0x1), region = 90 }

</bundles_post_ra>
